<compile_context>
chip_gen: v7x
topology: tpu7x:2x2x1
jax: 0.10.0
libtpu: 0.0.40
codegen_flags: <defaults>
</compile_context>

<pallas_src>
import functools

import jax
import jax.numpy as jnp
from jax import lax
from jax.experimental import pallas as pl
from jax.experimental.pallas import tpu as pltpu

BN_EPS = 1e-5
MXU_DTYPE = jnp.bfloat16      # native MXU path on v5e/v6e/v7x; accumulation stays f32
ACT_DTYPE = jnp.bfloat16      # dtype of the y1/y2 intermediates in HBM

# TODO(synk): narrow-channel configs (C < 128, e.g. this demo's C=4) underuse lanes/MXU;
#             pad channels to 128 or use a spatial-on-lanes VPU path for those. The module
#             default C=128 maps cleanly onto the lane dimension.
# TODO(synk): only the batch dimension is tiled; very large per-sample H*W*C would need a
#             halo'd spatial grid axis (also helps v7x's two TensorCores when N is tiny).


def _round_up(x, m):
    return (x + m - 1) // m * m


def _conv3x3_flat(s_val, scr_ref, w_ref, B, H, W):
    """3x3 SAME conv of a flat activation slab s_val (B*H*W, Cin) against w_ref (9, Cin, Cout).

    s_val is written once into the halo-padded flat scratch; each tap is then a constant
    row-offset window of that slab, masked at the H/W borders (SAME zero padding) and fed
    to an accumulated bf16 MXU matmul.  Returns (B*H*W, Cout) float32.
    """
    M, C = s_val.shape
    pad = (scr_ref.shape[0] - M) // 2

    zeros_band = jnp.zeros((pad, C), jnp.float32)
    scr_ref[pl.ds(0, pad), :] = zeros_band           # halo bands (masked anyway; keep clean)
    scr_ref[pl.ds(pad + M, pad), :] = zeros_band
    scr_ref[pl.ds(pad, M), :] = s_val                # aligned interior store

    # Border-validity masks, built once per tile.
    hi = lax.broadcasted_iota(jnp.int32, (B, H, W, C), 1).reshape(M, C)
    wi = lax.broadcasted_iota(jnp.int32, (B, H, W, C), 2).reshape(M, C)
    h_ok = {-1: hi >= 1, 0: None, 1: hi <= H - 2}
    w_ok = {-1: wi >= 1, 0: None, 1: wi <= W - 2}

    acc = None
    t = 0
    for oy in (-1, 0, 1):
        for ox in (-1, 0, 1):
            off = oy * W + ox
            if oy == 0 and ox == 0:
                tap = s_val                          # center tap: already in registers
            else:
                tap = scr_ref[pl.ds(pad + off, M), :]
            mask = h_ok[oy]
            if w_ok[ox] is not None:
                mask = w_ok[ox] if mask is None else jnp.logical_and(mask, w_ok[ox])
            if mask is not None:
                tap = jnp.where(mask, tap, 0.0)
            part = jnp.dot(tap.astype(w_ref.dtype), w_ref[t],
                           preferred_element_type=jnp.float32)
            acc = part if acc is None else acc + part
            t += 1
    return acc


def _conv1_kernel(x_ref, w_ref, y_ref, s_ref, ss_ref, scr_ref):
    B, H, W, C = x_ref.shape
    s_val = x_ref[...].astype(jnp.float32).reshape(B * H * W, C)
    acc = _conv3x3_flat(s_val, scr_ref, w_ref, B, H, W)
    # Per-tile partial BN statistics from the f32 accumulator.
    s_ref[...] = jnp.sum(acc, axis=0, keepdims=True)[None]
    ss_ref[...] = jnp.sum(acc * acc, axis=0, keepdims=True)[None]
    y_ref[...] = acc.reshape(B, H, W, acc.shape[-1]).astype(y_ref.dtype)


def _bn_relu_conv2_kernel(y1_ref, scale_ref, shift_ref, w_ref,
                          y2_ref, s_ref, ss_ref, scr_ref):
    B, H, W, C = y1_ref.shape
    scale = scale_ref[...].reshape(1, 1, 1, C)
    shift = shift_ref[...].reshape(1, 1, 1, C)
    h1 = jnp.maximum(y1_ref[...].astype(jnp.float32) * scale + shift, 0.0)  # BN1 + ReLU
    acc = _conv3x3_flat(h1.reshape(B * H * W, C), scr_ref, w_ref, B, H, W)  # conv2
    s_ref[...] = jnp.sum(acc, axis=0, keepdims=True)[None]
    ss_ref[...] = jnp.sum(acc * acc, axis=0, keepdims=True)[None]
    y2_ref[...] = acc.reshape(B, H, W, acc.shape[-1]).astype(y2_ref.dtype)


def _bn_relu_add_kernel(y2_ref, x_ref, scale_ref, shift_ref, o_ref):
    B, H, W, C = y2_ref.shape
    scale = scale_ref[...].reshape(1, 1, 1, C)
    shift = shift_ref[...].reshape(1, 1, 1, C)
    h2 = y2_ref[...].astype(jnp.float32) * scale + shift                     # BN2
    o_ref[...] = (jnp.maximum(h2, 0.0) + x_ref[...].astype(jnp.float32)).astype(o_ref.dtype)


def _vmem_capacity_bytes():
    try:
        info = pltpu.get_tpu_info()
        cap = int(getattr(info, "vmem_capacity_bytes", 0) or 0)
        if cap > 0:
            return cap
    except Exception:
        pass
    return 64 * 1024 * 1024          # conservative fallback (v7x per-core VMEM)


def _pick_batch_tile(n, h, w, c, budget_bytes):
    """Largest divisor of n whose per-step footprint stays within budget_bytes."""
    fixed = 2 * 2 * 9 * c * c                       # double-buffered bf16 conv weights
    per_sample = h * w * c * 24                     # f32 scratch + dbl-buffered in/out + acc
    tile = max(1, min(n, (budget_bytes - fixed) // max(per_sample, 1)))
    while n % tile:
        tile -= 1
    return int(tile)


def _stats_to_affine(s, ss, count, gamma, beta):
    """Fold global batch stats into a per-channel affine (scale, shift) for BN."""
    mean = s.sum(axis=0) / count                    # (1, C)
    var = ss.sum(axis=0) / count - mean * mean      # biased (training-mode) variance
    # NOTE: E[x^2]-E[x]^2 in f32; switch to a centered two-pass form if activations are huge.
    rstd = lax.rsqrt(var + BN_EPS)
    scale = gamma * rstd
    shift = beta - mean * scale
    return scale.astype(jnp.float32), shift.astype(jnp.float32)


def residue_block_nhwc(x, w1, g1, bt1, w2, g2, bt2, *, batch_tile=None):
    """x: (N, H, W, C) f32 NHWC; w*: (3, 3, Cin, Cout) HWIO; g*/bt*: (1, C).

    Conv biases are intentionally omitted: with training-mode BatchNorm right after each
    conv the bias cancels exactly in the mean subtraction."""
    N, H, W, C = x.shape
    assert w1.shape[-1] == C and w2.shape[-1] == C, "residual add needs in_channels == out_channels"

    vmem_cap = _vmem_capacity_bytes()
    tile_n = (_pick_batch_tile(N, H, W, C, vmem_cap // 4)
              if batch_tile is None else int(batch_tile))
    assert N % tile_n == 0
    nt = N // tile_n
    count = float(N * H * W)

    M = tile_n * H * W
    pad = _round_up(W + 1, 8)                 # halo rows in the flat scratch (>= max tap offset)
    scr_rows = M + 2 * pad

    # Tap-major weights (dy*3 + dx, Cin, Cout), cast once to the MXU dtype.
    w1t = w1.reshape(9, C, C).astype(MXU_DTYPE)
    w2t = w2.reshape(9, C, C).astype(MXU_DTYPE)

    cparams = pltpu.CompilerParams(
        dimension_semantics=("parallel",),              # megacore sharding where available
        vmem_limit_bytes=int(vmem_cap * 3 // 4),
    )

    act_blk = pl.BlockSpec((tile_n, H, W, C), lambda i: (i, 0, 0, 0))
    w_spec = pl.BlockSpec((9, C, C), lambda i: (0, 0, 0))
    vec_spec = pl.BlockSpec((1, C), lambda i: (0, 0))
    stat_spec = pl.BlockSpec((1, 1, C), lambda i: (i, 0, 0))
    stat_shape = jax.ShapeDtypeStruct((nt, 1, C), jnp.float32)
    act_shape = jax.ShapeDtypeStruct((N, H, W, C), ACT_DTYPE)
    scr = pltpu.VMEM((scr_rows, C), jnp.float32)

    # ---- pass 1: conv1 (+ partial BN1 statistics) -------------------------------------
    y1, s1, ss1 = pl.pallas_call(
        _conv1_kernel,
        grid=(nt,),
        in_specs=[act_blk, w_spec],
        out_specs=(act_blk, stat_spec, stat_spec),
        out_shape=(act_shape, stat_shape, stat_shape),
        scratch_shapes=[scr],
        compiler_params=cparams,
    )(x, w1t)
    scale1, shift1 = _stats_to_affine(s1, ss1, count, g1, bt1)

    # ---- pass 2: BN1 + ReLU -> conv2 (+ partial BN2 statistics) ------------------------
    y2, s2, ss2 = pl.pallas_call(
        _bn_relu_conv2_kernel,
        grid=(nt,),
        in_specs=[act_blk, vec_spec, vec_spec, w_spec],
        out_specs=(act_blk, stat_spec, stat_spec),
        out_shape=(act_shape, stat_shape, stat_shape),
        scratch_shapes=[scr],
        compiler_params=cparams,
    )(y1, scale1, shift1, w2t)
    scale2, shift2 = _stats_to_affine(s2, ss2, count, g2, bt2)

    # ---- pass 3: BN2 + ReLU + residual add ---------------------------------------------
    out = pl.pallas_call(
        _bn_relu_add_kernel,
        grid=(nt,),
        in_specs=[act_blk, act_blk, vec_spec, vec_spec],
        out_specs=act_blk,
        out_shape=jax.ShapeDtypeStruct((N, H, W, C), x.dtype),
        compiler_params=cparams,
    )(y2, x, scale2, shift2)
    return out


@functools.partial(jax.jit, static_argnames=("batch_tile",))
def residue_block(x_nchw, w1, b1, g1, bt1, w2, b2, g2, bt2, *, batch_tile=None):
    """PyTorch-layout wrapper (x: N, C, H, W).  b1/b2 accepted for API parity but are
    mathematically absorbed by the training-mode BatchNorm following each conv."""
    del b1, b2
    x = jnp.transpose(x_nchw, (0, 2, 3, 1))
    out = residue_block_nhwc(x, w1, g1, bt1, w2, g2, bt2, batch_tile=batch_tile)
    return jnp.transpose(out, (0, 3, 1, 2))


def _reference(x_nchw, w1, b1, g1, bt1, w2, b2, g2, bt2):
    """Pure-JAX reference mirroring the PyTorch forward (training-mode BatchNorm)."""
    x = jnp.transpose(x_nchw, (0, 2, 3, 1))

    def conv(inp, w, b):
        o = lax.conv_general_dilated(inp, w, (1, 1), 'SAME',
                                     dimension_numbers=('NHWC', 'HWIO', 'NHWC'))
        return o + b.reshape(1, 1, 1, -1)

    def bn(h, g, beta):
        m = h.mean(axis=(0, 1, 2), keepdims=True)
        v = ((h - m) ** 2).mean(axis=(0, 1, 2), keepdims=True)
        return (h - m) * lax.rsqrt(v + BN_EPS) * g.reshape(1, 1, 1, -1) + beta.reshape(1, 1, 1, -1)

    h = jax.nn.relu(bn(conv(x, w1, b1), g1, bt1))
    h = bn(conv(h, w2, b2), g2, bt2)
    out = jax.nn.relu(h) + x
    return jnp.transpose(out, (0, 3, 1, 2))


if __name__ == "__main__":
    # Small shapes consistent with the module (in_channels == out_channels for the residual).
    N, C, H, W = 2, 4, 16, 16

    key = jax.random.PRNGKey(0)
    kx, k1, k2, k3, k4, k5, k6, k7, k8 = jax.random.split(key, 9)

    x = jax.random.normal(kx, (N, C, H, W), jnp.float32)

    fan_in = 3 * 3 * C
    scale = 1.0 / jnp.sqrt(jnp.float32(fan_in))
    w1 = jax.random.normal(k1, (3, 3, C, C), jnp.float32) * scale   # HWIO
    b1 = jax.random.normal(k2, (1, C), jnp.float32) * 0.1
    w2 = jax.random.normal(k3, (3, 3, C, C), jnp.float32) * scale
    b2 = jax.random.normal(k4, (1, C), jnp.float32) * 0.1
    g1 = 1.0 + 0.1 * jax.random.normal(k5, (1, C), jnp.float32)
    bt1 = 0.1 * jax.random.normal(k6, (1, C), jnp.float32)
    g2 = 1.0 + 0.1 * jax.random.normal(k7, (1, C), jnp.float32)
    bt2 = 0.1 * jax.random.normal(k8, (1, C), jnp.float32)

    ref = _reference(x, w1, b1, g1, bt1, w2, b2, g2, bt2)

    # batch_tile=1 -> grid of 2 batch tiles: exercises the pipelined/gridded path and the
    # cross-tile BN statistics reduction.  (bf16 MXU / bf16 intermediates => looser tol.)
    out = residue_block(x, w1, b1, g1, bt1, w2, b2, g2, bt2, batch_tile=1)
    out = jax.block_until_ready(out)
    assert out.shape == (N, C, H, W) and out.dtype == jnp.float32
    assert jnp.allclose(out, ref, atol=5e-2, rtol=5e-2), "mismatch vs pure-JAX reference (tiled)"

    # Default path: tile size derived from the chip's VMEM capacity (single tile here).
    out2 = residue_block(x, w1, b1, g1, bt1, w2, b2, g2, bt2)
    out2 = jax.block_until_ready(out2)
    assert jnp.allclose(out2, ref, atol=5e-2, rtol=5e-2), "mismatch vs pure-JAX reference (auto)"

    print("KERNEL_OK")
</pallas_src>

<mosaic_0001>
module attributes {stable_mosaic.version = 11 : i64} {
  func.func @_conv1_kernel(%arg0: i32, %arg1: memref<1x16x16x4xf32, #tpu.memory_space<vmem>>, %arg2: memref<9x4x4xbf16, #tpu.memory_space<vmem>>, %arg3: memref<1x16x16x4xbf16, #tpu.memory_space<vmem>>, %arg4: memref<1x1x4xf32, #tpu.memory_space<vmem>>, %arg5: memref<1x1x4xf32, #tpu.memory_space<vmem>>, %arg6: memref<304x4xf32, #tpu.memory_space<vmem>>) attributes {dimension_semantics = [#tpu.dimension_semantics<parallel>], iteration_bounds = array<i64: 2>, scalar_prefetch = 0 : i64, scratch_operands = 1 : i64, tpu.core_type = #tpu.core_type<tc>, window_params = [{transform_indices = @transform_0, window_bounds = array<i64: 1, 16, 16, 4>}, {pipeline_mode = #tpu.pipeline_mode<synchronous>, transform_indices = @transform_1, window_bounds = array<i64: 9, 4, 4>}, {transform_indices = @transform_2, window_bounds = array<i64: 1, 16, 16, 4>}, {transform_indices = @transform_3, window_bounds = array<i64: 1, 1, 4>}, {transform_indices = @transform_4, window_bounds = array<i64: 1, 1, 4>}]} {
    %c0 = arith.constant 0 : index
    %c0_0 = arith.constant 0 : index
    %c0_1 = arith.constant 0 : index
    %c0_2 = arith.constant 0 : index
    %0 = vector.load %arg1[%c0, %c0_0, %c0_1, %c0_2] : memref<1x16x16x4xf32, #tpu.memory_space<vmem>>, vector<1x16x16x4xf32>
    %1 = vector.shape_cast %0 : vector<1x16x16x4xf32> to vector<256x4xf32>
    %cst = arith.constant 0.000000e+00 : f32
    %2 = vector.broadcast %cst : f32 to vector<24x4xf32>
    %c0_3 = arith.constant 0 : index
    %c0_4 = arith.constant 0 : index
    %3 = vector.load %arg6[%c0_3, %c0_4] : memref<304x4xf32, #tpu.memory_space<vmem>>, vector<24x4xf32>
    tpu.vector_store %arg6[%c0_3, %c0_4], %2 {strides = array<i32>} : memref<304x4xf32, #tpu.memory_space<vmem>>, vector<24x4xf32>,
    %c280 = arith.constant 280 : index
    %c0_5 = arith.constant 0 : index
    %4 = vector.load %arg6[%c280, %c0_5] : memref<304x4xf32, #tpu.memory_space<vmem>>, vector<24x4xf32>
    tpu.vector_store %arg6[%c280, %c0_5], %2 {strides = array<i32>} : memref<304x4xf32, #tpu.memory_space<vmem>>, vector<24x4xf32>,
    %c24 = arith.constant 24 : index
    %c0_6 = arith.constant 0 : index
    %5 = vector.load %arg6[%c24, %c0_6] : memref<304x4xf32, #tpu.memory_space<vmem>>, vector<256x4xf32>
    tpu.vector_store %arg6[%c24, %c0_6], %1 {strides = array<i32>} : memref<304x4xf32, #tpu.memory_space<vmem>>, vector<256x4xf32>,
    %6 = tpu.iota {dimensions = array<i32: 1>} : vector<1x16x16x4xi32>
    %7 = vector.shape_cast %6 : vector<1x16x16x4xi32> to vector<256x4xi32>
    %8 = tpu.iota {dimensions = array<i32: 2>} : vector<1x16x16x4xi32>
    %9 = vector.shape_cast %8 : vector<1x16x16x4xi32> to vector<256x4xi32>
    %c1_i32 = arith.constant 1 : i32
    %10 = vector.broadcast %c1_i32 : i32 to vector<256x4xi32>
    %11 = arith.cmpi sge, %7, %10 : vector<256x4xi32>
    %c14_i32 = arith.constant 14 : i32
    %12 = vector.broadcast %c14_i32 : i32 to vector<256x4xi32>
    %13 = arith.cmpi sle, %7, %12 : vector<256x4xi32>
    %c1_i32_7 = arith.constant 1 : i32
    %14 = vector.broadcast %c1_i32_7 : i32 to vector<256x4xi32>
    %15 = arith.cmpi sge, %9, %14 : vector<256x4xi32>
    %c14_i32_8 = arith.constant 14 : i32
    %16 = vector.broadcast %c14_i32_8 : i32 to vector<256x4xi32>
    %17 = arith.cmpi sle, %9, %16 : vector<256x4xi32>
    %c7 = arith.constant 7 : index
    %c0_9 = arith.constant 0 : index
    %18 = vector.load %arg6[%c7, %c0_9] : memref<304x4xf32, #tpu.memory_space<vmem>>, vector<256x4xf32>
    %19 = arith.andi %11, %15 : vector<256x4xi1>
    %cst_10 = arith.constant 0.000000e+00 : f32
    %20 = vector.broadcast %cst_10 : f32 to vector<256x4xf32>
    %21 = arith.select %19, %18, %20 : vector<256x4xi1>, vector<256x4xf32>
    %22 = arith.truncf %21 : vector<256x4xf32> to vector<256x4xbf16>
    %c0_11 = arith.constant 0 : index
    %c0_12 = arith.constant 0 : index
    %c0_13 = arith.constant 0 : index
    %23 = vector.load %arg2[%c0_11, %c0_12, %c0_13] : memref<9x4x4xbf16, #tpu.memory_space<vmem>>, vector<1x4x4xbf16>
    %24 = vector.shape_cast %23 : vector<1x4x4xbf16> to vector<4x4xbf16>
    %cst_14 = arith.constant dense<0.000000e+00> : vector<256x4xf32>
    %25 = tpu.matmul %22, %24, %cst_14 {dimension_numbers = #tpu.dot_dimension_numbers<[1], [0], [0], [1], [0, 0, 1, 1], [], []>} : vector<256x4xbf16>, vector<4x4xbf16>, vector<256x4xf32> -> vector<256x4xf32>
    %c8 = arith.constant 8 : index
    %c0_15 = arith.constant 0 : index
    %26 = vector.load %arg6[%c8, %c0_15] : memref<304x4xf32, #tpu.memory_space<vmem>>, vector<256x4xf32>
    %cst_16 = arith.constant 0.000000e+00 : f32
    %27 = vector.broadcast %cst_16 : f32 to vector<256x4xf32>
    %28 = arith.select %11, %26, %27 : vector<256x4xi1>, vector<256x4xf32>
    %29 = arith.truncf %28 : vector<256x4xf32> to vector<256x4xbf16>
    %c1 = arith.constant 1 : index
    %c0_17 = arith.constant 0 : index
    %c0_18 = arith.constant 0 : index
    %30 = vector.load %arg2[%c1, %c0_17, %c0_18] : memref<9x4x4xbf16, #tpu.memory_space<vmem>>, vector<1x4x4xbf16>
    %31 = vector.shape_cast %30 : vector<1x4x4xbf16> to vector<4x4xbf16>
    %cst_19 = arith.constant dense<0.000000e+00> : vector<256x4xf32>
    %32 = tpu.matmul %29, %31, %cst_19 {dimension_numbers = #tpu.dot_dimension_numbers<[1], [0], [0], [1], [0, 0, 1, 1], [], []>} : vector<256x4xbf16>, vector<4x4xbf16>, vector<256x4xf32> -> vector<256x4xf32>
    %33 = arith.addf %25, %32 : vector<256x4xf32>
    %c9 = arith.constant 9 : index
    %c0_20 = arith.constant 0 : index
    %34 = vector.load %arg6[%c9, %c0_20] : memref<304x4xf32, #tpu.memory_space<vmem>>, vector<256x4xf32>
    %35 = arith.andi %11, %17 : vector<256x4xi1>
    %cst_21 = arith.constant 0.000000e+00 : f32
    %36 = vector.broadcast %cst_21 : f32 to vector<256x4xf32>
    %37 = arith.select %35, %34, %36 : vector<256x4xi1>, vector<256x4xf32>
    %38 = arith.truncf %37 : vector<256x4xf32> to vector<256x4xbf16>
    %c2 = arith.constant 2 : index
    %c0_22 = arith.constant 0 : index
    %c0_23 = arith.constant 0 : index
    %39 = vector.load %arg2[%c2, %c0_22, %c0_23] : memref<9x4x4xbf16, #tpu.memory_space<vmem>>, vector<1x4x4xbf16>
    %40 = vector.shape_cast %39 : vector<1x4x4xbf16> to vector<4x4xbf16>
    %cst_24 = arith.constant dense<0.000000e+00> : vector<256x4xf32>
    %41 = tpu.matmul %38, %40, %cst_24 {dimension_numbers = #tpu.dot_dimension_numbers<[1], [0], [0], [1], [0, 0, 1, 1], [], []>} : vector<256x4xbf16>, vector<4x4xbf16>, vector<256x4xf32> -> vector<256x4xf32>
    %42 = arith.addf %33, %41 : vector<256x4xf32>
    %c23 = arith.constant 23 : index
    %c0_25 = arith.constant 0 : index
    %43 = vector.load %arg6[%c23, %c0_25] : memref<304x4xf32, #tpu.memory_space<vmem>>, vector<256x4xf32>
    %cst_26 = arith.constant 0.000000e+00 : f32
    %44 = vector.broadcast %cst_26 : f32 to vector<256x4xf32>
    %45 = arith.select %15, %43, %44 : vector<256x4xi1>, vector<256x4xf32>
    %46 = arith.truncf %45 : vector<256x4xf32> to vector<256x4xbf16>
    %c3 = arith.constant 3 : index
    %c0_27 = arith.constant 0 : index
    %c0_28 = arith.constant 0 : index
    %47 = vector.load %arg2[%c3, %c0_27, %c0_28] : memref<9x4x4xbf16, #tpu.memory_space<vmem>>, vector<1x4x4xbf16>
    %48 = vector.shape_cast %47 : vector<1x4x4xbf16> to vector<4x4xbf16>
    %cst_29 = arith.constant dense<0.000000e+00> : vector<256x4xf32>
    %49 = tpu.matmul %46, %48, %cst_29 {dimension_numbers = #tpu.dot_dimension_numbers<[1], [0], [0], [1], [0, 0, 1, 1], [], []>} : vector<256x4xbf16>, vector<4x4xbf16>, vector<256x4xf32> -> vector<256x4xf32>
    %50 = arith.addf %42, %49 : vector<256x4xf32>
    %51 = arith.truncf %1 : vector<256x4xf32> to vector<256x4xbf16>
    %c4 = arith.constant 4 : index
    %c0_30 = arith.constant 0 : index
    %c0_31 = arith.constant 0 : index
    %52 = vector.load %arg2[%c4, %c0_30, %c0_31] : memref<9x4x4xbf16, #tpu.memory_space<vmem>>, vector<1x4x4xbf16>
    %53 = vector.shape_cast %52 : vector<1x4x4xbf16> to vector<4x4xbf16>
    %cst_32 = arith.constant dense<0.000000e+00> : vector<256x4xf32>
    %54 = tpu.matmul %51, %53, %cst_32 {dimension_numbers = #tpu.dot_dimension_numbers<[1], [0], [0], [1], [0, 0, 1, 1], [], []>} : vector<256x4xbf16>, vector<4x4xbf16>, vector<256x4xf32> -> vector<256x4xf32>
    %55 = arith.addf %50, %54 : vector<256x4xf32>
    %c25 = arith.constant 25 : index
    %c0_33 = arith.constant 0 : index
    %56 = vector.load %arg6[%c25, %c0_33] : memref<304x4xf32, #tpu.memory_space<vmem>>, vector<256x4xf32>
    %cst_34 = arith.constant 0.000000e+00 : f32
    %57 = vector.broadcast %cst_34 : f32 to vector<256x4xf32>
    %58 = arith.select %17, %56, %57 : vector<256x4xi1>, vector<256x4xf32>
    %59 = arith.truncf %58 : vector<256x4xf32> to vector<256x4xbf16>
    %c5 = arith.constant 5 : index
    %c0_35 = arith.constant 0 : index
    %c0_36 = arith.constant 0 : index
    %60 = vector.load %arg2[%c5, %c0_35, %c0_36] : memref<9x4x4xbf16, #tpu.memory_space<vmem>>, vector<1x4x4xbf16>
    %61 = vector.shape_cast %60 : vector<1x4x4xbf16> to vector<4x4xbf16>
    %cst_37 = arith.constant dense<0.000000e+00> : vector<256x4xf32>
    %62 = tpu.matmul %59, %61, %cst_37 {dimension_numbers = #tpu.dot_dimension_numbers<[1], [0], [0], [1], [0, 0, 1, 1], [], []>} : vector<256x4xbf16>, vector<4x4xbf16>, vector<256x4xf32> -> vector<256x4xf32>
    %63 = arith.addf %55, %62 : vector<256x4xf32>
    %c39 = arith.constant 39 : index
    %c0_38 = arith.constant 0 : index
    %64 = vector.load %arg6[%c39, %c0_38] : memref<304x4xf32, #tpu.memory_space<vmem>>, vector<256x4xf32>
    %65 = arith.andi %13, %15 : vector<256x4xi1>
    %cst_39 = arith.constant 0.000000e+00 : f32
    %66 = vector.broadcast %cst_39 : f32 to vector<256x4xf32>
    %67 = arith.select %65, %64, %66 : vector<256x4xi1>, vector<256x4xf32>
    %68 = arith.truncf %67 : vector<256x4xf32> to vector<256x4xbf16>
    %c6 = arith.constant 6 : index
    %c0_40 = arith.constant 0 : index
    %c0_41 = arith.constant 0 : index
    %69 = vector.load %arg2[%c6, %c0_40, %c0_41] : memref<9x4x4xbf16, #tpu.memory_space<vmem>>, vector<1x4x4xbf16>
    %70 = vector.shape_cast %69 : vector<1x4x4xbf16> to vector<4x4xbf16>
    %cst_42 = arith.constant dense<0.000000e+00> : vector<256x4xf32>
    %71 = tpu.matmul %68, %70, %cst_42 {dimension_numbers = #tpu.dot_dimension_numbers<[1], [0], [0], [1], [0, 0, 1, 1], [], []>} : vector<256x4xbf16>, vector<4x4xbf16>, vector<256x4xf32> -> vector<256x4xf32>
    %72 = arith.addf %63, %71 : vector<256x4xf32>
    %c40 = arith.constant 40 : index
    %c0_43 = arith.constant 0 : index
    %73 = vector.load %arg6[%c40, %c0_43] : memref<304x4xf32, #tpu.memory_space<vmem>>, vector<256x4xf32>
    %cst_44 = arith.constant 0.000000e+00 : f32
    %74 = vector.broadcast %cst_44 : f32 to vector<256x4xf32>
    %75 = arith.select %13, %73, %74 : vector<256x4xi1>, vector<256x4xf32>
    %76 = arith.truncf %75 : vector<256x4xf32> to vector<256x4xbf16>
    %c7_45 = arith.constant 7 : index
    %c0_46 = arith.constant 0 : index
    %c0_47 = arith.constant 0 : index
    %77 = vector.load %arg2[%c7_45, %c0_46, %c0_47] : memref<9x4x4xbf16, #tpu.memory_space<vmem>>, vector<1x4x4xbf16>
    %78 = vector.shape_cast %77 : vector<1x4x4xbf16> to vector<4x4xbf16>
    %cst_48 = arith.constant dense<0.000000e+00> : vector<256x4xf32>
    %79 = tpu.matmul %76, %78, %cst_48 {dimension_numbers = #tpu.dot_dimension_numbers<[1], [0], [0], [1], [0, 0, 1, 1], [], []>} : vector<256x4xbf16>, vector<4x4xbf16>, vector<256x4xf32> -> vector<256x4xf32>
    %80 = arith.addf %72, %79 : vector<256x4xf32>
    %c41 = arith.constant 41 : index
    %c0_49 = arith.constant 0 : index
    %81 = vector.load %arg6[%c41, %c0_49] : memref<304x4xf32, #tpu.memory_space<vmem>>, vector<256x4xf32>
    %82 = arith.andi %13, %17 : vector<256x4xi1>
    %cst_50 = arith.constant 0.000000e+00 : f32
    %83 = vector.broadcast %cst_50 : f32 to vector<256x4xf32>
    %84 = arith.select %82, %81, %83 : vector<256x4xi1>, vector<256x4xf32>
    %85 = arith.truncf %84 : vector<256x4xf32> to vector<256x4xbf16>
    %c8_51 = arith.constant 8 : index
    %c0_52 = arith.constant 0 : index
    %c0_53 = arith.constant 0 : index
    %86 = vector.load %arg2[%c8_51, %c0_52, %c0_53] : memref<9x4x4xbf16, #tpu.memory_space<vmem>>, vector<1x4x4xbf16>
    %87 = vector.shape_cast %86 : vector<1x4x4xbf16> to vector<4x4xbf16>
    %cst_54 = arith.constant dense<0.000000e+00> : vector<256x4xf32>
    %88 = tpu.matmul %85, %87, %cst_54 {dimension_numbers = #tpu.dot_dimension_numbers<[1], [0], [0], [1], [0, 0, 1, 1], [], []>} : vector<256x4xbf16>, vector<4x4xbf16>, vector<256x4xf32> -> vector<256x4xf32>
    %89 = arith.addf %80, %88 : vector<256x4xf32>
    %cst_55 = arith.constant dense<0.000000e+00> : vector<4xf32>
    %90 = vector.multi_reduction <add>, %89, %cst_55 [0] : vector<256x4xf32> to vector<4xf32>
    %91 = vector.shape_cast %90 : vector<4xf32> to vector<1x4xf32>
    %92 = vector.shape_cast %91 : vector<1x4xf32> to vector<1x1x4xf32>
    %c0_56 = arith.constant 0 : index
    %c0_57 = arith.constant 0 : index
    %c0_58 = arith.constant 0 : index
    %93 = vector.load %arg4[%c0_56, %c0_57, %c0_58] : memref<1x1x4xf32, #tpu.memory_space<vmem>>, vector<1x1x4xf32>
    tpu.vector_store %arg4[%c0_56, %c0_57, %c0_58], %92 {strides = array<i32>} : memref<1x1x4xf32, #tpu.memory_space<vmem>>, vector<1x1x4xf32>,
    %94 = arith.mulf %89, %89 : vector<256x4xf32>
    %cst_59 = arith.constant dense<0.000000e+00> : vector<4xf32>
    %95 = vector.multi_reduction <add>, %94, %cst_59 [0] : vector<256x4xf32> to vector<4xf32>
    %96 = vector.shape_cast %95 : vector<4xf32> to vector<1x4xf32>
    %97 = vector.shape_cast %96 : vector<1x4xf32> to vector<1x1x4xf32>
    %c0_60 = arith.constant 0 : index
    %c0_61 = arith.constant 0 : index
    %c0_62 = arith.constant 0 : index
    %98 = vector.load %arg5[%c0_60, %c0_61, %c0_62] : memref<1x1x4xf32, #tpu.memory_space<vmem>>, vector<1x1x4xf32>
    tpu.vector_store %arg5[%c0_60, %c0_61, %c0_62], %97 {strides = array<i32>} : memref<1x1x4xf32, #tpu.memory_space<vmem>>, vector<1x1x4xf32>,
    %99 = vector.shape_cast %89 : vector<256x4xf32> to vector<1x16x16x4xf32>
    %100 = arith.truncf %99 : vector<1x16x16x4xf32> to vector<1x16x16x4xbf16>
    %c0_63 = arith.constant 0 : index
    %c0_64 = arith.constant 0 : index
    %c0_65 = arith.constant 0 : index
    %c0_66 = arith.constant 0 : index
    %101 = vector.load %arg3[%c0_63, %c0_64, %c0_65, %c0_66] : memref<1x16x16x4xbf16, #tpu.memory_space<vmem>>, vector<1x16x16x4xbf16>
    tpu.vector_store %arg3[%c0_63, %c0_64, %c0_65, %c0_66], %100 {strides = array<i32>} : memref<1x16x16x4xbf16, #tpu.memory_space<vmem>>, vector<1x16x16x4xbf16>,
    return
  }
  func.func @transform_0(%arg0: i32) -> (i32, i32, i32, i32) {
    %c0_i32 = arith.constant 0 : i32
    %c0_i32_0 = arith.constant 0 : i32
    %c0_i32_1 = arith.constant 0 : i32
    %c0_i32_2 = arith.constant 0 : i32
    return %arg0, %c0_i32, %c0_i32_0, %c0_i32_1 : i32, i32, i32, i32
  }
  func.func @transform_1(%arg0: i32) -> (i32, i32, i32) {
    %c0_i32 = arith.constant 0 : i32
    %c0_i32_0 = arith.constant 0 : i32
    %c0_i32_1 = arith.constant 0 : i32
    %c0_i32_2 = arith.constant 0 : i32
    return %c0_i32, %c0_i32_0, %c0_i32_1 : i32, i32, i32
  }
  func.func @transform_2(%arg0: i32) -> (i32, i32, i32, i32) {
    %c0_i32 = arith.constant 0 : i32
    %c0_i32_0 = arith.constant 0 : i32
    %c0_i32_1 = arith.constant 0 : i32
    %c0_i32_2 = arith.constant 0 : i32
    return %arg0, %c0_i32, %c0_i32_0, %c0_i32_1 : i32, i32, i32, i32
  }
  func.func @transform_3(%arg0: i32) -> (i32, i32, i32) {
    %c0_i32 = arith.constant 0 : i32
    %c0_i32_0 = arith.constant 0 : i32
    %c0_i32_1 = arith.constant 0 : i32
    return %arg0, %c0_i32, %c0_i32_0 : i32, i32, i32
  }
  func.func @transform_4(%arg0: i32) -> (i32, i32, i32) {
    %c0_i32 = arith.constant 0 : i32
    %c0_i32_0 = arith.constant 0 : i32
    %c0_i32_1 = arith.constant 0 : i32
    return %arg0, %c0_i32, %c0_i32_0 : i32, i32, i32
  }
}

module attributes {stable_mosaic.version = 11 : i64} {
  func.func @_bn_relu_conv2_kernel(%arg0: i32, %arg1: memref<1x16x16x4xbf16, #tpu.memory_space<vmem>>, %arg2: memref<1x4xf32, #tpu.memory_space<vmem>>, %arg3: memref<1x4xf32, #tpu.memory_space<vmem>>, %arg4: memref<9x4x4xbf16, #tpu.memory_space<vmem>>, %arg5: memref<1x16x16x4xbf16, #tpu.memory_space<vmem>>, %arg6: memref<1x1x4xf32, #tpu.memory_space<vmem>>, %arg7: memref<1x1x4xf32, #tpu.memory_space<vmem>>, %arg8: memref<304x4xf32, #tpu.memory_space<vmem>>) attributes {dimension_semantics = [#tpu.dimension_semantics<parallel>], iteration_bounds = array<i64: 2>, scalar_prefetch = 0 : i64, scratch_operands = 1 : i64, tpu.core_type = #tpu.core_type<tc>, window_params = [{transform_indices = @transform_0, window_bounds = array<i64: 1, 16, 16, 4>}, {pipeline_mode = #tpu.pipeline_mode<synchronous>, transform_indices = @transform_1, window_bounds = array<i64: 1, 4>}, {pipeline_mode = #tpu.pipeline_mode<synchronous>, transform_indices = @transform_2, window_bounds = array<i64: 1, 4>}, {pipeline_mode = #tpu.pipeline_mode<synchronous>, transform_indices = @transform_3, window_bounds = array<i64: 9, 4, 4>}, {transform_indices = @transform_4, window_bounds = array<i64: 1, 16, 16, 4>}, {transform_indices = @transform_5, window_bounds = array<i64: 1, 1, 4>}, {transform_indices = @transform_6, window_bounds = array<i64: 1, 1, 4>}]} {
    %c0 = arith.constant 0 : index
    %c0_0 = arith.constant 0 : index
    %0 = vector.load %arg2[%c0, %c0_0] : memref<1x4xf32, #tpu.memory_space<vmem>>, vector<1x4xf32>
    %1 = vector.shape_cast %0 : vector<1x4xf32> to vector<1x1x1x4xf32>
    %c0_1 = arith.constant 0 : index
    %c0_2 = arith.constant 0 : index
    %2 = vector.load %arg3[%c0_1, %c0_2] : memref<1x4xf32, #tpu.memory_space<vmem>>, vector<1x4xf32>
    %3 = vector.shape_cast %2 : vector<1x4xf32> to vector<1x1x1x4xf32>
    %c0_3 = arith.constant 0 : index
    %c0_4 = arith.constant 0 : index
    %c0_5 = arith.constant 0 : index
    %c0_6 = arith.constant 0 : index
    %4 = vector.load %arg1[%c0_3, %c0_4, %c0_5, %c0_6] : memref<1x16x16x4xbf16, #tpu.memory_space<vmem>>, vector<1x16x16x4xbf16>
    %5 = arith.extf %4 : vector<1x16x16x4xbf16> to vector<1x16x16x4xf32>
    %6 = vector.broadcast %1 : vector<1x1x1x4xf32> to vector<1x16x16x4xf32>
    %7 = arith.mulf %5, %6 : vector<1x16x16x4xf32>
    %8 = vector.broadcast %3 : vector<1x1x1x4xf32> to vector<1x16x16x4xf32>
    %9 = arith.addf %7, %8 : vector<1x16x16x4xf32>
    %cst = arith.constant 0.000000e+00 : f32
    %10 = vector.broadcast %cst : f32 to vector<1x16x16x4xf32>
    %11 = arith.maximumf %9, %10 : vector<1x16x16x4xf32>
    %12 = vector.shape_cast %11 : vector<1x16x16x4xf32> to vector<256x4xf32>
    %cst_7 = arith.constant 0.000000e+00 : f32
    %13 = vector.broadcast %cst_7 : f32 to vector<24x4xf32>
    %c0_8 = arith.constant 0 : index
    %c0_9 = arith.constant 0 : index
    %14 = vector.load %arg8[%c0_8, %c0_9] : memref<304x4xf32, #tpu.memory_space<vmem>>, vector<24x4xf32>
    tpu.vector_store %arg8[%c0_8, %c0_9], %13 {strides = array<i32>} : memref<304x4xf32, #tpu.memory_space<vmem>>, vector<24x4xf32>,
    %c280 = arith.constant 280 : index
    %c0_10 = arith.constant 0 : index
    %15 = vector.load %arg8[%c280, %c0_10] : memref<304x4xf32, #tpu.memory_space<vmem>>, vector<24x4xf32>
    tpu.vector_store %arg8[%c280, %c0_10], %13 {strides = array<i32>} : memref<304x4xf32, #tpu.memory_space<vmem>>, vector<24x4xf32>,
    %c24 = arith.constant 24 : index
    %c0_11 = arith.constant 0 : index
    %16 = vector.load %arg8[%c24, %c0_11] : memref<304x4xf32, #tpu.memory_space<vmem>>, vector<256x4xf32>
    tpu.vector_store %arg8[%c24, %c0_11], %12 {strides = array<i32>} : memref<304x4xf32, #tpu.memory_space<vmem>>, vector<256x4xf32>,
    %17 = tpu.iota {dimensions = array<i32: 1>} : vector<1x16x16x4xi32>
    %18 = vector.shape_cast %17 : vector<1x16x16x4xi32> to vector<256x4xi32>
    %19 = tpu.iota {dimensions = array<i32: 2>} : vector<1x16x16x4xi32>
    %20 = vector.shape_cast %19 : vector<1x16x16x4xi32> to vector<256x4xi32>
    %c1_i32 = arith.constant 1 : i32
    %21 = vector.broadcast %c1_i32 : i32 to vector<256x4xi32>
    %22 = arith.cmpi sge, %18, %21 : vector<256x4xi32>
    %c14_i32 = arith.constant 14 : i32
    %23 = vector.broadcast %c14_i32 : i32 to vector<256x4xi32>
    %24 = arith.cmpi sle, %18, %23 : vector<256x4xi32>
    %c1_i32_12 = arith.constant 1 : i32
    %25 = vector.broadcast %c1_i32_12 : i32 to vector<256x4xi32>
    %26 = arith.cmpi sge, %20, %25 : vector<256x4xi32>
    %c14_i32_13 = arith.constant 14 : i32
    %27 = vector.broadcast %c14_i32_13 : i32 to vector<256x4xi32>
    %28 = arith.cmpi sle, %20, %27 : vector<256x4xi32>
    %c7 = arith.constant 7 : index
    %c0_14 = arith.constant 0 : index
    %29 = vector.load %arg8[%c7, %c0_14] : memref<304x4xf32, #tpu.memory_space<vmem>>, vector<256x4xf32>
    %30 = arith.andi %22, %26 : vector<256x4xi1>
    %cst_15 = arith.constant 0.000000e+00 : f32
    %31 = vector.broadcast %cst_15 : f32 to vector<256x4xf32>
    %32 = arith.select %30, %29, %31 : vector<256x4xi1>, vector<256x4xf32>
    %33 = arith.truncf %32 : vector<256x4xf32> to vector<256x4xbf16>
    %c0_16 = arith.constant 0 : index
    %c0_17 = arith.constant 0 : index
    %c0_18 = arith.constant 0 : index
    %34 = vector.load %arg4[%c0_16, %c0_17, %c0_18] : memref<9x4x4xbf16, #tpu.memory_space<vmem>>, vector<1x4x4xbf16>
    %35 = vector.shape_cast %34 : vector<1x4x4xbf16> to vector<4x4xbf16>
    %cst_19 = arith.constant dense<0.000000e+00> : vector<256x4xf32>
    %36 = tpu.matmul %33, %35, %cst_19 {dimension_numbers = #tpu.dot_dimension_numbers<[1], [0], [0], [1], [0, 0, 1, 1], [], []>} : vector<256x4xbf16>, vector<4x4xbf16>, vector<256x4xf32> -> vector<256x4xf32>
    %c8 = arith.constant 8 : index
    %c0_20 = arith.constant 0 : index
    %37 = vector.load %arg8[%c8, %c0_20] : memref<304x4xf32, #tpu.memory_space<vmem>>, vector<256x4xf32>
    %cst_21 = arith.constant 0.000000e+00 : f32
    %38 = vector.broadcast %cst_21 : f32 to vector<256x4xf32>
    %39 = arith.select %22, %37, %38 : vector<256x4xi1>, vector<256x4xf32>
    %40 = arith.truncf %39 : vector<256x4xf32> to vector<256x4xbf16>
    %c1 = arith.constant 1 : index
    %c0_22 = arith.constant 0 : index
    %c0_23 = arith.constant 0 : index
    %41 = vector.load %arg4[%c1, %c0_22, %c0_23] : memref<9x4x4xbf16, #tpu.memory_space<vmem>>, vector<1x4x4xbf16>
    %42 = vector.shape_cast %41 : vector<1x4x4xbf16> to vector<4x4xbf16>
    %cst_24 = arith.constant dense<0.000000e+00> : vector<256x4xf32>
    %43 = tpu.matmul %40, %42, %cst_24 {dimension_numbers = #tpu.dot_dimension_numbers<[1], [0], [0], [1], [0, 0, 1, 1], [], []>} : vector<256x4xbf16>, vector<4x4xbf16>, vector<256x4xf32> -> vector<256x4xf32>
    %44 = arith.addf %36, %43 : vector<256x4xf32>
    %c9 = arith.constant 9 : index
    %c0_25 = arith.constant 0 : index
    %45 = vector.load %arg8[%c9, %c0_25] : memref<304x4xf32, #tpu.memory_space<vmem>>, vector<256x4xf32>
    %46 = arith.andi %22, %28 : vector<256x4xi1>
    %cst_26 = arith.constant 0.000000e+00 : f32
    %47 = vector.broadcast %cst_26 : f32 to vector<256x4xf32>
    %48 = arith.select %46, %45, %47 : vector<256x4xi1>, vector<256x4xf32>
    %49 = arith.truncf %48 : vector<256x4xf32> to vector<256x4xbf16>
    %c2 = arith.constant 2 : index
    %c0_27 = arith.constant 0 : index
    %c0_28 = arith.constant 0 : index
    %50 = vector.load %arg4[%c2, %c0_27, %c0_28] : memref<9x4x4xbf16, #tpu.memory_space<vmem>>, vector<1x4x4xbf16>
    %51 = vector.shape_cast %50 : vector<1x4x4xbf16> to vector<4x4xbf16>
    %cst_29 = arith.constant dense<0.000000e+00> : vector<256x4xf32>
    %52 = tpu.matmul %49, %51, %cst_29 {dimension_numbers = #tpu.dot_dimension_numbers<[1], [0], [0], [1], [0, 0, 1, 1], [], []>} : vector<256x4xbf16>, vector<4x4xbf16>, vector<256x4xf32> -> vector<256x4xf32>
    %53 = arith.addf %44, %52 : vector<256x4xf32>
    %c23 = arith.constant 23 : index
    %c0_30 = arith.constant 0 : index
    %54 = vector.load %arg8[%c23, %c0_30] : memref<304x4xf32, #tpu.memory_space<vmem>>, vector<256x4xf32>
    %cst_31 = arith.constant 0.000000e+00 : f32
    %55 = vector.broadcast %cst_31 : f32 to vector<256x4xf32>
    %56 = arith.select %26, %54, %55 : vector<256x4xi1>, vector<256x4xf32>
    %57 = arith.truncf %56 : vector<256x4xf32> to vector<256x4xbf16>
    %c3 = arith.constant 3 : index
    %c0_32 = arith.constant 0 : index
    %c0_33 = arith.constant 0 : index
    %58 = vector.load %arg4[%c3, %c0_32, %c0_33] : memref<9x4x4xbf16, #tpu.memory_space<vmem>>, vector<1x4x4xbf16>
    %59 = vector.shape_cast %58 : vector<1x4x4xbf16> to vector<4x4xbf16>
    %cst_34 = arith.constant dense<0.000000e+00> : vector<256x4xf32>
    %60 = tpu.matmul %57, %59, %cst_34 {dimension_numbers = #tpu.dot_dimension_numbers<[1], [0], [0], [1], [0, 0, 1, 1], [], []>} : vector<256x4xbf16>, vector<4x4xbf16>, vector<256x4xf32> -> vector<256x4xf32>
    %61 = arith.addf %53, %60 : vector<256x4xf32>
    %62 = arith.truncf %12 : vector<256x4xf32> to vector<256x4xbf16>
    %c4 = arith.constant 4 : index
    %c0_35 = arith.constant 0 : index
    %c0_36 = arith.constant 0 : index
    %63 = vector.load %arg4[%c4, %c0_35, %c0_36] : memref<9x4x4xbf16, #tpu.memory_space<vmem>>, vector<1x4x4xbf16>
    %64 = vector.shape_cast %63 : vector<1x4x4xbf16> to vector<4x4xbf16>
    %cst_37 = arith.constant dense<0.000000e+00> : vector<256x4xf32>
    %65 = tpu.matmul %62, %64, %cst_37 {dimension_numbers = #tpu.dot_dimension_numbers<[1], [0], [0], [1], [0, 0, 1, 1], [], []>} : vector<256x4xbf16>, vector<4x4xbf16>, vector<256x4xf32> -> vector<256x4xf32>
    %66 = arith.addf %61, %65 : vector<256x4xf32>
    %c25 = arith.constant 25 : index
    %c0_38 = arith.constant 0 : index
    %67 = vector.load %arg8[%c25, %c0_38] : memref<304x4xf32, #tpu.memory_space<vmem>>, vector<256x4xf32>
    %cst_39 = arith.constant 0.000000e+00 : f32
    %68 = vector.broadcast %cst_39 : f32 to vector<256x4xf32>
    %69 = arith.select %28, %67, %68 : vector<256x4xi1>, vector<256x4xf32>
    %70 = arith.truncf %69 : vector<256x4xf32> to vector<256x4xbf16>
    %c5 = arith.constant 5 : index
    %c0_40 = arith.constant 0 : index
    %c0_41 = arith.constant 0 : index
    %71 = vector.load %arg4[%c5, %c0_40, %c0_41] : memref<9x4x4xbf16, #tpu.memory_space<vmem>>, vector<1x4x4xbf16>
    %72 = vector.shape_cast %71 : vector<1x4x4xbf16> to vector<4x4xbf16>
    %cst_42 = arith.constant dense<0.000000e+00> : vector<256x4xf32>
    %73 = tpu.matmul %70, %72, %cst_42 {dimension_numbers = #tpu.dot_dimension_numbers<[1], [0], [0], [1], [0, 0, 1, 1], [], []>} : vector<256x4xbf16>, vector<4x4xbf16>, vector<256x4xf32> -> vector<256x4xf32>
    %74 = arith.addf %66, %73 : vector<256x4xf32>
    %c39 = arith.constant 39 : index
    %c0_43 = arith.constant 0 : index
    %75 = vector.load %arg8[%c39, %c0_43] : memref<304x4xf32, #tpu.memory_space<vmem>>, vector<256x4xf32>
    %76 = arith.andi %24, %26 : vector<256x4xi1>
    %cst_44 = arith.constant 0.000000e+00 : f32
    %77 = vector.broadcast %cst_44 : f32 to vector<256x4xf32>
    %78 = arith.select %76, %75, %77 : vector<256x4xi1>, vector<256x4xf32>
    %79 = arith.truncf %78 : vector<256x4xf32> to vector<256x4xbf16>
    %c6 = arith.constant 6 : index
    %c0_45 = arith.constant 0 : index
    %c0_46 = arith.constant 0 : index
    %80 = vector.load %arg4[%c6, %c0_45, %c0_46] : memref<9x4x4xbf16, #tpu.memory_space<vmem>>, vector<1x4x4xbf16>
    %81 = vector.shape_cast %80 : vector<1x4x4xbf16> to vector<4x4xbf16>
    %cst_47 = arith.constant dense<0.000000e+00> : vector<256x4xf32>
    %82 = tpu.matmul %79, %81, %cst_47 {dimension_numbers = #tpu.dot_dimension_numbers<[1], [0], [0], [1], [0, 0, 1, 1], [], []>} : vector<256x4xbf16>, vector<4x4xbf16>, vector<256x4xf32> -> vector<256x4xf32>
    %83 = arith.addf %74, %82 : vector<256x4xf32>
    %c40 = arith.constant 40 : index
    %c0_48 = arith.constant 0 : index
    %84 = vector.load %arg8[%c40, %c0_48] : memref<304x4xf32, #tpu.memory_space<vmem>>, vector<256x4xf32>
    %cst_49 = arith.constant 0.000000e+00 : f32
    %85 = vector.broadcast %cst_49 : f32 to vector<256x4xf32>
    %86 = arith.select %24, %84, %85 : vector<256x4xi1>, vector<256x4xf32>
    %87 = arith.truncf %86 : vector<256x4xf32> to vector<256x4xbf16>
    %c7_50 = arith.constant 7 : index
    %c0_51 = arith.constant 0 : index
    %c0_52 = arith.constant 0 : index
    %88 = vector.load %arg4[%c7_50, %c0_51, %c0_52] : memref<9x4x4xbf16, #tpu.memory_space<vmem>>, vector<1x4x4xbf16>
    %89 = vector.shape_cast %88 : vector<1x4x4xbf16> to vector<4x4xbf16>
    %cst_53 = arith.constant dense<0.000000e+00> : vector<256x4xf32>
    %90 = tpu.matmul %87, %89, %cst_53 {dimension_numbers = #tpu.dot_dimension_numbers<[1], [0], [0], [1], [0, 0, 1, 1], [], []>} : vector<256x4xbf16>, vector<4x4xbf16>, vector<256x4xf32> -> vector<256x4xf32>
    %91 = arith.addf %83, %90 : vector<256x4xf32>
    %c41 = arith.constant 41 : index
    %c0_54 = arith.constant 0 : index
    %92 = vector.load %arg8[%c41, %c0_54] : memref<304x4xf32, #tpu.memory_space<vmem>>, vector<256x4xf32>
    %93 = arith.andi %24, %28 : vector<256x4xi1>
    %cst_55 = arith.constant 0.000000e+00 : f32
    %94 = vector.broadcast %cst_55 : f32 to vector<256x4xf32>
    %95 = arith.select %93, %92, %94 : vector<256x4xi1>, vector<256x4xf32>
    %96 = arith.truncf %95 : vector<256x4xf32> to vector<256x4xbf16>
    %c8_56 = arith.constant 8 : index
    %c0_57 = arith.constant 0 : index
    %c0_58 = arith.constant 0 : index
    %97 = vector.load %arg4[%c8_56, %c0_57, %c0_58] : memref<9x4x4xbf16, #tpu.memory_space<vmem>>, vector<1x4x4xbf16>
    %98 = vector.shape_cast %97 : vector<1x4x4xbf16> to vector<4x4xbf16>
    %cst_59 = arith.constant dense<0.000000e+00> : vector<256x4xf32>
    %99 = tpu.matmul %96, %98, %cst_59 {dimension_numbers = #tpu.dot_dimension_numbers<[1], [0], [0], [1], [0, 0, 1, 1], [], []>} : vector<256x4xbf16>, vector<4x4xbf16>, vector<256x4xf32> -> vector<256x4xf32>
    %100 = arith.addf %91, %99 : vector<256x4xf32>
    %cst_60 = arith.constant dense<0.000000e+00> : vector<4xf32>
    %101 = vector.multi_reduction <add>, %100, %cst_60 [0] : vector<256x4xf32> to vector<4xf32>
    %102 = vector.shape_cast %101 : vector<4xf32> to vector<1x4xf32>
    %103 = vector.shape_cast %102 : vector<1x4xf32> to vector<1x1x4xf32>
    %c0_61 = arith.constant 0 : index
    %c0_62 = arith.constant 0 : index
    %c0_63 = arith.constant 0 : index
    %104 = vector.load %arg6[%c0_61, %c0_62, %c0_63] : memref<1x1x4xf32, #tpu.memory_space<vmem>>, vector<1x1x4xf32>
    tpu.vector_store %arg6[%c0_61, %c0_62, %c0_63], %103 {strides = array<i32>} : memref<1x1x4xf32, #tpu.memory_space<vmem>>, vector<1x1x4xf32>,
    %105 = arith.mulf %100, %100 : vector<256x4xf32>
    %cst_64 = arith.constant dense<0.000000e+00> : vector<4xf32>
    %106 = vector.multi_reduction <add>, %105, %cst_64 [0] : vector<256x4xf32> to vector<4xf32>
    %107 = vector.shape_cast %106 : vector<4xf32> to vector<1x4xf32>
    %108 = vector.shape_cast %107 : vector<1x4xf32> to vector<1x1x4xf32>
    %c0_65 = arith.constant 0 : index
    %c0_66 = arith.constant 0 : index
    %c0_67 = arith.constant 0 : index
    %109 = vector.load %arg7[%c0_65, %c0_66, %c0_67] : memref<1x1x4xf32, #tpu.memory_space<vmem>>, vector<1x1x4xf32>
    tpu.vector_store %arg7[%c0_65, %c0_66, %c0_67], %108 {strides = array<i32>} : memref<1x1x4xf32, #tpu.memory_space<vmem>>, vector<1x1x4xf32>,
    %110 = vector.shape_cast %100 : vector<256x4xf32> to vector<1x16x16x4xf32>
    %111 = arith.truncf %110 : vector<1x16x16x4xf32> to vector<1x16x16x4xbf16>
    %c0_68 = arith.constant 0 : index
    %c0_69 = arith.constant 0 : index
    %c0_70 = arith.constant 0 : index
    %c0_71 = arith.constant 0 : index
    %112 = vector.load %arg5[%c0_68, %c0_69, %c0_70, %c0_71] : memref<1x16x16x4xbf16, #tpu.memory_space<vmem>>, vector<1x16x16x4xbf16>
    tpu.vector_store %arg5[%c0_68, %c0_69, %c0_70, %c0_71], %111 {strides = array<i32>} : memref<1x16x16x4xbf16, #tpu.memory_space<vmem>>, vector<1x16x16x4xbf16>,
    return
  }
  func.func @transform_0(%arg0: i32) -> (i32, i32, i32, i32) {
    %c0_i32 = arith.constant 0 : i32
    %c0_i32_0 = arith.constant 0 : i32
    %c0_i32_1 = arith.constant 0 : i32
    %c0_i32_2 = arith.constant 0 : i32
    return %arg0, %c0_i32, %c0_i32_0, %c0_i32_1 : i32, i32, i32, i32
  }
  func.func @transform_1(%arg0: i32) -> (i32, i32) {
    %c0_i32 = arith.constant 0 : i32
    %c0_i32_0 = arith.constant 0 : i32
    %c0_i32_1 = arith.constant 0 : i32
    return %c0_i32, %c0_i32_0 : i32, i32
  }
  func.func @transform_2(%arg0: i32) -> (i32, i32) {
    %c0_i32 = arith.constant 0 : i32
    %c0_i32_0 = arith.constant 0 : i32
    %c0_i32_1 = arith.constant 0 : i32
    return %c0_i32, %c0_i32_0 : i32, i32
  }
  func.func @transform_3(%arg0: i32) -> (i32, i32, i32) {
    %c0_i32 = arith.constant 0 : i32
    %c0_i32_0 = arith.constant 0 : i32
    %c0_i32_1 = arith.constant 0 : i32
    %c0_i32_2 = arith.constant 0 : i32
    return %c0_i32, %c0_i32_0, %c0_i32_1 : i32, i32, i32
  }
  func.func @transform_4(%arg0: i32) -> (i32, i32, i32, i32) {
    %c0_i32 = arith.constant 0 : i32
    %c0_i32_0 = arith.constant 0 : i32
    %c0_i32_1 = arith.constant 0 : i32
    %c0_i32_2 = arith.constant 0 : i32
    return %arg0, %c0_i32, %c0_i32_0, %c0_i32_1 : i32, i32, i32, i32
  }
  func.func @transform_5(%arg0: i32) -> (i32, i32, i32) {
    %c0_i32 = arith.constant 0 : i32
    %c0_i32_0 = arith.constant 0 : i32
    %c0_i32_1 = arith.constant 0 : i32
    return %arg0, %c0_i32, %c0_i32_0 : i32, i32, i32
  }
  func.func @transform_6(%arg0: i32) -> (i32, i32, i32) {
    %c0_i32 = arith.constant 0 : i32
    %c0_i32_0 = arith.constant 0 : i32
    %c0_i32_1 = arith.constant 0 : i32
    return %arg0, %c0_i32, %c0_i32_0 : i32, i32, i32
  }
}

module attributes {stable_mosaic.version = 11 : i64} {
  func.func @_bn_relu_add_kernel(%arg0: i32, %arg1: memref<1x16x16x4xbf16, #tpu.memory_space<vmem>>, %arg2: memref<1x16x16x4xf32, #tpu.memory_space<vmem>>, %arg3: memref<1x4xf32, #tpu.memory_space<vmem>>, %arg4: memref<1x4xf32, #tpu.memory_space<vmem>>, %arg5: memref<1x16x16x4xf32, #tpu.memory_space<vmem>>) attributes {dimension_semantics = [#tpu.dimension_semantics<parallel>], iteration_bounds = array<i64: 2>, scalar_prefetch = 0 : i64, scratch_operands = 0 : i64, tpu.core_type = #tpu.core_type<tc>, window_params = [{transform_indices = @transform_0, window_bounds = array<i64: 1, 16, 16, 4>}, {transform_indices = @transform_1, window_bounds = array<i64: 1, 16, 16, 4>}, {pipeline_mode = #tpu.pipeline_mode<synchronous>, transform_indices = @transform_2, window_bounds = array<i64: 1, 4>}, {pipeline_mode = #tpu.pipeline_mode<synchronous>, transform_indices = @transform_3, window_bounds = array<i64: 1, 4>}, {transform_indices = @transform_4, window_bounds = array<i64: 1, 16, 16, 4>}]} {
    %c0 = arith.constant 0 : index
    %c0_0 = arith.constant 0 : index
    %0 = vector.load %arg3[%c0, %c0_0] : memref<1x4xf32, #tpu.memory_space<vmem>>, vector<1x4xf32>
    %1 = vector.shape_cast %0 : vector<1x4xf32> to vector<1x1x1x4xf32>
    %c0_1 = arith.constant 0 : index
    %c0_2 = arith.constant 0 : index
    %2 = vector.load %arg4[%c0_1, %c0_2] : memref<1x4xf32, #tpu.memory_space<vmem>>, vector<1x4xf32>
    %3 = vector.shape_cast %2 : vector<1x4xf32> to vector<1x1x1x4xf32>
    %c0_3 = arith.constant 0 : index
    %c0_4 = arith.constant 0 : index
    %c0_5 = arith.constant 0 : index
    %c0_6 = arith.constant 0 : index
    %4 = vector.load %arg1[%c0_3, %c0_4, %c0_5, %c0_6] : memref<1x16x16x4xbf16, #tpu.memory_space<vmem>>, vector<1x16x16x4xbf16>
    %5 = arith.extf %4 : vector<1x16x16x4xbf16> to vector<1x16x16x4xf32>
    %6 = vector.broadcast %1 : vector<1x1x1x4xf32> to vector<1x16x16x4xf32>
    %7 = arith.mulf %5, %6 : vector<1x16x16x4xf32>
    %8 = vector.broadcast %3 : vector<1x1x1x4xf32> to vector<1x16x16x4xf32>
    %9 = arith.addf %7, %8 : vector<1x16x16x4xf32>
    %cst = arith.constant 0.000000e+00 : f32
    %10 = vector.broadcast %cst : f32 to vector<1x16x16x4xf32>
    %11 = arith.maximumf %9, %10 : vector<1x16x16x4xf32>
    %c0_7 = arith.constant 0 : index
    %c0_8 = arith.constant 0 : index
    %c0_9 = arith.constant 0 : index
    %c0_10 = arith.constant 0 : index
    %12 = vector.load %arg2[%c0_7, %c0_8, %c0_9, %c0_10] : memref<1x16x16x4xf32, #tpu.memory_space<vmem>>, vector<1x16x16x4xf32>
    %13 = arith.addf %11, %12 : vector<1x16x16x4xf32>
    %c0_11 = arith.constant 0 : index
    %c0_12 = arith.constant 0 : index
    %c0_13 = arith.constant 0 : index
    %c0_14 = arith.constant 0 : index
    %14 = vector.load %arg5[%c0_11, %c0_12, %c0_13, %c0_14] : memref<1x16x16x4xf32, #tpu.memory_space<vmem>>, vector<1x16x16x4xf32>
    tpu.vector_store %arg5[%c0_11, %c0_12, %c0_13, %c0_14], %13 {strides = array<i32>} : memref<1x16x16x4xf32, #tpu.memory_space<vmem>>, vector<1x16x16x4xf32>,
    return
  }
  func.func @transform_0(%arg0: i32) -> (i32, i32, i32, i32) {
    %c0_i32 = arith.constant 0 : i32
    %c0_i32_0 = arith.constant 0 : i32
    %c0_i32_1 = arith.constant 0 : i32
    %c0_i32_2 = arith.constant 0 : i32
    return %arg0, %c0_i32, %c0_i32_0, %c0_i32_1 : i32, i32, i32, i32
  }
  func.func @transform_1(%arg0: i32) -> (i32, i32, i32, i32) {
    %c0_i32 = arith.constant 0 : i32
    %c0_i32_0 = arith.constant 0 : i32
    %c0_i32_1 = arith.constant 0 : i32
    %c0_i32_2 = arith.constant 0 : i32
    return %arg0, %c0_i32, %c0_i32_0, %c0_i32_1 : i32, i32, i32, i32
  }
  func.func @transform_2(%arg0: i32) -> (i32, i32) {
    %c0_i32 = arith.constant 0 : i32
    %c0_i32_0 = arith.constant 0 : i32
    %c0_i32_1 = arith.constant 0 : i32
    return %c0_i32, %c0_i32_0 : i32, i32
  }
  func.func @transform_3(%arg0: i32) -> (i32, i32) {
    %c0_i32 = arith.constant 0 : i32
    %c0_i32_0 = arith.constant 0 : i32
    %c0_i32_1 = arith.constant 0 : i32
    return %c0_i32, %c0_i32_0 : i32, i32
  }
  func.func @transform_4(%arg0: i32) -> (i32, i32, i32, i32) {
    %c0_i32 = arith.constant 0 : i32
    %c0_i32_0 = arith.constant 0 : i32
    %c0_i32_1 = arith.constant 0 : i32
    %c0_i32_2 = arith.constant 0 : i32
    return %arg0, %c0_i32, %c0_i32_0, %c0_i32_1 : i32, i32, i32, i32
  }
}

</mosaic_0001>

<bundles_post_ra>
// kernel: residue_block.5
= control target key start
LH: loop header
LB: loop body
LE: loop exit
PB: predicated region body
PF: predicated region fallthrough
CT: control target
= control target key end

     0   :  { %s694_s15 = smov 0   ;;  %s914_s0 = inlined_call_operand.vmem [shape: bf16[2,16,16,4], index: 0, kind: input, shape index: {}]   ;;  %s915_s1 = inlined_call_operand.vmem [shape: f32[2,16,16,4], index: 1, kind: input, shape index: {}]   ;;  %s916_s2 = inlined_call_operand.vmem [shape: f32[1,4], index: 2, kind: input, shape index: {}]   ;;  %s917_s3 = inlined_call_operand.vmem [shape: f32[1,4], index: 3, kind: input, shape index: {}]   ;;  %s918_s4 = inlined_call_operand.vmem [shape: f32[2,16,16,4], index: 4, kind: output, shape index: {}]  }
   0x1 LB: > { %s556_s16 = sadd.s32 4294967295, %s667_s15   ;;  %p560_p0 = scmp.ge.s32.totalorder %s667_s15, 1  ;;  %s667_s15 = sphi %s694_s15, %s14_s15  }
   0x2   : > { %p172_p1 = scmp.lt.s32.totalorder %s667_s15, 3 }
   0x4   : > { %p173_p2 = pnand %p560_p0, %p172_p1 }
   0x5   : > { %p203_p3 = scmp.lt.s32.totalorder (!%p173_p2), %s556_s16, 1  ;;  %v714_v0 = vld [vmem:[%s916_s2] ss:$0 sm:$0xff] (!%p173_p2)  ;;  %vm456_vm0 = vcmask (!%p173_p2), 31744  }
   0x6   : > { %176 = sbr.rel (%p173_p2) target bundleno = 60 (0x3c), region = 36  ;;  %v721_v5 = vld [vmem:[%s917_s3] ss:$0 sm:$0xff] (!%p173_p2) }
   0xd   : > { %s920_s16 = smov (!%p203_p3, %s556_s16), 1 }
   0xe   : > { %s571_s17 = sshll.u32 %s920_s16, 7  ;;  %s572_s21 = sshll.u32 %s920_s16, 8 }
   0xf   : > { %s708_s20 = scalar_lea.vmem %s914_s0, %s571_s17  ;;  %s729_s28 = scalar_lea.vmem %s915_s1, %s572_s21 }
  0x10   : > { %v575_v1 = vld [vmem:[%s708_s20] sm:$0xff]   ;;  %v638_v4 = vld [vmem:[%s708_s20 + $0x8] sm:$0xff]   ;;  %v639_v8 = vld [vmem:[%s708_s20 + $0x10] sm:$0xff]   ;;  %s755_s5 = scalar_lea.vmem %s918_s4, %s572_s21 }
  0x11   : > { %v576_v2 = vunpack.c.l.bf16 %v575_v1  ;;  %v577_v3 = vunpack.c.h.bf16 %v575_v1  ;;  %v580_v6 = vunpack.c.l.bf16 %v638_v4  ;;  %v581_v7 = vunpack.c.h.bf16 %v638_v4  ;;  %v640_v13 = vld [vmem:[%s708_s20 + $0x18] sm:$0xff]   ;;  %v392_v22 = vld [vmem:[%s729_s28] sm:$0xff]  ;;  %v393_v23 = vld [vmem:[%s729_s28 + $0x8] sm:$0xff] }
  0x12   : > { %v584_v11 = vunpack.c.l.bf16 %v639_v8  ;;  %v585_v12 = vunpack.c.h.bf16 %v639_v8  ;;  %v588_v16 = vunpack.c.l.bf16 %v640_v13  ;;  %v589_v17 = vunpack.c.h.bf16 %v640_v13  ;;  %v394_v30 = vld [vmem:[%s729_s28 + $0x10] sm:$0xff]  ;;  %v395_v31 = vld [vmem:[%s729_s28 + $0x18] sm:$0xff]  ;;  %v396_v36 = vld [vmem:[%s729_s28 + $0x20] sm:$0xff] }
  0x13   : > { %v290_v9 = vmul.f32 %v576_v2, %v714_v0  ;;  %v291_v10 = vmul.f32 %v577_v3, %v714_v0  ;;  %v292_v14 = vmul.f32 %v580_v6, %v714_v0  ;;  %v293_v15 = vmul.f32 %v581_v7, %v714_v0  ;;  %v397_v37 = vld [vmem:[%s729_s28 + $0x28] sm:$0xff]  ;;  %v641_v40 = vld [vmem:[%s708_s20 + $0x20] sm:$0xff]   ;;  %v398_v45 = vld [vmem:[%s729_s28 + $0x30] sm:$0xff] }
  0x14   : > { %v294_v20 = vmul.f32 %v584_v11, %v714_v0  ;;  %v295_v21 = vmul.f32 %v585_v12, %v714_v0  ;;  %v296_v26 = vmul.f32 %v588_v16, %v714_v0  ;;  %v297_v27 = vmul.f32 %v589_v17, %v714_v0  ;;  %v399_v46 = vld [vmem:[%s729_s28 + $0x38] sm:$0xff]  ;;  %v642_v47 = vld [vmem:[%s708_s20 + $0x28] sm:$0xff]   ;;  %v643_v52 = vld [vmem:[%s708_s20 + $0x30] sm:$0xff]  }
  0x15   : > { %v328_v18 = vadd.f32 %v721_v5, %v290_v9  ;;  %v329_v19 = vadd.f32 %v721_v5, %v291_v10  ;;  %v330_v24 = vadd.f32 %v721_v5, %v292_v14  ;;  %v331_v25 = vadd.f32 %v721_v5, %v293_v15  ;;  %v644_v57 = vld [vmem:[%s708_s20 + $0x38] sm:$0xff]   ;;  %v400_v12 = vld [vmem:[%s729_s28 + $0x40] sm:$0xff]  ;;  %v401_v13 = vld [vmem:[%s729_s28 + $0x48] sm:$0xff] }
  0x16   : > { %v332_v32 = vadd.f32 %v721_v5, %v294_v20  ;;  %v333_v33 = vadd.f32 %v721_v5, %v295_v21  ;;  %v334_v38 = vadd.f32 %v721_v5, %v296_v26  ;;  %v335_v39 = vadd.f32 %v721_v5, %v297_v27  ;;  %v402_v20 = vld [vmem:[%s729_s28 + $0x50] sm:$0xff]  ;;  %v403_v21 = vld [vmem:[%s729_s28 + $0x58] sm:$0xff]  ;;  %v404_v26 = vld [vmem:[%s729_s28 + $0x60] sm:$0xff] }
  0x17   : > { %v360_v28 = vmax.f32 %v328_v18, 0.0  ;;  %v361_v29 = vmax.f32 %v329_v19, 0.0  ;;  %v362_v34 = vmax.f32 %v330_v24, 0.0  ;;  %v363_v35 = vmax.f32 %v331_v25, 0.0  ;;  %v405_v27 = vld [vmem:[%s729_s28 + $0x68] sm:$0xff] }
  0x18   : > { %v364_v43 = vmax.f32 %v332_v32, 0.0  ;;  %v365_v44 = vmax.f32 %v333_v33, 0.0  ;;  %v366_v50 = vmax.f32 %v334_v38, 0.0  ;;  %v367_v51 = vmax.f32 %v335_v39, 0.0 }
  0x19   : > { %v424_v41 = vadd.f32 %v392_v22, %v360_v28  ;;  %v425_v42 = vadd.f32 %v393_v23, %v361_v29  ;;  %v426_v48 = vadd.f32 %v394_v30, %v362_v34  ;;  %v427_v49 = vadd.f32 %v395_v31, %v363_v35  ;;  %v645_v30 = vld [vmem:[%s708_s20 + $0x40] sm:$0xff]   ;;  %v406_v35 = vld [vmem:[%s729_s28 + $0x70] sm:$0xff] }
  0x1a   : > { %v428_v53 = vadd.f32 %v396_v36, %v364_v43  ;;  %v429_v54 = vadd.f32 %v397_v37, %v365_v44  ;;  %v592_v55 = vunpack.c.l.bf16 %v641_v40  ;;  %v593_v56 = vunpack.c.h.bf16 %v641_v40  ;;  %v407_v36 = vld [vmem:[%s729_s28 + $0x78] sm:$0xff]  ;;  %v646_v37 = vld [vmem:[%s708_s20 + $0x48] sm:$0xff]  }
  0x1b   : > { %457 = vst.msk [vmem:[%s755_s5] sm:$0xff] %vm456_vm0, %v424_v41  ;;  %458 = vst.msk [vmem:[%s755_s5 + $0x8] sm:$0xff] %vm456_vm0, %v425_v42  ;;  %v430_v58 = vadd.f32 %v398_v45, %v366_v50  ;;  %v431_v59 = vadd.f32 %v399_v46, %v367_v51  ;;  %v596_v60 = vunpack.c.l.bf16 %v642_v47  ;;  %v597_v61 = vunpack.c.h.bf16 %v642_v47  ;;  %v647_v42 = vld [vmem:[%s708_s20 + $0x50] sm:$0xff]   ;;  %v648_v47 = vld [vmem:[%s708_s20 + $0x58] sm:$0xff]  }
  0x1c   : > { %459 = vst.msk [vmem:[%s755_s5 + $0x10] sm:$0xff] %vm456_vm0, %v426_v48  ;;  %460 = vst.msk [vmem:[%s755_s5 + $0x18] sm:$0xff] %vm456_vm0, %v427_v49  ;;  %v298_v62 = vmul.f32 %v592_v55, %v714_v0  ;;  %v299_v63 = vmul.f32 %v593_v56, %v714_v0  ;;  %v600_v1 = vunpack.c.l.bf16 %v643_v52  ;;  %v601_v2 = vunpack.c.h.bf16 %v643_v52 }
  0x1d   : > { %461 = vst.msk [vmem:[%s755_s5 + $0x20] sm:$0xff] %vm456_vm0, %v428_v53  ;;  %462 = vst.msk [vmem:[%s755_s5 + $0x28] sm:$0xff] %vm456_vm0, %v429_v54  ;;  %v300_v3 = vmul.f32 %v596_v60, %v714_v0  ;;  %v301_v4 = vmul.f32 %v597_v61, %v714_v0  ;;  %v604_v6 = vunpack.c.l.bf16 %v644_v57  ;;  %v605_v7 = vunpack.c.h.bf16 %v644_v57 }
  0x1e   : > { %463 = vst.msk [vmem:[%s755_s5 + $0x30] sm:$0xff] %vm456_vm0, %v430_v58  ;;  %464 = vst.msk [vmem:[%s755_s5 + $0x38] sm:$0xff] %vm456_vm0, %v431_v59  ;;  %v336_v8 = vadd.f32 %v721_v5, %v298_v62  ;;  %v337_v9 = vadd.f32 %v721_v5, %v299_v63  ;;  %v302_v10 = vmul.f32 %v600_v1, %v714_v0  ;;  %v608_v45 = vunpack.c.l.bf16 %v645_v30  ;;  %v408_v1 = vld [vmem:[%s729_s28 + $0x80] sm:$0xff] }
  0x1f   : > { %v303_v11 = vmul.f32 %v601_v2, %v714_v0  ;;  %v338_v14 = vadd.f32 %v721_v5, %v300_v3  ;;  %v339_v15 = vadd.f32 %v721_v5, %v301_v4  ;;  %v304_v16 = vmul.f32 %v604_v6, %v714_v0  ;;  %v409_v2 = vld [vmem:[%s729_s28 + $0x88] sm:$0xff] }
  0x20   : > { %v305_v17 = vmul.f32 %v605_v7, %v714_v0  ;;  %v368_v18 = vmax.f32 %v336_v8, 0.0  ;;  %v369_v19 = vmax.f32 %v337_v9, 0.0  ;;  %v340_v22 = vadd.f32 %v721_v5, %v302_v10  ;;  %v410_v10 = vld [vmem:[%s729_s28 + $0x90] sm:$0xff] }
  0x21   : > { %v341_v23 = vadd.f32 %v721_v5, %v303_v11  ;;  %v370_v24 = vmax.f32 %v338_v14, 0.0  ;;  %v371_v25 = vmax.f32 %v339_v15, 0.0  ;;  %v342_v28 = vadd.f32 %v721_v5, %v304_v16  ;;  %v411_v11 = vld [vmem:[%s729_s28 + $0x98] sm:$0xff]  ;;  %v412_v16 = vld [vmem:[%s729_s28 + $0xa0] sm:$0xff] }
  0x22   : > { %v343_v29 = vadd.f32 %v721_v5, %v305_v17  ;;  %v432_v31 = vadd.f32 %v400_v12, %v368_v18  ;;  %v433_v32 = vadd.f32 %v401_v13, %v369_v19  ;;  %v372_v33 = vmax.f32 %v340_v22, 0.0  ;;  %v413_v17 = vld [vmem:[%s729_s28 + $0xa8] sm:$0xff] }
  0x23   : > { %v373_v34 = vmax.f32 %v341_v23, 0.0  ;;  %v434_v38 = vadd.f32 %v402_v20, %v370_v24  ;;  %v435_v39 = vadd.f32 %v403_v21, %v371_v25  ;;  %v374_v40 = vmax.f32 %v342_v28, 0.0  ;;  %v649_v20 = vld [vmem:[%s708_s20 + $0x60] sm:$0xff]   ;;  %v414_v25 = vld [vmem:[%s729_s28 + $0xb0] sm:$0xff] }
  0x24   : > { %v375_v41 = vmax.f32 %v343_v29, 0.0  ;;  %465 = vst.msk [vmem:[%s755_s5 + $0x40] sm:$0xff] %vm456_vm0, %v432_v31  ;;  %466 = vst.msk [vmem:[%s755_s5 + $0x48] sm:$0xff] %vm456_vm0, %v433_v32  ;;  %v436_v43 = vadd.f32 %v404_v26, %v372_v33  ;;  %v609_v46 = vunpack.c.h.bf16 %v645_v30  ;;  %v612_v50 = vunpack.c.l.bf16 %v646_v37  ;;  %v415_v26 = vld [vmem:[%s729_s28 + $0xb8] sm:$0xff]  ;;  %v651_v32 = vld [vmem:[%s708_s20 + $0x70] sm:$0xff]  }
  0x25   : > { %v437_v44 = vadd.f32 %v405_v27, %v373_v34  ;;  %467 = vst.msk [vmem:[%s755_s5 + $0x50] sm:$0xff] %vm456_vm0, %v434_v38  ;;  %468 = vst.msk [vmem:[%s755_s5 + $0x58] sm:$0xff] %vm456_vm0, %v435_v39  ;;  %v438_v48 = vadd.f32 %v406_v35, %v374_v40  ;;  %v613_v51 = vunpack.c.h.bf16 %v646_v37  ;;  %v306_v52 = vmul.f32 %v608_v45, %v714_v0  ;;  %v650_v27 = vld [vmem:[%s708_s20 + $0x68] sm:$0xff]   ;;  %v652_v37 = vld [vmem:[%s708_s20 + $0x78] sm:$0xff]  }
  0x26   : > { %v439_v49 = vadd.f32 %v407_v36, %v375_v41  ;;  %469 = vst.msk [vmem:[%s755_s5 + $0x60] sm:$0xff] %vm456_vm0, %v436_v43  ;;  %v307_v53 = vmul.f32 %v609_v46, %v714_v0  ;;  %v616_v54 = vunpack.c.l.bf16 %v647_v42  ;;  %v617_v55 = vunpack.c.h.bf16 %v647_v42 }
  0x27   : > { %470 = vst.msk [vmem:[%s755_s5 + $0x68] sm:$0xff] %vm456_vm0, %v437_v44  ;;  %471 = vst.msk [vmem:[%s755_s5 + $0x70] sm:$0xff] %vm456_vm0, %v438_v48  ;;  %v308_v56 = vmul.f32 %v612_v50, %v714_v0  ;;  %v309_v57 = vmul.f32 %v613_v51, %v714_v0  ;;  %v620_v58 = vunpack.c.l.bf16 %v648_v47  ;;  %v621_v59 = vunpack.c.h.bf16 %v648_v47 }
  0x28   : > { %472 = vst.msk [vmem:[%s755_s5 + $0x78] sm:$0xff] %vm456_vm0, %v439_v49  ;;  %v344_v60 = vadd.f32 %v721_v5, %v306_v52  ;;  %v345_v61 = vadd.f32 %v721_v5, %v307_v53  ;;  %v310_v62 = vmul.f32 %v616_v54, %v714_v0  ;;  %v311_v63 = vmul.f32 %v617_v55, %v714_v0  ;;  %v416_v54 = vld [vmem:[%s729_s28 + $0xc0] sm:$0xff]  ;;  %v417_v55 = vld [vmem:[%s729_s28 + $0xc8] sm:$0xff] }
  0x29   : > { %v346_v3 = vadd.f32 %v721_v5, %v308_v56  ;;  %v347_v4 = vadd.f32 %v721_v5, %v309_v57  ;;  %v312_v6 = vmul.f32 %v620_v58, %v714_v0  ;;  %v313_v7 = vmul.f32 %v621_v59, %v714_v0 }
  0x2a   : > { %v376_v8 = vmax.f32 %v344_v60, 0.0  ;;  %v377_v9 = vmax.f32 %v345_v61, 0.0  ;;  %v348_v12 = vadd.f32 %v721_v5, %v310_v62  ;;  %v349_v13 = vadd.f32 %v721_v5, %v311_v63  ;;  %v418_v62 = vld [vmem:[%s729_s28 + $0xd0] sm:$0xff]  ;;  %v419_v63 = vld [vmem:[%s729_s28 + $0xd8] sm:$0xff] }
  0x2b   : > { %v378_v14 = vmax.f32 %v346_v3, 0.0  ;;  %v379_v15 = vmax.f32 %v347_v4, 0.0  ;;  %v350_v18 = vadd.f32 %v721_v5, %v312_v6  ;;  %v351_v19 = vadd.f32 %v721_v5, %v313_v7  ;;  %v420_v6 = vld [vmem:[%s729_s28 + $0xe0] sm:$0xff]  ;;  %v421_v7 = vld [vmem:[%s729_s28 + $0xe8] sm:$0xff] }
  0x2c   : > { %v440_v21 = vadd.f32 %v408_v1, %v376_v8  ;;  %v441_v22 = vadd.f32 %v409_v2, %v377_v9  ;;  %v380_v23 = vmax.f32 %v348_v12, 0.0  ;;  %v381_v24 = vmax.f32 %v349_v13, 0.0  ;;  %v422_v13 = vld [vmem:[%s729_s28 + $0xf0] sm:$0xff] }
  0x2d   : > { %v442_v28 = vadd.f32 %v410_v10, %v378_v14  ;;  %v443_v29 = vadd.f32 %v411_v11, %v379_v15  ;;  %v382_v30 = vmax.f32 %v350_v18, 0.0  ;;  %v383_v31 = vmax.f32 %v351_v19, 0.0  ;;  %v423_v14 = vld [vmem:[%s729_s28 + $0xf8] sm:$0xff] }
  0x2e   : > { %473 = vst.msk [vmem:[%s755_s5 + $0x80] sm:$0xff] %vm456_vm0, %v440_v21  ;;  %474 = vst.msk [vmem:[%s755_s5 + $0x88] sm:$0xff] %vm456_vm0, %v441_v22  ;;  %v444_v33 = vadd.f32 %v412_v16, %v380_v23  ;;  %v445_v34 = vadd.f32 %v413_v17, %v381_v24  ;;  %v624_v35 = vunpack.c.l.bf16 %v649_v20  ;;  %v625_v36 = vunpack.c.h.bf16 %v649_v20 }
  0x2f   : > { %475 = vst.msk [vmem:[%s755_s5 + $0x90] sm:$0xff] %vm456_vm0, %v442_v28  ;;  %476 = vst.msk [vmem:[%s755_s5 + $0x98] sm:$0xff] %vm456_vm0, %v443_v29  ;;  %v446_v38 = vadd.f32 %v414_v25, %v382_v30  ;;  %v447_v39 = vadd.f32 %v415_v26, %v383_v31  ;;  %v628_v40 = vunpack.c.l.bf16 %v650_v27  ;;  %v629_v41 = vunpack.c.h.bf16 %v650_v27 }
  0x30   : > { %477 = vst.msk [vmem:[%s755_s5 + $0xa0] sm:$0xff] %vm456_vm0, %v444_v33  ;;  %478 = vst.msk [vmem:[%s755_s5 + $0xa8] sm:$0xff] %vm456_vm0, %v445_v34  ;;  %v314_v42 = vmul.f32 %v624_v35, %v714_v0  ;;  %v315_v43 = vmul.f32 %v625_v36, %v714_v0  ;;  %v632_v44 = vunpack.c.l.bf16 %v651_v32  ;;  %v633_v45 = vunpack.c.h.bf16 %v651_v32 }
  0x31   : > { %479 = vst.msk [vmem:[%s755_s5 + $0xb0] sm:$0xff] %vm456_vm0, %v446_v38  ;;  %480 = vst.msk [vmem:[%s755_s5 + $0xb8] sm:$0xff] %vm456_vm0, %v447_v39  ;;  %v316_v46 = vmul.f32 %v628_v40, %v714_v0  ;;  %v317_v47 = vmul.f32 %v629_v41, %v714_v0  ;;  %v636_v48 = vunpack.c.l.bf16 %v652_v37  ;;  %v637_v49 = vunpack.c.h.bf16 %v652_v37 }
  0x32   : > { %v352_v50 = vadd.f32 %v721_v5, %v314_v42  ;;  %v353_v51 = vadd.f32 %v721_v5, %v315_v43  ;;  %v318_v52 = vmul.f32 %v632_v44, %v714_v0  ;;  %v319_v53 = vmul.f32 %v633_v45, %v714_v0 }
  0x33   : > { %v354_v56 = vadd.f32 %v721_v5, %v316_v46  ;;  %v355_v57 = vadd.f32 %v721_v5, %v317_v47  ;;  %v320_v58 = vmul.f32 %v636_v48, %v714_v0  ;;  %v321_v59 = vmul.f32 %v637_v49, %v714_v0 }
  0x34   : > { %v384_v60 = vmax.f32 %v352_v50, 0.0  ;;  %v385_v61 = vmax.f32 %v353_v51, 0.0  ;;  %v356_v1 = vadd.f32 %v721_v5, %v318_v52  ;;  %v357_v2 = vadd.f32 %v721_v5, %v319_v53 }
  0x35   : > { %v386_v3 = vmax.f32 %v354_v56, 0.0  ;;  %v387_v4 = vmax.f32 %v355_v57, 0.0  ;;  %v358_v8 = vadd.f32 %v721_v5, %v320_v58  ;;  %v359_v0 = vadd.f32 %v721_v5, %v321_v59 }
  0x36   : > { %v448_v9 = vadd.f32 %v416_v54, %v384_v60  ;;  %v449_v10 = vadd.f32 %v417_v55, %v385_v61  ;;  %v388_v11 = vmax.f32 %v356_v1, 0.0  ;;  %v389_v12 = vmax.f32 %v357_v2, 0.0 }
  0x37   : > { %v450_v15 = vadd.f32 %v418_v62, %v386_v3  ;;  %v451_v16 = vadd.f32 %v419_v63, %v387_v4  ;;  %v390_v17 = vmax.f32 %v358_v8, 0.0  ;;  %v391_v18 = vmax.f32 %v359_v0, 0.0 }
  0x38   : > { %481 = vst.msk [vmem:[%s755_s5 + $0xc0] sm:$0xff] %vm456_vm0, %v448_v9  ;;  %482 = vst.msk [vmem:[%s755_s5 + $0xc8] sm:$0xff] %vm456_vm0, %v449_v10  ;;  %v452_v5 = vadd.f32 %v420_v6, %v388_v11  ;;  %v453_v19 = vadd.f32 %v421_v7, %v389_v12 }
  0x39   : > { %483 = vst.msk [vmem:[%s755_s5 + $0xd0] sm:$0xff] %vm456_vm0, %v450_v15  ;;  %484 = vst.msk [vmem:[%s755_s5 + $0xd8] sm:$0xff] %vm456_vm0, %v451_v16  ;;  %v454_v20 = vadd.f32 %v422_v13, %v390_v17  ;;  %v455_v21 = vadd.f32 %v423_v14, %v391_v18 }
  0x3a   : > { %485 = vst.msk [vmem:[%s755_s5 + $0xe0] sm:$0xff] %vm456_vm0, %v452_v5  ;;  %486 = vst.msk [vmem:[%s755_s5 + $0xe8] sm:$0xff] %vm456_vm0, %v453_v19 }
  0x3b   : > { %487 = vst.msk [vmem:[%s755_s5 + $0xf0] sm:$0xff] %vm456_vm0, %v454_v20  ;;  %488 = vst.msk [vmem:[%s755_s5 + $0xf8] sm:$0xff] %vm456_vm0, %v455_v21 }
  0x3c PF: > { %s14_s15 = sadd.s32 1, %s667_s15  }
  0x3d   : > { %p11_p4 = scmp.ge.s32.totalorder %s14_s15, 4  }
  0x3f   :  { %13 = sbr.rel (!%p11_p4) target bundleno = 1 (0x1), region = 69 }

// kernel: residue_block.3
= control target key start
LH: loop header
LB: loop body
LE: loop exit
PB: predicated region body
PF: predicated region fallthrough
CT: control target
= control target key end

     0   :  { %s4430_s15 = smov 0   ;;  %s5275_s0 = inlined_call_operand.vmem [shape: f32[2,16,16,4], index: 0, kind: input, shape index: {}]   ;;  %s5276_s1 = inlined_call_operand.vmem [shape: bf16[9,4,4], index: 1, kind: input, shape index: {}]   ;;  %s5277_s2 = inlined_call_operand.vmem [shape: bf16[2,16,16,4], index: 2, kind: output, shape index: {0}]   ;;  %s5278_s3 = inlined_call_operand.vmem [shape: f32[2,1,4], index: 3, kind: output, shape index: {1}]   ;;  %s5279_s4 = inlined_call_operand.vmem [shape: f32[2,1,4], index: 4, kind: output, shape index: {2}]  }
   0x1 LB: > { %s3435_s16 = sadd.s32 4294967295, %s4401_s15   ;;  %p3439_p0 = scmp.ge.s32.totalorder %s4401_s15, 1  ;;  %s4401_s15 = sphi %s4430_s15, %s15_s15  }
   0x2   : > { %p167_p1 = scmp.lt.s32.totalorder %s4401_s15, 3 }
   0x4   : > { %p168_p2 = pnand %p3439_p0, %p167_p1 }
   0x6   : > { %171 = sbr.rel (%p168_p2) target bundleno = 552 (0x228), region = 28 }
   0xd   : > { %vm466_vm0 = vcmask 1041408   ;;  %v4441_v0 = vld [vmem:[%s5276_s1 + $0x8] sm:$0x3]  ;;  %p199_p3 = scmp.lt.s32.totalorder %s3435_s16, 1  ;;  %vm248_vm1 = vcmask 31744   ;;  %v5280_v3 = vmov 0.0|0.0   ;;  %v287_v34 = vlaneseq }
   0xe   : > { %4379 = vmatprep.subr.msk.bf16.mxu0 %vm466_vm0, %v4441_v0  ;;  %v4447_v1 = vsel %vm466_vm0, %v4441_v0, 0  ;;  %v3444_v2 = vld [vmem:[%s5276_s1 + $0x2] sm:$0x3]  ;;  %3813 = vmatprep.mubr.bf16.mxu1 %v5280_v3  ;;  %v4456_v4 = vld [vmem:[%s5276_s1] sm:$0x3]  ;;  %v4404_v7 = vmov 0.0  }
   0xf   : > { %3948 = vmatpush3.bf16.msra.mxu0 %v4447_v1  ;;  %s5311_s16 = smov (!%p199_p3, %s3435_s16), 1  ;;  %4375 = vmatprep.subr.msk.bf16.mxu1 %vm466_vm0, %v3444_v2  ;;  %v468_v5 = vsel %vm466_vm0, %v3444_v2, 0  ;;  %v3525_v6 = vld [vmem:[%s5276_s1 + $0xa] sm:$0x3]  ;;  %251 = vst.msk [vmem:[#allocation2 + $0x10] sm:$0xff] %vm248_vm1, %v4404_v7  ;;  %252 = vst.msk [vmem:[#allocation2 + $0x118] sm:$0xff] %vm248_vm1, %v4404_v7 }
  0x10   : > { %3812 = vmatpush3.bf16.msra.mxu1 %v468_v5  ;;  %4381 = vmatprep.subr.msk.bf16.mxu0 %vm466_vm0, %v3525_v6  ;;  %s3624_s25 = sshll.u32 %s5311_s16, 8  ;;  %v4489_v15 = vld [vmem:[%s5276_s1 + $0xc] sm:$0x3]  ;;  %v1877_v18 = vsel %vm466_vm0, %v3525_v6, 0  ;;  %v677_v43 = vsel %vm466_vm0, %v4456_v4, 0  ;;  %v4583_v47 = vshrl.u32 %v287_v34, 7  ;;  %s211_s21 = scalar_lea.vmem %s5278_s3, %s5311_s16 }
  0x11   : > { %4376 = vmatprep.subr.msk.bf16.mxu1 %vm466_vm0, %v4456_v4  ;;  %s4475_s28 = scalar_lea.vmem %s5275_s0, %s3624_s25  ;;  %v4588_v48 = vld [vmem:[%s5276_s1 + $0x4] sm:$0x3]  ;;  %s3625_s13 = sshll.u32 %s5311_s16, 7  ;;  %vm3297_vm4 = vcmask 27648   ;;  %vm3065_vm5 = vcmask 24576  }
  0x12   : > { %v216_v8 = vld [vmem:[%s4475_s28] sm:$0xff]  ;;  %v217_v9 = vld [vmem:[%s4475_s28 + $0x8] sm:$0xff]  ;;  %v218_v10 = vld [vmem:[%s4475_s28 + $0x10] sm:$0xff]  ;;  %v4599_v54 = vadd.s32 8, %v4583_v47  ;;  %vm290_vm3 = vcmp.ge.s32.totalorder %v4583_v47, 1  ;;  %s5124_s18 = scalar_lea.vmem %s5277_s2, %s3625_s13  ;;  %s214_s24 = scalar_lea.vmem %s5279_s4, %s5311_s16 }
  0x13   : > { %255 = vst.msk [vmem:[#allocation2 + $0x18] sm:$0xff] %vm248_vm1, %v216_v8  ;;  %256 = vst.msk [vmem:[#allocation2 + $0x20] sm:$0xff] %vm248_vm1, %v217_v9  ;;  %v1484_v11 = vpack.c.bf16 %v217_v9, %v216_v8  ;;  %v219_v12 = vld [vmem:[%s4475_s28 + $0x18] sm:$0xff]  ;;  %v220_v13 = vld [vmem:[%s4475_s28 + $0x20] sm:$0xff] }
  0x14   : > { %257 = vst.msk [vmem:[#allocation2 + $0x28] sm:$0xff] %vm248_vm1, %v218_v10  ;;  %v221_v14 = vld [vmem:[%s4475_s28 + $0x28] sm:$0xff]  ;;  %258 = vst.msk [vmem:[#allocation2 + $0x30] sm:$0xff] %vm248_vm1, %v219_v12  ;;  %v1485_v16 = vpack.c.bf16 %v219_v12, %v218_v10  ;;  %v222_v19 = vld [vmem:[%s4475_s28 + $0x30] sm:$0xff]  ;;  %vm293_vm2 = vcmp.le.s32.totalorder %v4599_v54, 14 }
  0x15   : > { %259 = vst.msk [vmem:[#allocation2 + $0x38] sm:$0xff] %vm248_vm1, %v220_v13  ;;  %260 = vst.msk [vmem:[#allocation2 + $0x40] sm:$0xff] %vm248_vm1, %v221_v14  ;;  %v1486_v17 = vpack.c.bf16 %v221_v14, %v220_v13  ;;  %v223_v20 = vld [vmem:[%s4475_s28 + $0x38] sm:$0xff]  ;;  %v224_v21 = vld [vmem:[%s4475_s28 + $0x40] sm:$0xff]  ;;  %3949 = vmatprep.mubr.msk.bf16.mxu0 %vm248_vm1, %v1484_v11 }
  0x16   : > { %261 = vst.msk [vmem:[#allocation2 + $0x48] sm:$0xff] %vm248_vm1, %v222_v19  ;;  %262 = vst.msk [vmem:[#allocation2 + $0x50] sm:$0xff] %vm248_vm1, %v223_v20  ;;  %v225_v22 = vld [vmem:[%s4475_s28 + $0x48] sm:$0xff]  ;;  %v4504_v23 = vld [vmem:[%s4475_s28 + $0x50] sm:$0xff]  ;;  %3950 = vmatmul.mubr.msk.bf16.vlgmr.msra.gmra.mrb[0].mxu0 %vm248_vm1, %v1485_v16  ;;  %v1487_v40 = vpack.c.bf16 %v223_v20, %v222_v19 }
  0x17   : > { %263 = vst.msk [vmem:[#allocation2 + $0x58] sm:$0xff] %vm248_vm1, %v224_v21  ;;  %v4507_v24 = vld [vmem:[%s4475_s28 + $0x58] sm:$0xff]  ;;  %264 = vst.msk [vmem:[#allocation2 + $0x60] sm:$0xff] %vm248_vm1, %v225_v22  ;;  %v4516_v25 = vld [vmem:[%s4475_s28 + $0x60] sm:$0xff]  ;;  %3953 = vmatprep.mubr.msk.bf16.mxu0 %vm248_vm1, %v1486_v17  ;;  %3982 = vmatpush3.bf16.msra.mxu0 %v1877_v18  ;;  %v1488_v45 = vpack.c.bf16 %v225_v22, %v224_v21 }
  0x18   : > { %265 = vst.msk [vmem:[#allocation2 + $0x68] sm:$0xff] %vm248_vm1, %v4504_v23  ;;  %266 = vst.msk [vmem:[#allocation2 + $0x70] sm:$0xff] %vm248_vm1, %v4507_v24  ;;  %v4519_v26 = vld [vmem:[%s4475_s28 + $0x68] sm:$0xff]  ;;  %v4522_v27 = vld [vmem:[%s4475_s28 + $0x70] sm:$0xff]  ;;  %4382 = vmatprep.subr.msk.bf16.mxu0 %vm466_vm0, %v4489_v15  ;;  %v1489_v55 = vpack.c.bf16 %v4507_v24, %v4504_v23 }
  0x19   : > { %267 = vst.msk [vmem:[#allocation2 + $0x78] sm:$0xff] %vm248_vm1, %v4516_v25  ;;  %268 = vst.msk [vmem:[#allocation2 + $0x80] sm:$0xff] %vm248_vm1, %v4519_v26  ;;  %v4530_v28 = vld [vmem:[%s4475_s28 + $0x78] sm:$0xff]  ;;  %v4535_v29 = vld [vmem:[%s4475_s28 + $0x80] sm:$0xff]  ;;  %v1490_v57 = vpack.c.bf16 %v4519_v26, %v4516_v25 }
  0x1a   : > { %269 = vst.msk [vmem:[#allocation2 + $0x88] sm:$0xff] %vm248_vm1, %v4522_v27  ;;  %v4538_v30 = vld [vmem:[%s4475_s28 + $0x88] sm:$0xff]  ;;  %270 = vst.msk [vmem:[#allocation2 + $0x90] sm:$0xff] %vm248_vm1, %v4530_v28  ;;  %v4549_v31 = vld [vmem:[%s4475_s28 + $0x90] sm:$0xff]  ;;  %v1491_v11 = vpack.c.bf16 %v4530_v28, %v4522_v27 }
  0x1b   : > { %271 = vst.msk [vmem:[#allocation2 + $0x98] sm:$0xff] %vm248_vm1, %v4535_v29  ;;  %272 = vst.msk [vmem:[#allocation2 + $0xa0] sm:$0xff] %vm248_vm1, %v4538_v30  ;;  %v4552_v32 = vld [vmem:[%s4475_s28 + $0x98] sm:$0xff]  ;;  %v4555_v33 = vld [vmem:[%s4475_s28 + $0xa0] sm:$0xff] }
  0x1c   : > { %273 = vst.msk [vmem:[#allocation2 + $0xa8] sm:$0xff] %vm248_vm1, %v4549_v31  ;;  %274 = vst.msk [vmem:[#allocation2 + $0xb0] sm:$0xff] %vm248_vm1, %v4552_v32  ;;  %v4562_v35 = vld [vmem:[%s4475_s28 + $0xa8] sm:$0xff]  ;;  %v4567_v36 = vld [vmem:[%s4475_s28 + $0xb0] sm:$0xff] }
  0x1d   : > { %275 = vst.msk [vmem:[#allocation2 + $0xb8] sm:$0xff] %vm248_vm1, %v4555_v33  ;;  %v4570_v37 = vld [vmem:[%s4475_s28 + $0xb8] sm:$0xff]  ;;  %v372_v39 = vld [vmem:[#allocation2 + $0x20] sm:$0xff]  ;;  %v373_v41 = vld [vmem:[#allocation2 + $0x28] sm:$0xff] }
  0x1e   : > { %v371_v38 = vld [vmem:[#allocation2 + $0x18] sm:$0xff]  ;;  %276 = vst.msk [vmem:[#allocation2 + $0xc0] sm:$0xff] %vm248_vm1, %v4562_v35  ;;  %277 = vst.msk [vmem:[#allocation2 + $0xc8] sm:$0xff] %vm248_vm1, %v4567_v36  ;;  %v374_v44 = vld [vmem:[#allocation2 + $0x30] sm:$0xff]  ;;  %3954 = vmatmul.mubr.msk.bf16.gmra.mrb[4].mxu0 %vm248_vm1, %v1487_v40 }
  0x1f   : > { %278 = vst.msk [vmem:[#allocation2 + $0xd0] sm:$0xff] %vm248_vm1, %v4570_v37  ;;  %v401_v42 = vpack.c.bf16 %v372_v39, %v371_v38  ;;  %v4580_v46 = vpack.c.bf16 %v374_v44, %v373_v41  ;;  %v375_v49 = vld [vmem:[#allocation2 + $0x38] sm:$0xff]  ;;  %v376_v50 = vld [vmem:[#allocation2 + $0x40] sm:$0xff]  ;;  %3957 = vmatprep.mubr.msk.bf16.mxu0 %vm248_vm1, %v1488_v45  ;;  %v377_v51 = vld [vmem:[#allocation2 + $0x48] sm:$0xff]  ;;  %v2195_v39 = vsel %vm466_vm0, %v4489_v15, 0 }
  0x20   : > { %v378_v52 = vld [vmem:[#allocation2 + $0x50] sm:$0xff]  ;;  %v4596_v53 = vpack.c.bf16 %v376_v50, %v375_v49  ;;  %v379_v58 = vld [vmem:[#allocation2 + $0x58] sm:$0xff]  ;;  %v1747_v59 = vld [vmem:[#allocation2 + $0x21] sm:$0xff] }
  0x21   : > { %3814 = vmatmul.mubr.msk.bf16.vlgmr.msra.gmra.mrb[0].mxu1 %vm248_vm1, %v401_v42  ;;  %v4603_v56 = vpack.c.bf16 %v378_v52, %v377_v51  ;;  %v380_v60 = vld [vmem:[#allocation2 + $0x60] sm:$0xff]  ;;  %v4617_v62 = vld [vmem:[%s4475_s28 + $0xc8] sm:$0xff]  ;;  %v382_v2 = vld [vmem:[#allocation2 + $0x70] sm:$0xff]  ;;  %v1779_v5 = vsel %vm293_vm2, %v1747_v59, 0.0 }
  0x22   : > { %3846 = vmatpush3.bf16.msra.mxu1 %v677_v43  ;;  %3817 = vmatprep.mubr.msk.bf16.mxu1 %vm248_vm1, %v4580_v46  ;;  %v4614_v61 = vld [vmem:[%s4475_s28 + $0xc0] sm:$0xff]  ;;  %5292 = vst [vmem:[#allocation4_spill] sm:$0xff] %v4617_v62  ;;  %v381_v63 = vld [vmem:[#allocation2 + $0x68] sm:$0xff]  ;;  %280 = vst.msk [vmem:[#allocation2 + $0xe0] sm:$0xff] %vm248_vm1, %v4617_v62  ;;  %v4635_v9 = vpack.c.bf16 %v380_v60, %v379_v58 }
  0x23   : > { %4377 = vmatprep.subr.msk.bf16.mxu1 %vm466_vm0, %v4588_v48  ;;  %5291 = vst [vmem:[#allocation3_spill] sm:$0xff] %v4614_v61  ;;  %v1746_v4 = vld [vmem:[#allocation2 + $0x19] sm:$0xff]  ;;  %279 = vst.msk [vmem:[#allocation2 + $0xd8] sm:$0xff] %vm248_vm1, %v4614_v61  ;;  %v4627_v6 = vld [vmem:[%s4475_s28 + $0xd0] sm:$0xff]  ;;  %v4648_v12 = vpack.c.bf16 %v382_v2, %v381_v63 }
  0x24   : > { %5293 = vst [vmem:[#allocation5_spill] sm:$0xff] %v4627_v6  ;;  %v4630_v7 = vld [vmem:[%s4475_s28 + $0xd8] sm:$0xff]  ;;  %v4633_v8 = vld [vmem:[%s4475_s28 + $0xe0] sm:$0xff]  ;;  %281 = vst.msk [vmem:[#allocation2 + $0xe8] sm:$0xff] %vm248_vm1, %v4627_v6  ;;  %v4652_v13 = vpack.c.bf16 %v1779_v5, %v1746_v4 }
  0x25   : > { %5294 = vst [vmem:[#allocation6_spill] sm:$0xff] %v4630_v7  ;;  %5295 = vst [vmem:[#allocation7_spill] sm:$0xff] %v4633_v8  ;;  %v4642_v10 = vld [vmem:[%s4475_s28 + $0xe8] sm:$0xff]  ;;  %v1749_v14 = vld [vmem:[#allocation2 + $0x31] sm:$0xff] }
  0x26   : > { %3958 = vmatmul.mubr.msk.bf16.gmra.mrb[8].mxu0 %vm248_vm1, %v1489_v55  ;;  %282 = vst.msk [vmem:[#allocation2 + $0xf0] sm:$0xff] %vm248_vm1, %v4630_v7  ;;  %5296 = vst [vmem:[#allocation8_spill] sm:$0xff] %v4642_v10  ;;  %v1751_v16 = vld [vmem:[#allocation2 + $0x41] sm:$0xff]  ;;  %v383_v17 = vld [vmem:[#allocation2 + $0x78] sm:$0xff]  ;;  %v1781_v20 = vsel %vm293_vm2, %v1749_v14, 0.0 }
  0x27   : > { %3961 = vmatprep.mubr.msk.bf16.mxu0 %vm248_vm1, %v1490_v57  ;;  %283 = vst.msk [vmem:[#allocation2 + $0xf8] sm:$0xff] %vm248_vm1, %v4633_v8  ;;  %284 = vst.msk [vmem:[#allocation2 + $0x100] sm:$0xff] %vm248_vm1, %v4642_v10  ;;  %v384_v18 = vld [vmem:[#allocation2 + $0x80] sm:$0xff]  ;;  %v1748_v19 = vld [vmem:[#allocation2 + $0x29] sm:$0xff]  ;;  %v1783_v24 = vsel %vm293_vm2, %v1751_v16, 0.0 }
  0x28   : > { %v385_v21 = vld [vmem:[#allocation2 + $0x88] sm:$0xff]  ;;  %v386_v22 = vld [vmem:[#allocation2 + $0x90] sm:$0xff]  ;;  %v1750_v23 = vld [vmem:[#allocation2 + $0x39] sm:$0xff]  ;;  %v4665_v25 = vpack.c.bf16 %v384_v18, %v383_v17  ;;  %v4667_v26 = vpack.c.bf16 %v1781_v20, %v1748_v19 }
  0x29   : > { %3818 = vmatmul.mubr.msk.bf16.gmra.mrb[4].mxu1 %vm248_vm1, %v4596_v53  ;;  %v4669_v27 = vpack.c.bf16 %v386_v22, %v385_v21  ;;  %v4672_v28 = vld [vmem:[%s4475_s28 + $0xf0] sm:$0xff]  ;;  %v4674_v34 = vpack.c.bf16 %v1783_v24, %v1750_v23  ;;  %v4679_v38 = vld [vmem:[%s4475_s28 + $0xf8] sm:$0xff]  ;;  %v1755_v41 = vld [vmem:[#allocation2 + $0x61] sm:$0xff] }
  0x2a   : > { %3821 = vmatprep.mubr.msk.bf16.mxu1 %vm248_vm1, %v4603_v56  ;;  %5297 = vst [vmem:[#allocation9_spill] sm:$0xff] %v4672_v28  ;;  %285 = vst.msk [vmem:[#allocation2 + $0x108] sm:$0xff] %vm248_vm1, %v4672_v28  ;;  %v1753_v40 = vld [vmem:[#allocation2 + $0x51] sm:$0xff]  ;;  %v4690_v42 = vld [vmem:[%s5276_s1 + $0xe] sm:$0x3]  ;;  %v1787_v52 = vsel %vm293_vm2, %v1755_v41, 0.0 }
  0x2b   : > { %5298 = vst [vmem:[#allocation10_spill] sm:$0xff] %v4679_v38  ;;  %286 = vst.msk [vmem:[#allocation2 + $0x110] sm:$0xff] %vm248_vm1, %v4679_v38  ;;  %v387_v15 = vld [vmem:[#allocation2 + $0x98] sm:$0xff]  ;;  %v388_v43 = vld [vmem:[#allocation2 + $0xa0] sm:$0xff]  ;;  %v1785_v45 = vsel %vm293_vm2, %v1753_v40, 0.0 }
  0x2c   : > { %v1752_v44 = vld [vmem:[#allocation2 + $0x49] sm:$0xff]  ;;  %v1754_v51 = vld [vmem:[#allocation2 + $0x59] sm:$0xff]  ;;  %v4704_v55 = vpack.c.bf16 %v388_v43, %v387_v15  ;;  %v1757_v60 = vld [vmem:[#allocation2 + $0x71] sm:$0xff] }
  0x2d   : > { %v389_v49 = vld [vmem:[#allocation2 + $0xa8] sm:$0xff]  ;;  %v390_v50 = vld [vmem:[#allocation2 + $0xb0] sm:$0xff]  ;;  %v4706_v57 = vpack.c.bf16 %v1785_v45, %v1752_v44  ;;  %v4710_v59 = vpack.c.bf16 %v1787_v52, %v1754_v51  ;;  %v391_v2 = vld [vmem:[#allocation2 + $0xb8] sm:$0xff] }
  0x2e   : > { %3962 = vmatmul.mubr.msk.bf16.gmra.mrb[12].mxu0 %vm248_vm1, %v1491_v11  ;;  %v4708_v58 = vpack.c.bf16 %v390_v50, %v389_v49  ;;  %v1759_v63 = vld [vmem:[#allocation2 + $0x81] sm:$0xff]  ;;  %v1756_v5 = vld [vmem:[#allocation2 + $0x69] sm:$0xff]  ;;  %v1789_v11 = vsel %vm293_vm2, %v1757_v60, 0.0  ;;  %v1758_v17 = vld [vmem:[#allocation2 + $0x79] sm:$0xff] }
  0x2f   : > { %3983 = vmatprep.mubr.msk.bf16.mxu0 %vm248_vm1, %v4652_v13  ;;  %v392_v4 = vld [vmem:[#allocation2 + $0xc0] sm:$0xff]  ;;  %v393_v14 = vld [vmem:[#allocation2 + $0xc8] sm:$0xff]  ;;  %v394_v16 = vld [vmem:[#allocation2 + $0xd0] sm:$0xff]  ;;  %v1791_v18 = vsel %vm293_vm2, %v1759_v63, 0.0  ;;  %v4726_v20 = vpack.c.bf16 %v1789_v11, %v1756_v5 }
  0x30   : > { %v4724_v19 = vpack.c.bf16 %v392_v4, %v391_v2  ;;  %v4728_v21 = vpack.c.bf16 %v394_v16, %v393_v14  ;;  %v4730_v22 = vpack.c.bf16 %v1791_v18, %v1758_v17  ;;  %v1761_v23 = vld [vmem:[#allocation2 + $0x91] sm:$0xff]  ;;  %v1763_v24 = vld [vmem:[#allocation2 + $0xa1] sm:$0xff]  ;;  %v1760_v41 = vld [vmem:[#allocation2 + $0x89] sm:$0xff] }
  0x31   : > { %3822 = vmatmul.mubr.msk.bf16.gmra.mrb[8].mxu1 %vm248_vm1, %v4635_v9  ;;  %v396_v40 = vld [vmem:[#allocation2 + $0xe0] sm:$0xff]  ;;  %v1793_v15 = vsel %vm293_vm2, %v1761_v23, 0.0  ;;  %v397_v43 = vld [vmem:[#allocation2 + $0xe8] sm:$0xff]  ;;  %v398_v44 = vld [vmem:[#allocation2 + $0xf0] sm:$0xff]  ;;  %v1795_v49 = vsel %vm293_vm2, %v1763_v24, 0.0 }
  0x32   : > { %3825 = vmatprep.mubr.msk.bf16.mxu1 %vm248_vm1, %v4648_v12  ;;  %v1762_v45 = vld [vmem:[#allocation2 + $0x99] sm:$0xff]  ;;  %v4746_v51 = vpack.c.bf16 %v1793_v15, %v1760_v41  ;;  %v4748_v52 = vpack.c.bf16 %v398_v44, %v397_v43  ;;  %v1765_v63 = vld [vmem:[#allocation2 + $0xb1] sm:$0xff]  ;;  %v1767_v2 = vld [vmem:[#allocation2 + $0xc1] sm:$0xff] }
  0x33   : > { %v4750_v60 = vpack.c.bf16 %v1795_v49, %v1762_v45  ;;  %v399_v4 = vld [vmem:[#allocation2 + $0xf8] sm:$0xff]  ;;  %v400_v5 = vld [vmem:[#allocation2 + $0x100] sm:$0xff]  ;;  %v1764_v11 = vld [vmem:[#allocation2 + $0xa9] sm:$0xff]  ;;  %v1797_v14 = vsel %vm293_vm2, %v1765_v63, 0.0  ;;  %v1799_v17 = vsel %vm293_vm2, %v1767_v2, 0.0 }
  0x34   : > { %v1766_v16 = vld [vmem:[#allocation2 + $0xb9] sm:$0xff]  ;;  %v4764_v18 = vpack.c.bf16 %v400_v5, %v399_v4  ;;  %v4766_v23 = vpack.c.bf16 %v1797_v14, %v1764_v11  ;;  %v296_v41 = vld [vmem:[#allocation2 + $0x27] sm:$0xff]  ;;  %v297_v63 = vld [vmem:[#allocation2 + $0x2f] sm:$0xff] }
  0x35   : > { %v294_v24 = vld [vmem:[#allocation2 + $0x17] sm:$0xff]  ;;  %v1771_v15 = vld [vmem:[#allocation2 + $0xe1] sm:$0xff]  ;;  %v1768_v45 = vld [vmem:[#allocation2 + $0xc9] sm:$0xff]  ;;  %v326_v2 = vsel %vm290_vm3, %v296_v41, 0.0 }
  0x36   : > { %3984 = vmatmul.mubr.msk.bf16.vlgmr.msra.gmra.mrb[0].mxu0 %vm248_vm1, %v4667_v26  ;;  %v295_v43 = vld [vmem:[#allocation2 + $0x1f] sm:$0xff]  ;;  %v324_v44 = vsel %vm290_vm3, %v294_v24, 0.0  ;;  %v1803_v5 = vsel %vm293_vm2, %v1771_v15, 0.0  ;;  %v298_v24 = vld [vmem:[#allocation2 + $0x37] sm:$0xff]  ;;  %v300_v38 = vld [vmem:[#allocation2 + $0x47] sm:$0xff] }
  0x37   : > { %3987 = vmatprep.mubr.msk.bf16.mxu0 %vm248_vm1, %v4674_v34  ;;  %4016 = vmatpush3.bf16.msra.mxu0 %v2195_v39  ;;  %v395_v39 = vld [vmem:[#allocation2 + $0xd8] sm:$0xff]  ;;  %v4786_v11 = vpack.c.bf16 %v295_v43, %v324_v44  ;;  %v1775_v41 = vld [vmem:[#allocation2 + $0x101] sm:$0xff]  ;;  %v328_v43 = vsel %vm290_vm3, %v298_v24, 0.0  ;;  %v1772_v44 = vld [vmem:[#allocation2 + $0xe9] sm:$0xff] }
  0x38   : > { %4383 = vmatprep.subr.msk.bf16.mxu0 %vm466_vm0, %v4690_v42  ;;  %v4744_v50 = vpack.c.bf16 %v396_v40, %v395_v39  ;;  %v4769_v39 = vpack.c.bf16 %v1799_v17, %v1766_v16  ;;  %v1769_v40 = vld [vmem:[#allocation2 + $0xd1] sm:$0xff]  ;;  %v1770_v4 = vld [vmem:[#allocation2 + $0xd9] sm:$0xff]  ;;  %v963_v16 = vsel %vm466_vm0, %v4588_v48, 0  ;;  %v4792_v17 = vpack.c.bf16 %v297_v63, %v326_v2  ;;  %v4801_v15 = vld [vmem:[%s5276_s1 + $0x6] sm:$0x3] }
  0x39   : > { %3826 = vmatmul.mubr.msk.bf16.gmra.mrb[12].mxu1 %vm248_vm1, %v4665_v25  ;;  %v1801_v49 = vsel %vm293_vm2, %v1769_v40, 0.0  ;;  %v1773_v40 = vld [vmem:[#allocation2 + $0xf1] sm:$0xff]  ;;  %v299_v48 = vld [vmem:[#allocation2 + $0x3f] sm:$0xff]  ;;  %v330_v63 = vsel %vm290_vm3, %v300_v38, 0.0  ;;  %v304_v8 = vld [vmem:[#allocation2 + $0x67] sm:$0xff] }
  0x3a   : > { %3829 = vmatprep.mubr.msk.bf16.mxu1 %vm248_vm1, %v4669_v27  ;;  %v4788_v14 = vpack.c.bf16 %v1801_v49, %v1768_v45  ;;  %v1805_v45 = vsel %vm293_vm2, %v1773_v40, 0.0  ;;  %v301_v49 = vld [vmem:[#allocation2 + $0x4f] sm:$0xff]  ;;  %v1774_v2 = vld [vmem:[#allocation2 + $0xf9] sm:$0xff]  ;;  %v308_v7 = vld [vmem:[#allocation2 + $0x87] sm:$0xff] }
  0x3b   : > { %v4823_v24 = vpack.c.bf16 %v301_v49, %v330_v63  ;;  %v302_v28 = vld [vmem:[#allocation2 + $0x57] sm:$0xff]  ;;  %v303_v38 = vld [vmem:[#allocation2 + $0x5f] sm:$0xff]  ;;  %v316_v6 = vld [vmem:[#allocation2 + $0xc7] sm:$0xff] }
  0x3c   : > { %v1777_v40 = vld [vmem:[#allocation2 + $0x111] sm:$0xff]  ;;  %v307_v54 = vld [vmem:[#allocation2 + $0x7f] sm:$0xff] }
  0x3d   : > { %v2419_v47 = vld [vmem:[#allocation2 + $0x110] sm:$0xff] }
  0x3e   : > { %3988 = vmatmul.mubr.msk.bf16.gmra.mrb[4].mxu0 %vm248_vm1, %v4706_v57 }
  0x3f   : > { %3991 = vmatprep.mubr.msk.bf16.mxu0 %vm248_vm1, %v4710_v59 }
  0x41   : > { %3830 = vmatmul.mubr.msk.bf16.gmra.mrb[16].mxu1 %vm248_vm1, %v4704_v55 }
  0x42   : > { %3833 = vmatprep.mubr.msk.bf16.mxu1 %vm248_vm1, %v4708_v58 }
  0x46   : > { %3992 = vmatmul.mubr.msk.bf16.gmra.mrb[8].mxu0 %vm248_vm1, %v4726_v20 }
  0x47   : > { %3995 = vmatprep.mubr.msk.bf16.mxu0 %vm248_vm1, %v4730_v22 }
  0x49   : > { %3834 = vmatmul.mubr.msk.bf16.gmra.mrb[20].mxu1 %vm248_vm1, %v4724_v19 }
  0x4a   : > { %3837 = vmatprep.mubr.msk.bf16.mxu1 %vm248_vm1, %v4728_v21 }
  0x4e   : > { %3996 = vmatmul.mubr.msk.bf16.gmra.mrb[12].mxu0 %vm248_vm1, %v4746_v51 }
  0x4f   : > { %3999 = vmatprep.mubr.msk.bf16.mxu0 %vm248_vm1, %v4750_v60 }
  0x51   : > { %3838 = vmatmul.mubr.msk.bf16.gmra.mrb[24].mxu1 %vm248_vm1, %v4744_v50 }
  0x52   : > { %3841 = vmatprep.mubr.msk.bf16.mxu1 %vm248_vm1, %v4748_v52 }
  0x56   : > { %4000 = vmatmul.mubr.msk.bf16.gmra.mrb[16].mxu0 %vm248_vm1, %v4766_v23 }
  0x57   : > { %4003 = vmatprep.mubr.msk.bf16.mxu0 %vm248_vm1, %v4769_v39 }
  0x59   : > { %3842 = vmatmul.mubr.msk.bf16.gmra.mrb[28].mxu1 %vm248_vm1, %v4764_v18 }
  0x5a   : > { %3847 = vmatprep.mubr.bf16.mxu1 %v5280_v3  ;;  %v4794_v3 = vpack.c.bf16 %v1803_v5, %v1770_v4  ;;  %v1807_v4 = vsel %vm293_vm2, %v1775_v41, 0.0  ;;  %v4819_v5 = vpack.c.bf16 %v299_v48, %v328_v43  ;;  %v332_v41 = vsel %vm290_vm3, %v302_v28, 0.0  ;;  %v1776_v48 = vld [vmem:[#allocation2 + $0x109] sm:$0xff] }
  0x5b   : > { %v4825_v10 = vpack.c.bf16 %v1807_v4, %v1774_v2  ;;  %v1809_v43 = vsel %vm293_vm2, %v1777_v40, 0.0  ;;  %v4841_v49 = vpack.c.bf16 %v303_v38, %v332_v41  ;;  %v306_v4 = vld [vmem:[#allocation2 + $0x77] sm:$0xff]  ;;  %v309_v28 = vld [vmem:[#allocation2 + $0x8f] sm:$0xff]  ;;  %v338_v40 = vsel %vm290_vm3, %v308_v7, 0.0  ;;  %v311_v7 = vld [vmem:[#allocation2 + $0x9f] sm:$0xff] }
  0x5c   : > { %v4843_v63 = vpack.c.bf16 %v1809_v43, %v1776_v48  ;;  %v4861_v41 = vpack.c.bf16 %v309_v28, %v338_v40  ;;  %v310_v48 = vld [vmem:[#allocation2 + $0x97] sm:$0xff]  ;;  %v2483_v43 = vsel %vm466_vm0, %v4690_v42, 0  ;;  %v313_v42 = vld [vmem:[#allocation2 + $0xaf] sm:$0xff] }
  0x5d   : > { %v314_v40 = vld [vmem:[#allocation2 + $0xb7] sm:$0xff] }
  0x5e   : > { %4004 = vmatmul.mubr.msk.bf16.gmra.mrb[20].mxu0 %vm248_vm1, %v4788_v14  ;;  %5299 = vst [vmem:[#allocation11_spill] sm:$0xff] %v4843_v63 }
  0x5f   : > { %4007 = vmatprep.mubr.msk.bf16.mxu0 %vm248_vm1, %v4794_v3 }
  0x61   : > { %3848 = vmatmul.mubr.msk.bf16.vlgmr.msra.gmra.mrb[0].mxu1 %vm248_vm1, %v4786_v11 }
  0x62   : > { %3880 = vmatpush3.bf16.msra.mxu1 %v963_v16  ;;  %3851 = vmatprep.mubr.msk.bf16.mxu1 %vm248_vm1, %v4792_v17  ;;  %v4821_v16 = vpack.c.bf16 %v1805_v45, %v1772_v44  ;;  %v305_v44 = vld [vmem:[#allocation2 + $0x6f] sm:$0xff]  ;;  %v334_v45 = vsel %vm290_vm3, %v304_v8, 0.0  ;;  %v336_v8 = vsel %vm290_vm3, %v306_v4, 0.0  ;;  %v340_v4 = vsel %vm290_vm3, %v310_v48, 0.0  ;;  %v315_v48 = vld [vmem:[#allocation2 + $0xbf] sm:$0xff] }
  0x63   : > { %4378 = vmatprep.subr.msk.bf16.mxu1 %vm466_vm0, %v4801_v15  ;;  %v4845_v2 = vpack.c.bf16 %v305_v44, %v334_v45  ;;  %v4859_v38 = vpack.c.bf16 %v307_v54, %v336_v8  ;;  %v312_v44 = vld [vmem:[#allocation2 + $0xa7] sm:$0xff]  ;;  %v4870_v45 = vld [vmem:[%s5276_s1 + $0x10] sm:$0x3]  ;;  %v4884_v8 = vpack.c.bf16 %v311_v7, %v340_v4  ;;  %v346_v7 = vsel %vm290_vm3, %v316_v6, 0.0 }
  0x64   : > { %v342_v54 = vsel %vm290_vm3, %v312_v44, 0.0  ;;  %v317_v44 = vld [vmem:[#allocation2 + $0xcf] sm:$0xff] }
  0x65   : > { %v4886_v28 = vpack.c.bf16 %v313_v42, %v342_v54  ;;  %v4902_v42 = vpack.c.bf16 %v317_v44, %v346_v7  ;;  %v318_v54 = vld [vmem:[#allocation2 + $0xd7] sm:$0xff]  ;;  %v321_v6 = vld [vmem:[#allocation2 + $0xef] sm:$0xff] }
  0x66   : > { %4008 = vmatmul.mubr.msk.bf16.gmra.mrb[24].mxu0 %vm248_vm1, %v4821_v16  ;;  %v348_v62 = vsel %vm290_vm3, %v318_v54, 0.0  ;;  %v322_v7 = vld [vmem:[#allocation2 + $0xf7] sm:$0xff]  ;;  %v323_v54 = vld [vmem:[#allocation2 + $0xff] sm:$0xff] }
  0x67   : > { %4011 = vmatprep.mubr.msk.bf16.mxu0 %vm248_vm1, %v4825_v10  ;;  %v352_v61 = vsel %vm290_vm3, %v322_v7, 0.0 }
  0x69   : > { %3852 = vmatmul.mubr.msk.bf16.gmra.mrb[4].mxu1 %vm248_vm1, %v4819_v5 }
  0x6a   : > { %3855 = vmatprep.mubr.msk.bf16.mxu1 %vm248_vm1, %v4823_v24 }
  0x6e   : > { %4012 = vmatmul.mubr.msk.bf16.gmra.mrb[28].mxu0 %vm248_vm1, %v4843_v63  ;;  %v320_v63 = vld [vmem:[#allocation2 + $0xe7] sm:$0xff] }
  0x6f   : > { %4017 = vmatprep.mubr.msk.bf16.mxu0 %vm248_vm1, %v4792_v17 }
  0x71   : > { %3856 = vmatmul.mubr.msk.bf16.gmra.mrb[8].mxu1 %vm248_vm1, %v4841_v49 }
  0x72   : > { %3859 = vmatprep.mubr.msk.bf16.mxu1 %vm248_vm1, %v4845_v2 }
  0x76   : > { %4018 = vmatmul.mubr.msk.bf16.vlgmr.msra.gmra.mrb[0].mxu0 %vm248_vm1, %v4819_v5 }
  0x77   : > { %4021 = vmatprep.mubr.msk.bf16.mxu0 %vm248_vm1, %v4823_v24  ;;  %4050 = vmatpush3.bf16.msra.mxu0 %v2483_v43  ;;  %v344_v43 = vsel %vm290_vm3, %v314_v40, 0.0  ;;  %v319_v40 = vld [vmem:[#allocation2 + $0xdf] sm:$0xff] }
  0x78   : > { %4384 = vmatprep.subr.msk.bf16.mxu0 %vm466_vm0, %v4870_v45  ;;  %v4900_v4 = vpack.c.bf16 %v315_v48, %v344_v43  ;;  %v350_v48 = vsel %vm290_vm3, %v320_v63, 0.0  ;;  %v4916_v43 = vpack.c.bf16 %v319_v40, %v348_v62  ;;  %v4930_v62 = vpack.c.bf16 %v323_v54, %v352_v61  ;;  %v2101_v61 = vld [vmem:[#allocation2 + $0x10f] sm:$0xff] }
  0x79   : > { %3860 = vmatmul.mubr.msk.bf16.gmra.mrb[12].mxu1 %vm248_vm1, %v4859_v38  ;;  %v4918_v44 = vpack.c.bf16 %v321_v6, %v350_v48  ;;  %v5300_v63 = vmov 0.0|0.0   ;;  %v1289_v40 = vsel %vm466_vm0, %v4801_v15, 0  ;;  %v2100_v6 = vld [vmem:[#allocation2 + $0x107] sm:$0xff] }
  0x7a   : > { %3863 = vmatprep.mubr.msk.bf16.mxu1 %vm248_vm1, %v4861_v41  ;;  %v2130_v48 = vsel %vm290_vm3, %v2100_v6, 0.0 }
  0x7b   : > { %v4953_v15 = vpack.c.bf16 %v2101_v61, %v2130_v48 }
  0x7e   : > { %4022 = vmatmul.mubr.msk.bf16.gmra.mrb[4].mxu0 %vm248_vm1, %v4841_v49 }
  0x7f   : > { %4025 = vmatprep.mubr.msk.bf16.mxu0 %vm248_vm1, %v4845_v2 }
  0x81   : > { %3864 = vmatmul.mubr.msk.bf16.gmra.mrb[16].mxu1 %vm248_vm1, %v4884_v8 }
  0x82   : > { %3867 = vmatprep.mubr.msk.bf16.mxu1 %vm248_vm1, %v4886_v28 }
  0x86   : > { %4026 = vmatmul.mubr.msk.bf16.gmra.mrb[8].mxu0 %vm248_vm1, %v4859_v38 }
  0x87   : > { %4029 = vmatprep.mubr.msk.bf16.mxu0 %vm248_vm1, %v4861_v41 }
  0x89   : > { %3868 = vmatmul.mubr.msk.bf16.gmra.mrb[20].mxu1 %vm248_vm1, %v4900_v4 }
  0x8a   : > { %3871 = vmatprep.mubr.msk.bf16.mxu1 %vm248_vm1, %v4902_v42 }
  0x8e   : > { %4030 = vmatmul.mubr.msk.bf16.gmra.mrb[12].mxu0 %vm248_vm1, %v4884_v8 }
  0x8f   : > { %4033 = vmatprep.mubr.msk.bf16.mxu0 %vm248_vm1, %v4886_v28 }
  0x91   : > { %3872 = vmatmul.mubr.msk.bf16.gmra.mrb[24].mxu1 %vm248_vm1, %v4916_v43 }
  0x92   : > { %3875 = vmatprep.mubr.msk.bf16.mxu1 %vm248_vm1, %v4918_v44 }
  0x96   : > { %4034 = vmatmul.mubr.msk.bf16.gmra.mrb[16].mxu0 %vm248_vm1, %v4900_v4 }
  0x97   : > { %4037 = vmatprep.mubr.msk.bf16.mxu0 %vm248_vm1, %v4902_v42 }
  0x99   : > { %3876 = vmatmul.mubr.msk.bf16.gmra.mrb[28].mxu1 %vm248_vm1, %v4930_v62 }
  0x9a   : > { %3881 = vmatprep.mubr.bf16.mxu1 %v5300_v63 }
  0x9e   : > { %4038 = vmatmul.mubr.msk.bf16.gmra.mrb[20].mxu0 %vm248_vm1, %v4916_v43 }
  0x9f   : > { %4041 = vmatprep.mubr.msk.bf16.mxu0 %vm248_vm1, %v4918_v44 }
  0xa1   : > { %3882 = vmatmul.mubr.msk.bf16.vlgmr.msra.gmra.mrb[0].mxu1 %vm248_vm1, %v4652_v13 }
  0xa2   : > { %3914 = vmatpush3.bf16.msra.mxu1 %v1289_v40  ;;  %3885 = vmatprep.mubr.msk.bf16.mxu1 %vm248_vm1, %v4667_v26 }
  0xa3   : > { %4380 = vmatprep.subr.msk.bf16.mxu1 %vm466_vm0, %v4441_v0  ;;  %v2801_v0 = vsel %vm466_vm0, %v4870_v45, 0 }
  0xa6   : > { %4042 = vmatmul.mubr.msk.bf16.gmra.mrb[24].mxu0 %vm248_vm1, %v4930_v62 }
  0xa7   : > { %4045 = vmatprep.mubr.msk.bf16.mxu0 %vm248_vm1, %v4953_v15 }
  0xa9   : > { %3886 = vmatmul.mubr.msk.bf16.gmra.mrb[4].mxu1 %vm248_vm1, %v4674_v34 }
  0xaa   : > { %3889 = vmatprep.mubr.msk.bf16.mxu1 %vm248_vm1, %v4706_v57 }
  0xae   : > { %4046 = vmatmul.mubr.bf16.gmra.mrb[28].mxu0 %v5300_v63 }
  0xaf   : > { %4051 = vmatprep.mubr.msk.bf16.mxu0 %vm248_vm1, %v4580_v46  ;;  %v2418_v46 = vld [vmem:[#allocation2 + $0x108] sm:$0xff] }
  0xb1   : > { %3890 = vmatmul.mubr.msk.bf16.gmra.mrb[8].mxu1 %vm248_vm1, %v4710_v59 }
  0xb2   : > { %3893 = vmatprep.mubr.msk.bf16.mxu1 %vm248_vm1, %v4726_v20 }
  0xb6   : > { %4052 = vmatmul.mubr.msk.bf16.vlgmr.msra.gmra.mrb[0].mxu0 %vm248_vm1, %v4596_v53  ;;  %v2434_v53 = vpack.c.bf16 %v2419_v47, %v2418_v46 }
  0xb7   : > { %4055 = vmatprep.mubr.msk.bf16.mxu0 %vm248_vm1, %v4603_v56  ;;  %4084 = vmatpush3.bf16.msra.mxu0 %v2801_v0  ;;  %v1493_v56 = vpack.c.bf16 %v4552_v32, %v4549_v31  ;;  %v5303_v31 = vld [vmem:[#allocation11_spill] sm:$0xff]  ;;  %v5305_v32 = vld [vmem:[#allocation6_spill] sm:$0xff] }
  0xb9   : > { %3894 = vmatmul.mubr.msk.bf16.gmra.mrb[12].mxu1 %vm248_vm1, %v4730_v22 }
  0xba   : > { %3897 = vmatprep.mubr.msk.bf16.mxu1 %vm248_vm1, %v4746_v51 }
  0xbe   : > { %4056 = vmatmul.mubr.msk.bf16.gmra.mrb[4].mxu0 %vm248_vm1, %v4635_v9  ;;  %v1494_v9 = vpack.c.bf16 %v4562_v35, %v4555_v33  ;;  %v5306_v35 = vld [vmem:[#allocation7_spill] sm:$0xff] }
  0xbf   : > { %4059 = vmatprep.mubr.msk.bf16.mxu0 %vm248_vm1, %v4648_v12  ;;  %v5302_v12 = vld [vmem:[#allocation4_spill] sm:$0xff] }
  0xc1   : > { %3898 = vmatmul.mubr.msk.bf16.gmra.mrb[16].mxu1 %vm248_vm1, %v4750_v60 }
  0xc2   : > { %3901 = vmatprep.mubr.msk.bf16.mxu1 %vm248_vm1, %v4766_v23 }
  0xc6   : > { %4060 = vmatmul.mubr.msk.bf16.gmra.mrb[8].mxu0 %vm248_vm1, %v4665_v25  ;;  %v5307_v25 = vld [vmem:[#allocation8_spill] sm:$0xff] }
  0xc7   : > { %4063 = vmatprep.mubr.msk.bf16.mxu0 %vm248_vm1, %v4669_v27 }
  0xc9   : > { %3902 = vmatmul.mubr.msk.bf16.gmra.mrb[20].mxu1 %vm248_vm1, %v4769_v39 }
  0xca   : > { %3905 = vmatprep.mubr.msk.bf16.mxu1 %vm248_vm1, %v4788_v14 }
  0xce   : > { %4064 = vmatmul.mubr.msk.bf16.gmra.mrb[12].mxu0 %vm248_vm1, %v4704_v55 }
  0xcf   : > { %4067 = vmatprep.mubr.msk.bf16.mxu0 %vm248_vm1, %v4708_v58 }
  0xd1   : > { %3906 = vmatmul.mubr.msk.bf16.gmra.mrb[24].mxu1 %vm248_vm1, %v4794_v3 }
  0xd2   : > { %3909 = vmatprep.mubr.msk.bf16.mxu1 %vm248_vm1, %v4821_v16 }
  0xd6   : > { %4068 = vmatmul.mubr.msk.bf16.gmra.mrb[16].mxu0 %vm248_vm1, %v4724_v19 }
  0xd7   : > { %4071 = vmatprep.mubr.msk.bf16.mxu0 %vm248_vm1, %v4728_v21 }
  0xd9   : > { %3910 = vmatmul.mubr.msk.bf16.gmra.mrb[28].mxu1 %vm248_vm1, %v4825_v10 }
  0xda   : > { %3915 = vmatprep.mubr.msk.bf16.mxu1 %vm248_vm1, %v4786_v11 }
  0xde   : > { %4072 = vmatmul.mubr.msk.bf16.gmra.mrb[20].mxu0 %vm248_vm1, %v4744_v50 }
  0xdf   : > { %4075 = vmatprep.mubr.msk.bf16.mxu0 %vm248_vm1, %v4748_v52 }
  0xe1   : > { %3916 = vmatmul.mubr.msk.bf16.vlgmr.msra.gmra.mrb[0].mxu1 %vm248_vm1, %v4792_v17 }
  0xe2   : > { %4118 = vmatpush3.bf16.msra.mxu1 %v4447_v1  ;;  %3919 = vmatprep.mubr.msk.bf16.mxu1 %vm248_vm1, %v4819_v5  ;;  %v1492_v1 = vpack.c.bf16 %v4538_v30, %v4535_v29  ;;  %v1495_v29 = vpack.c.bf16 %v4570_v37, %v4567_v36  ;;  %v5301_v30 = vld [vmem:[#allocation3_spill] sm:$0xff]  ;;  %v5308_v36 = vld [vmem:[#allocation9_spill] sm:$0xff]  ;;  %v5309_v37 = vld [vmem:[#allocation10_spill] sm:$0xff] }
  0xe3   : > { %v1496_v13 = vpack.c.bf16 %v5302_v12, %v5301_v30 }
  0xe6   : > { %4076 = vmatmul.mubr.msk.bf16.gmra.mrb[24].mxu0 %vm248_vm1, %v4764_v18 }
  0xe7   : > { %4079 = vmatprep.mubr.msk.bf16.mxu0 %vm248_vm1, %v2434_v53 }
  0xe9   : > { %3920 = vmatmul.mubr.msk.bf16.gmra.mrb[4].mxu1 %vm248_vm1, %v4823_v24 }
  0xea   : > { %3923 = vmatprep.mubr.msk.bf16.mxu1 %vm248_vm1, %v4841_v49 }
  0xee   : > { %4080 = vmatmul.mubr.bf16.gmra.mrb[28].mxu0 %v5300_v63 }
  0xef   : > { %4085 = vmatprep.mubr.msk.bf16.mxu0 %vm248_vm1, %v4667_v26  ;;  %v1498_v26 = vpack.c.bf16 %v5307_v25, %v5306_v35 }
  0xf1   : > { %3924 = vmatmul.mubr.msk.bf16.gmra.mrb[8].mxu1 %vm248_vm1, %v4845_v2 }
  0xf2   : > { %3927 = vmatprep.mubr.msk.bf16.mxu1 %vm248_vm1, %v4859_v38 }
  0xf6   : > { %4086 = vmatmul.mubr.msk.bf16.vlgmr.msra.gmra.mrb[0].mxu0 %vm248_vm1, %v4674_v34 }
  0xf7   : > { %4089 = vmatprep.mubr.msk.bf16.mxu0 %vm248_vm1, %v4706_v57 }
  0xf9   : > { %3928 = vmatmul.mubr.msk.bf16.gmra.mrb[12].mxu1 %vm248_vm1, %v4861_v41 }
  0xfa   : > { %3931 = vmatprep.mubr.msk.bf16.mxu1 %vm248_vm1, %v4884_v8 }
  0xfe   : > { %4090 = vmatmul.mubr.msk.bf16.gmra.mrb[4].mxu0 %vm248_vm1, %v4710_v59 }
  0xff   : > { %4093 = vmatprep.mubr.msk.bf16.mxu0 %vm248_vm1, %v4726_v20 }
 0x101   : > { %3932 = vmatmul.mubr.msk.bf16.gmra.mrb[16].mxu1 %vm248_vm1, %v4886_v28 }
 0x102   : > { %3935 = vmatprep.mubr.msk.bf16.mxu1 %vm248_vm1, %v4900_v4 }
 0x106   : > { %4094 = vmatmul.mubr.msk.bf16.gmra.mrb[8].mxu0 %vm248_vm1, %v4730_v22 }
 0x107   : > { %4097 = vmatprep.mubr.msk.bf16.mxu0 %vm248_vm1, %v4746_v51 }
 0x109   : > { %3936 = vmatmul.mubr.msk.bf16.gmra.mrb[20].mxu1 %vm248_vm1, %v4902_v42 }
 0x10a   : > { %3939 = vmatprep.mubr.msk.bf16.mxu1 %vm248_vm1, %v4916_v43 }
 0x10e   : > { %4098 = vmatmul.mubr.msk.bf16.gmra.mrb[12].mxu0 %vm248_vm1, %v4750_v60 }
 0x10f   : > { %4101 = vmatprep.mubr.msk.bf16.mxu0 %vm248_vm1, %v4766_v23 }
 0x111   : > { %3940 = vmatmul.mubr.msk.bf16.gmra.mrb[24].mxu1 %vm248_vm1, %v4918_v44 }
 0x112   : > { %3943 = vmatprep.mubr.msk.bf16.mxu1 %vm248_vm1, %v4930_v62 }
 0x116   : > { %4102 = vmatmul.mubr.msk.bf16.gmra.mrb[16].mxu0 %vm248_vm1, %v4769_v39 }
 0x117   : > { %4105 = vmatprep.mubr.msk.bf16.mxu0 %vm248_vm1, %v4788_v14 }
 0x119   : > { %3944 = vmatmul.mubr.msk.bf16.gmra.mrb[28].mxu1 %vm248_vm1, %v4953_v15 }
 0x11a   : > { %3965 = vmatprep.mubr.msk.bf16.mxu1 %vm248_vm1, %v1492_v1 }
 0x11e   : > { %4106 = vmatmul.mubr.msk.bf16.gmra.mrb[20].mxu0 %vm248_vm1, %v4794_v3  ;;  %v5304_v3 = vld [vmem:[#allocation5_spill] sm:$0xff] }
 0x11f   : > { %4109 = vmatprep.mubr.msk.bf16.mxu0 %vm248_vm1, %v4821_v16  ;;  %v1497_v33 = vpack.c.bf16 %v5305_v32, %v5304_v3 }
 0x121   : > { %3966 = vmatmul.mubr.msk.bf16.vlgmr.msra.gmra.mrb[16].mxu1 %vm248_vm1, %v1493_v56 }
 0x122   : > { %3969 = vmatprep.mubr.msk.bf16.mxu1 %vm248_vm1, %v1494_v9 }
 0x126   : > { %4110 = vmatmul.mubr.msk.bf16.gmra.mrb[24].mxu0 %vm248_vm1, %v4825_v10  ;;  %v1499_v10 = vpack.c.bf16 %v5309_v37, %v5308_v36 }
 0x127   : > { %4113 = vmatprep.mubr.msk.bf16.mxu0 %vm248_vm1, %v5303_v31 }
 0x129   : > { %3970 = vmatmul.mubr.msk.bf16.gmra.mrb[20].mxu1 %vm248_vm1, %v1495_v29 }
 0x12a   : > { %3973 = vmatprep.mubr.msk.bf16.mxu1 %vm248_vm1, %v1496_v13 }
 0x12e   : > { %4114 = vmatmul.mubr.bf16.gmra.mrb[28].mxu0 %v5300_v63 }
 0x131   : > { %3974 = vmatmul.mubr.msk.bf16.gmra.mrb[24].mxu1 %vm248_vm1, %v1497_v33 }
 0x132   : > { %3977 = vmatprep.mubr.msk.bf16.mxu1 %vm248_vm1, %v1498_v26 }
 0x139   : > { %3978 = vmatmul.mubr.msk.bf16.gmra.mrb[28].mxu1 %vm248_vm1, %v1499_v10 }
 0x1b4   : > { %v3917_v27 = vpop.f32.mrb[0].mxu1 }
 0x1b5   : > { %v1325_v34 = vpop.f32.mrb[1].mxu1 }
 0x1b6   : > { %v3918_v55 = vpop.f32.mrb[2].mxu1 }
 0x1b7   : > { %v1328_v57 = vpop.f32.mrb[3].mxu1 }
 0x1bc   : > { %v3921_v58 = vpop.f32.mrb[4].mxu1 }
 0x1bd   : > { %v1341_v59 = vpop.f32.mrb[5].mxu1 }
 0x1be   : > { %v3922_v19 = vpop.f32.mrb[6].mxu1 }
 0x1bf   : > { %v1344_v20 = vpop.f32.mrb[7].mxu1 }
 0x1c4   : > { %v5106_v21 = vpop.f32.mrb[8].mxu1 }
 0x1c5   : > { %v5108_v22 = vpop.f32.mrb[9].mxu1 }
 0x1c6   : > { %v5110_v50 = vpop.f32.mrb[10].mxu1 }
 0x1c7   : > { %v5112_v51 = vpop.f32.mrb[11].mxu1 }
 0x1c9   : > { %v4087_v18 = vpop.f32.mrb[0].mxu0 }
 0x1ca   : > { %v4119_v23 = vadd.f32 %v4087_v18, %v3917_v27  ;;  %v2837_v11 = vpop.f32.mrb[1].mxu0 }
 0x1cb   : > { %v4120_v14 = vadd.f32 %v2837_v11, %v1325_v34  ;;  %v4088_v5 = vpop.f32.mrb[2].mxu0 }
 0x1cc   : > { %v5114_v52 = vpop.f32.mrb[12].mxu1  ;;  %v3628_v16 = vpack.c.bf16 %v4119_v23, %v4119_v23  ;;  %v4121_v24 = vadd.f32 %v4088_v5, %v3918_v55  ;;  %v2840_v49 = vpop.f32.mrb[3].mxu0  ;;  %v3069_v45 = vmul.f32 %v4119_v23, %v4119_v23  ;;  %v2999_v54 = vsel %vm248_vm1, %v4119_v23, 0.0 }
 0x1cd   : > { %v5117_v60 = vpop.f32.mrb[13].mxu1  ;;  %v3067_v2 = vmul.f32 %v4120_v14, %v4120_v14  ;;  %v3626_v38 = vpack.c.bf16 %v4120_v14, %v4120_v14  ;;  %v4122_v41 = vadd.f32 %v2840_v49, %v1328_v57  ;;  %v2996_v28 = vsel %vm248_vm1, %v4120_v14, 0.0 }
 0x1ce   : > { %v5119_v39 = vpop.f32.mrb[14].mxu1  ;;  %3300 = vst.msk [vmem:[%s5124_s18 + $0x8] sm:$0xf] %vm3297_vm4, %v3628_v16  ;;  %v3629_v8 = vpack.c.bf16 %v4121_v24, %v4121_v24  ;;  %v3070_v44 = vmul.f32 %v4121_v24, %v4121_v24  ;;  %v3102_v0 = vsel %vm248_vm1, %v3069_v45, 0.0  ;;  %v3001_v53 = vsel %vm248_vm1, %v4121_v24, 0.0 }
 0x1cf   : > { %v5126_v17 = vpop.f32.mrb[15].mxu1  ;;  %3298 = vst.msk [vmem:[%s5124_s18] sm:$0xf] %vm3297_vm4, %v3626_v38  ;;  %v2997_v4 = vsel %vm248_vm1, %v4122_v41, 0.0  ;;  %v3068_v42 = vmul.f32 %v4122_v41, %v4122_v41  ;;  %v3627_v43 = vpack.c.bf16 %v4122_v41, %v4122_v41  ;;  %v3099_v62 = vsel %vm248_vm1, %v3067_v2, 0.0 }
 0x1d0   : > { %3301 = vst.msk [vmem:[%s5124_s18 + $0xc] sm:$0xf] %vm3297_vm4, %v3629_v8  ;;  %v2998_v7 = vadd.f32 %v2997_v4, %v2996_v28  ;;  %v3104_v1 = vsel %vm248_vm1, %v3070_v44, 0.0 }
 0x1d1   : > { %v3100_v63 = vsel %vm248_vm1, %v3068_v42, 0.0  ;;  %3299 = vst.msk [vmem:[%s5124_s18 + $0x4] sm:$0xf] %vm3297_vm4, %v3627_v43  ;;  %v4091_v40 = vpop.f32.mrb[4].mxu0 }
 0x1d2   : > { %v3000_v6 = vadd.f32 %v2999_v54, %v2998_v7  ;;  %v3101_v61 = vadd.f32 %v3100_v63, %v3099_v62  ;;  %v4123_v48 = vadd.f32 %v4091_v40, %v3921_v58  ;;  %v2853_v15 = vpop.f32.mrb[5].mxu0 }
 0x1d3   : > { %v4124_v46 = vadd.f32 %v2853_v15, %v1341_v59  ;;  %v4092_v47 = vpop.f32.mrb[6].mxu0 }
 0x1d4   : > { %v3103_v56 = vadd.f32 %v3102_v0, %v3101_v61  ;;  %v3632_v9 = vpack.c.bf16 %v4123_v48, %v4123_v48  ;;  %v2856_v29 = vpop.f32.mrb[7].mxu0  ;;  %v3002_v30 = vadd.f32 %v3001_v53, %v3000_v6  ;;  %v4125_v32 = vadd.f32 %v4092_v47, %v3922_v19 }
 0x1d5   : > { %v3003_v12 = vsel %vm248_vm1, %v4124_v46, 0.0  ;;  %v3071_v13 = vmul.f32 %v4124_v46, %v4124_v46  ;;  %v3630_v31 = vpack.c.bf16 %v4124_v46, %v4124_v46  ;;  %v4126_v33 = vadd.f32 %v2856_v29, %v1344_v20 }
 0x1d6   : > { %3304 = vst.msk [vmem:[%s5124_s18 + $0x18] sm:$0xf] %vm3297_vm4, %v3632_v9  ;;  %v3105_v3 = vadd.f32 %v3104_v1, %v3103_v56  ;;  %v3004_v35 = vadd.f32 %v3003_v12, %v3002_v30  ;;  %v3073_v26 = vmul.f32 %v4123_v48, %v4123_v48  ;;  %v3633_v37 = vpack.c.bf16 %v4125_v32, %v4125_v32 }
 0x1d7   : > { %v3106_v25 = vsel %vm248_vm1, %v3071_v13, 0.0  ;;  %3302 = vst.msk [vmem:[%s5124_s18 + $0x10] sm:$0xf] %vm3297_vm4, %v3630_v31  ;;  %v3005_v10 = vsel %vm248_vm1, %v4126_v33, 0.0  ;;  %v3072_v27 = vmul.f32 %v4126_v33, %v4126_v33  ;;  %v3631_v34 = vpack.c.bf16 %v4126_v33, %v4126_v33 }
 0x1d8   : > { %v3107_v36 = vadd.f32 %v3106_v25, %v3105_v3  ;;  %3305 = vst.msk [vmem:[%s5124_s18 + $0x1c] sm:$0xf] %vm3297_vm4, %v3633_v37  ;;  %v3006_v57 = vadd.f32 %v3005_v10, %v3004_v35  ;;  %v3007_v19 = vsel %vm248_vm1, %v4123_v48, 0.0  ;;  %v3074_v20 = vmul.f32 %v4125_v32, %v4125_v32 }
 0x1d9   : > { %v4095_v55 = vpop.f32.mrb[8].mxu0  ;;  %v3108_v18 = vsel %vm248_vm1, %v3072_v27, 0.0  ;;  %3303 = vst.msk [vmem:[%s5124_s18 + $0x14] sm:$0xf] %vm3297_vm4, %v3631_v34  ;;  %v3110_v14 = vsel %vm248_vm1, %v3073_v26, 0.0  ;;  %v3009_v5 = vsel %vm248_vm1, %v4125_v32, 0.0 }
 0x1da   : > { %v4127_v58 = vadd.f32 %v4095_v55, %v5106_v21  ;;  %v2869_v59 = vpop.f32.mrb[9].mxu0  ;;  %v3008_v16 = vadd.f32 %v3007_v19, %v3006_v57  ;;  %v3109_v24 = vadd.f32 %v3108_v18, %v3107_v36 }
 0x1db   : > { %v4128_v23 = vadd.f32 %v2869_v59, %v5108_v22  ;;  %v4096_v11 = vpop.f32.mrb[10].mxu0  ;;  %v3112_v22 = vsel %vm248_vm1, %v3074_v20, 0.0 }
 0x1dc   : > { %v2872_v21 = vpop.f32.mrb[11].mxu0  ;;  %v3636_v49 = vpack.c.bf16 %v4127_v58, %v4127_v58  ;;  %v3111_v45 = vadd.f32 %v3110_v14, %v3109_v24  ;;  %v3010_v8 = vadd.f32 %v3009_v5, %v3008_v16  ;;  %v4129_v28 = vadd.f32 %v4096_v11, %v5110_v50 }
 0x1dd   : > { %v3011_v2 = vsel %vm248_vm1, %v4128_v23, 0.0  ;;  %v3075_v38 = vmul.f32 %v4128_v23, %v4128_v23  ;;  %v3634_v41 = vpack.c.bf16 %v4128_v23, %v4128_v23  ;;  %v4130_v42 = vadd.f32 %v2872_v21, %v5112_v51 }
 0x1de   : > { %3308 = vst.msk [vmem:[%s5124_s18 + $0x28] sm:$0xf] %vm3297_vm4, %v3636_v49  ;;  %v3077_v43 = vmul.f32 %v4127_v58, %v4127_v58  ;;  %v3012_v44 = vadd.f32 %v3011_v2, %v3010_v8  ;;  %v3113_v7 = vadd.f32 %v3112_v22, %v3111_v45  ;;  %v3637_v54 = vpack.c.bf16 %v4129_v28, %v4129_v28 }
 0x1df   : > { %v3114_v4 = vsel %vm248_vm1, %v3075_v38, 0.0  ;;  %3306 = vst.msk [vmem:[%s5124_s18 + $0x20] sm:$0xf] %vm3297_vm4, %v3634_v41  ;;  %v3013_v62 = vsel %vm248_vm1, %v4130_v42, 0.0  ;;  %v3076_v63 = vmul.f32 %v4130_v42, %v4130_v42  ;;  %v3635_v50 = vpack.c.bf16 %v4130_v42, %v4130_v42 }
 0x1e0   : > { %v3115_v6 = vadd.f32 %v3114_v4, %v3113_v7  ;;  %v3014_v61 = vadd.f32 %v3013_v62, %v3012_v44  ;;  %v3015_v0 = vsel %vm248_vm1, %v4127_v58, 0.0  ;;  %v3078_v46 = vmul.f32 %v4129_v28, %v4129_v28  ;;  %3309 = vst.msk [vmem:[%s5124_s18 + $0x2c] sm:$0xf] %vm3297_vm4, %v3637_v54 }
 0x1e1   : > { %v4099_v40 = vpop.f32.mrb[12].mxu0  ;;  %v3116_v51 = vsel %vm248_vm1, %v3076_v63, 0.0  ;;  %3307 = vst.msk [vmem:[%s5124_s18 + $0x24] sm:$0xf] %vm3297_vm4, %v3635_v50  ;;  %v3118_v1 = vsel %vm248_vm1, %v3077_v43, 0.0  ;;  %v3017_v56 = vsel %vm248_vm1, %v4129_v28, 0.0 }
 0x1e2   : > { %v4131_v48 = vadd.f32 %v4099_v40, %v5114_v52  ;;  %v2885_v15 = vpop.f32.mrb[13].mxu0  ;;  %v3016_v52 = vadd.f32 %v3015_v0, %v3014_v61  ;;  %v3117_v9 = vadd.f32 %v3116_v51, %v3115_v6 }
 0x1e3   : > { %v4132_v47 = vadd.f32 %v2885_v15, %v5117_v60  ;;  %v4100_v53 = vpop.f32.mrb[14].mxu0  ;;  %v3120_v60 = vsel %vm248_vm1, %v3078_v46, 0.0 }
 0x1e4   : > { %v2888_v29 = vpop.f32.mrb[15].mxu0  ;;  %v3640_v30 = vpack.c.bf16 %v4131_v48, %v4131_v48  ;;  %v3119_v3 = vadd.f32 %v3118_v1, %v3117_v9  ;;  %v3018_v32 = vadd.f32 %v3017_v56, %v3016_v52  ;;  %v4133_v33 = vadd.f32 %v4100_v53, %v5119_v39 }
 0x1e5   : > { %v3019_v12 = vsel %vm248_vm1, %v4132_v47, 0.0  ;;  %v3079_v13 = vmul.f32 %v4132_v47, %v4132_v47  ;;  %v3638_v31 = vpack.c.bf16 %v4132_v47, %v4132_v47  ;;  %v4134_v25 = vadd.f32 %v2888_v29, %v5126_v17 }
 0x1e6   : > { %3312 = vst.msk [vmem:[%s5124_s18 + $0x38] sm:$0xf] %vm3297_vm4, %v3640_v30  ;;  %v3081_v26 = vmul.f32 %v4131_v48, %v4131_v48  ;;  %v3020_v36 = vadd.f32 %v3019_v12, %v3018_v32  ;;  %v3121_v37 = vadd.f32 %v3120_v60, %v3119_v3  ;;  %v3641_v10 = vpack.c.bf16 %v4133_v33, %v4133_v33 }
 0x1e7   : > { %v3122_v35 = vsel %vm248_vm1, %v3079_v13, 0.0  ;;  %3310 = vst.msk [vmem:[%s5124_s18 + $0x30] sm:$0xf] %vm3297_vm4, %v3638_v31  ;;  %v3021_v27 = vsel %vm248_vm1, %v4134_v25, 0.0  ;;  %v3080_v34 = vmul.f32 %v4134_v25, %v4134_v25  ;;  %v3639_v39 = vpack.c.bf16 %v4134_v25, %v4134_v25 }
 0x1e8   : > { %v3123_v57 = vadd.f32 %v3122_v35, %v3121_v37  ;;  %v3022_v58 = vadd.f32 %v3021_v27, %v3020_v36  ;;  %v3023_v19 = vsel %vm248_vm1, %v4131_v48, 0.0  ;;  %v3082_v20 = vmul.f32 %v4133_v33, %v4133_v33  ;;  %3313 = vst.msk [vmem:[%s5124_s18 + $0x3c] sm:$0xf] %vm3297_vm4, %v3641_v10 }
 0x1e9   : > { %v4103_v55 = vpop.f32.mrb[16].mxu0  ;;  %v3124_v17 = vsel %vm248_vm1, %v3080_v34, 0.0  ;;  %3311 = vst.msk [vmem:[%s5124_s18 + $0x34] sm:$0xf] %vm3297_vm4, %v3639_v39  ;;  %v3126_v5 = vsel %vm248_vm1, %v3081_v26, 0.0  ;;  %v3025_v16 = vsel %vm248_vm1, %v4133_v33, 0.0 }
 0x1ea   : > { %v2901_v59 = vpop.f32.mrb[17].mxu0  ;;  %v3024_v23 = vadd.f32 %v3023_v19, %v3022_v58  ;;  %v3125_v11 = vadd.f32 %v3124_v17, %v3123_v57  ;;  %v3128_v49 = vsel %vm248_vm1, %v3082_v20, 0.0 }
 0x1eb   : > { %v4104_v18 = vpop.f32.mrb[18].mxu0 }
 0x1ec   : > { %v2904_v14 = vpop.f32.mrb[19].mxu0  ;;  %v3127_v24 = vadd.f32 %v3126_v5, %v3125_v11  ;;  %v3026_v21 = vadd.f32 %v3025_v16, %v3024_v23 }
 0x1ee   : > { %v3129_v38 = vadd.f32 %v3128_v49, %v3127_v24 }
 0x1f1   : > { %v4107_v8 = vpop.f32.mrb[20].mxu0 }
 0x1f2   : > { %v2917_v4 = vpop.f32.mrb[21].mxu0 }
 0x1f3   : > { %v4108_v7 = vpop.f32.mrb[22].mxu0 }
 0x1f4   : > { %v3967_v2 = vpop.f32.mrb[16].mxu1  ;;  %v2920_v40 = vpop.f32.mrb[23].mxu0 }
 0x1f5   : > { %v4135_v41 = vadd.f32 %v4103_v55, %v3967_v2  ;;  %v1651_v45 = vpop.f32.mrb[17].mxu1 }
 0x1f6   : > { %v4136_v28 = vadd.f32 %v2901_v59, %v1651_v45  ;;  %v3968_v22 = vpop.f32.mrb[18].mxu1 }
 0x1f7   : > { %v3644_v42 = vpack.c.bf16 %v4135_v41, %v4135_v41  ;;  %v4137_v43 = vadd.f32 %v4104_v18, %v3968_v22  ;;  %v1654_v44 = vpop.f32.mrb[19].mxu1  ;;  %v3085_v6 = vmul.f32 %v4135_v41, %v4135_v41  ;;  %v3031_v56 = vsel %vm248_vm1, %v4135_v41, 0.0 }
 0x1f8   : > { %v3027_v54 = vsel %vm248_vm1, %v4136_v28, 0.0  ;;  %v3083_v62 = vmul.f32 %v4136_v28, %v4136_v28  ;;  %v3642_v63 = vpack.c.bf16 %v4136_v28, %v4136_v28  ;;  %v4138_v50 = vadd.f32 %v2904_v14, %v1654_v44 }
 0x1f9   : > { %3316 = vst.msk [vmem:[%s5124_s18 + $0x48] sm:$0xf] %vm3297_vm4, %v3644_v42  ;;  %v3028_v61 = vadd.f32 %v3027_v54, %v3026_v21  ;;  %v3645_v15 = vpack.c.bf16 %v4137_v43, %v4137_v43  ;;  %v3086_v47 = vmul.f32 %v4137_v43, %v4137_v43  ;;  %v4111_v31 = vpop.f32.mrb[24].mxu0  ;;  %v3134_v3 = vsel %vm248_vm1, %v3085_v6, 0.0 }
 0x1fa   : > { %v3130_v48 = vsel %vm248_vm1, %v3083_v62, 0.0  ;;  %3314 = vst.msk [vmem:[%s5124_s18 + $0x40] sm:$0xf] %vm3297_vm4, %v3642_v63  ;;  %v3029_v0 = vsel %vm248_vm1, %v4138_v50, 0.0  ;;  %v3084_v46 = vmul.f32 %v4138_v50, %v4138_v50  ;;  %v3643_v1 = vpack.c.bf16 %v4138_v50, %v4138_v50  ;;  %v2933_v60 = vpop.f32.mrb[25].mxu0 }
 0x1fb   : > { %v3131_v51 = vadd.f32 %v3130_v48, %v3129_v38  ;;  %v3030_v53 = vadd.f32 %v3029_v0, %v3028_v61  ;;  %3317 = vst.msk [vmem:[%s5124_s18 + $0x4c] sm:$0xf] %vm3297_vm4, %v3645_v15  ;;  %v3033_v35 = vsel %vm248_vm1, %v4137_v43, 0.0  ;;  %v3136_v25 = vsel %vm248_vm1, %v3086_v47, 0.0  ;;  %v4112_v10 = vpop.f32.mrb[26].mxu0 }
 0x1fc   : > { %v3132_v52 = vsel %vm248_vm1, %v3084_v46, 0.0  ;;  %v3971_v9 = vpop.f32.mrb[20].mxu1  ;;  %3315 = vst.msk [vmem:[%s5124_s18 + $0x44] sm:$0xf] %vm3297_vm4, %v3643_v1  ;;  %v2936_v57 = vpop.f32.mrb[27].mxu0 }
 0x1fd   : > { %v3032_v29 = vadd.f32 %v3031_v56, %v3030_v53  ;;  %v3133_v30 = vadd.f32 %v3132_v52, %v3131_v51  ;;  %v4139_v12 = vadd.f32 %v4107_v8, %v3971_v9  ;;  %v1667_v13 = vpop.f32.mrb[21].mxu1 }
 0x1fe   : > { %v4140_v32 = vadd.f32 %v2917_v4, %v1667_v13  ;;  %v3972_v33 = vpop.f32.mrb[22].mxu1 }
 0x1ff   : > { %v3135_v26 = vadd.f32 %v3134_v3, %v3133_v30  ;;  %v3648_v36 = vpack.c.bf16 %v4139_v12, %v4139_v12  ;;  %v1670_v37 = vpop.f32.mrb[23].mxu1  ;;  %v3034_v27 = vadd.f32 %v3033_v35, %v3032_v29  ;;  %v4141_v59 = vadd.f32 %v4108_v7, %v3972_v33 }
 0x200   : > { %v3035_v34 = vsel %vm248_vm1, %v4140_v32, 0.0  ;;  %v3087_v39 = vmul.f32 %v4140_v32, %v4140_v32  ;;  %v3646_v55 = vpack.c.bf16 %v4140_v32, %v4140_v32  ;;  %v4142_v19 = vadd.f32 %v2920_v40, %v1670_v37 }
 0x201   : > { %3320 = vst.msk [vmem:[%s5124_s18 + $0x58] sm:$0xf] %vm3297_vm4, %v3648_v36  ;;  %v3137_v58 = vadd.f32 %v3136_v25, %v3135_v26  ;;  %v3036_v20 = vadd.f32 %v3035_v34, %v3034_v27  ;;  %v3089_v18 = vmul.f32 %v4139_v12, %v4139_v12  ;;  %v3649_v11 = vpack.c.bf16 %v4141_v59, %v4141_v59  ;;  %v4115_v38 = vpop.f32.mrb[28].mxu0 }
 0x202   : > { %v3138_v17 = vsel %vm248_vm1, %v3087_v39, 0.0  ;;  %3318 = vst.msk [vmem:[%s5124_s18 + $0x50] sm:$0xf] %vm3297_vm4, %v3646_v55  ;;  %v3037_v14 = vsel %vm248_vm1, %v4142_v19, 0.0  ;;  %v3088_v5 = vmul.f32 %v4142_v19, %v4142_v19  ;;  %v3647_v16 = vpack.c.bf16 %v4142_v19, %v4142_v19  ;;  %v2949_v4 = vpop.f32.mrb[29].mxu0 }
 0x203   : > { %v3139_v23 = vadd.f32 %v3138_v17, %v3137_v58  ;;  %3321 = vst.msk [vmem:[%s5124_s18 + $0x5c] sm:$0xf] %vm3297_vm4, %v3649_v11  ;;  %v3038_v21 = vadd.f32 %v3037_v14, %v3036_v20  ;;  %v3039_v41 = vsel %vm248_vm1, %v4139_v12, 0.0  ;;  %v3090_v45 = vmul.f32 %v4141_v59, %v4141_v59  ;;  %v4116_v62 = vpop.f32.mrb[30].mxu0 }
 0x204   : > { %v3975_v24 = vpop.f32.mrb[24].mxu1  ;;  %v3140_v8 = vsel %vm248_vm1, %v3088_v5, 0.0  ;;  %3319 = vst.msk [vmem:[%s5124_s18 + $0x54] sm:$0xf] %vm3297_vm4, %v3647_v16  ;;  %v3142_v42 = vsel %vm248_vm1, %v3089_v18, 0.0  ;;  %v3041_v43 = vsel %vm248_vm1, %v4141_v59, 0.0 }
 0x205   : > { %v4143_v49 = vadd.f32 %v4111_v31, %v3975_v24  ;;  %v1683_v2 = vpop.f32.mrb[25].mxu1  ;;  %v3040_v44 = vadd.f32 %v3039_v41, %v3038_v21  ;;  %v3141_v7 = vadd.f32 %v3140_v8, %v3139_v23  ;;  %v2952_v61 = vpop.f32.mrb[31].mxu0  ;;  %v3144_v46 = vsel %vm248_vm1, %v3090_v45, 0.0 }
 0x206   : > { %v4144_v28 = vadd.f32 %v2933_v60, %v1683_v2  ;;  %v3976_v22 = vpop.f32.mrb[26].mxu1 }
 0x207   : > { %v1686_v54 = vpop.f32.mrb[27].mxu1  ;;  %v3652_v63 = vpack.c.bf16 %v4143_v49, %v4143_v49  ;;  %v3143_v48 = vadd.f32 %v3142_v42, %v3141_v7  ;;  %v3042_v15 = vadd.f32 %v3041_v43, %v3040_v44  ;;  %v4145_v0 = vadd.f32 %v4112_v10, %v3976_v22 }
 0x208   : > { %v3043_v50 = vsel %vm248_vm1, %v4144_v28, 0.0  ;;  %v3091_v40 = vmul.f32 %v4144_v28, %v4144_v28  ;;  %v3650_v6 = vpack.c.bf16 %v4144_v28, %v4144_v28  ;;  %v4146_v47 = vadd.f32 %v2936_v57, %v1686_v54 }
 0x209   : > { %3324 = vst.msk [vmem:[%s5124_s18 + $0x68] sm:$0xf] %vm3297_vm4, %v3652_v63  ;;  %v3093_v53 = vmul.f32 %v4143_v49, %v4143_v49  ;;  %v3044_v1 = vadd.f32 %v3043_v50, %v3042_v15  ;;  %v3145_v56 = vadd.f32 %v3144_v46, %v3143_v48  ;;  %v3653_v52 = vpack.c.bf16 %v4145_v0, %v4145_v0 }
 0x20a   : > { %v3146_v51 = vsel %vm248_vm1, %v3091_v40, 0.0  ;;  %3322 = vst.msk [vmem:[%s5124_s18 + $0x60] sm:$0xf] %vm3297_vm4, %v3650_v6  ;;  %v3045_v9 = vsel %vm248_vm1, %v4146_v47, 0.0  ;;  %v3092_v29 = vmul.f32 %v4146_v47, %v4146_v47  ;;  %v3651_v30 = vpack.c.bf16 %v4146_v47, %v4146_v47 }
 0x20b   : > { %v3147_v13 = vadd.f32 %v3146_v51, %v3145_v56  ;;  %v3046_v31 = vadd.f32 %v3045_v9, %v3044_v1  ;;  %v3047_v33 = vsel %vm248_vm1, %v4143_v49, 0.0  ;;  %v3094_v60 = vmul.f32 %v4145_v0, %v4145_v0  ;;  %3325 = vst.msk [vmem:[%s5124_s18 + $0x6c] sm:$0xf] %vm3297_vm4, %v3653_v52 }
 0x20c   : > { %v3979_v12 = vpop.f32.mrb[28].mxu1  ;;  %v3148_v35 = vsel %vm248_vm1, %v3092_v29, 0.0  ;;  %3323 = vst.msk [vmem:[%s5124_s18 + $0x64] sm:$0xf] %vm3297_vm4, %v3651_v30  ;;  %v3150_v36 = vsel %vm248_vm1, %v3093_v53, 0.0  ;;  %v3049_v37 = vsel %vm248_vm1, %v4145_v0, 0.0 }
 0x20d   : > { %v4147_v3 = vadd.f32 %v4115_v38, %v3979_v12  ;;  %v1699_v32 = vpop.f32.mrb[29].mxu1  ;;  %v3048_v10 = vadd.f32 %v3047_v33, %v3046_v31  ;;  %v3149_v27 = vadd.f32 %v3148_v35, %v3147_v13  ;;  %v3152_v17 = vsel %vm248_vm1, %v3094_v60, 0.0 }
 0x20e   : > { %v4148_v25 = vadd.f32 %v2949_v4, %v1699_v32  ;;  %v3980_v26 = vpop.f32.mrb[30].mxu1 }
 0x20f   : > { %v1702_v34 = vpop.f32.mrb[31].mxu1  ;;  %v3656_v39 = vpack.c.bf16 %v4147_v3, %v4147_v3  ;;  %v3151_v59 = vadd.f32 %v3150_v36, %v3149_v27  ;;  %v3050_v19 = vadd.f32 %v3049_v37, %v3048_v10  ;;  %v4149_v20 = vadd.f32 %v4116_v62, %v3980_v26 }
 0x210   : > { %v3051_v55 = vsel %vm248_vm1, %v4148_v25, 0.0  ;;  %v3095_v57 = vmul.f32 %v4148_v25, %v4148_v25  ;;  %v3654_v58 = vpack.c.bf16 %v4148_v25, %v4148_v25  ;;  %v4150_v23 = vadd.f32 %v2952_v61, %v1702_v34 }
 0x211   : > { %3328 = vst.msk [vmem:[%s5124_s18 + $0x78] sm:$0xf] %vm3297_vm4, %v3656_v39  ;;  %v3097_v11 = vmul.f32 %v4147_v3, %v4147_v3  ;;  %v3052_v14 = vadd.f32 %v3051_v55, %v3050_v19  ;;  %v3153_v5 = vadd.f32 %v3152_v17, %v3151_v59  ;;  %v3657_v16 = vpack.c.bf16 %v4149_v20, %v4149_v20 }
 0x212   : > { %v3154_v18 = vsel %vm248_vm1, %v3095_v57, 0.0  ;;  %3326 = vst.msk [vmem:[%s5124_s18 + $0x70] sm:$0xf] %vm3297_vm4, %v3654_v58  ;;  %v3053_v24 = vsel %vm248_vm1, %v4150_v23, 0.0  ;;  %v3096_v21 = vmul.f32 %v4150_v23, %v4150_v23  ;;  %v3655_v49 = vpack.c.bf16 %v4150_v23, %v4150_v23 }
 0x213   : > { %v3155_v2 = vadd.f32 %v3154_v18, %v3153_v5  ;;  %v3054_v38 = vadd.f32 %v3053_v24, %v3052_v14  ;;  %v3055_v41 = vsel %vm248_vm1, %v4147_v3, 0.0  ;;  %v3098_v45 = vmul.f32 %v4149_v20, %v4149_v20  ;;  %3329 = vst.msk [vmem:[%s5124_s18 + $0x7c] sm:$0xf] %vm3297_vm4, %v3657_v16 }
 0x214   : > { %v3156_v8 = vsel %vm248_vm1, %v3096_v21, 0.0  ;;  %3327 = vst.msk [vmem:[%s5124_s18 + $0x74] sm:$0xf] %vm3297_vm4, %v3655_v49  ;;  %v3158_v4 = vsel %vm248_vm1, %v3097_v11, 0.0  ;;  %v3057_v42 = vsel %vm248_vm1, %v4149_v20, 0.0 }
 0x215   : > { %v3056_v28 = vadd.f32 %v3055_v41, %v3054_v38  ;;  %v3157_v22 = vadd.f32 %v3156_v8, %v3155_v2  ;;  %v3160_v7 = vsel %vm248_vm1, %v3098_v45, 0.0 }
 0x217   : > { %v3058_v43 = vadd.f32 %v3057_v42, %v3056_v28  ;;  %v3159_v44 = vadd.f32 %v3158_v4, %v3157_v22 }
 0x219   : > { %v3059_v54 = vrot.slane %v3058_v43, 4  ;;  %v3161_v62 = vadd.f32 %v3160_v7, %v3159_v44 }
 0x21b   : > { %v3060_v63 = vadd.f32 %v3059_v54, %v3058_v43  ;;  %v3162_v50 = vrot.slane %v3161_v62, 4 }
 0x21d   : > { %v3061_v40 = vrot.slane %v3060_v63, 2  ;;  %v3163_v6 = vadd.f32 %v3162_v50, %v3161_v62 }
 0x21f   : > { %v3062_v61 = vadd.f32 %v3061_v40, %v3060_v63  ;;  %v3164_v48 = vrot.slane %v3163_v6, 2 }
 0x221   : > { %v3063_v15 = vrot.slane %v3062_v61, 1  ;;  %v3165_v0 = vadd.f32 %v3164_v48, %v3163_v6 }
 0x223   : > { %v3064_v46 = vadd.f32 %v3063_v15, %v3062_v61  ;;  %v3166_v51 = vrot.slane %v3165_v0, 1 }
 0x225   : > { %3066 = vst.msk [vmem:[%s211_s21] sm:$0x1] %vm3065_vm5, %v3064_v46  ;;  %v3167_v47 = vadd.f32 %v3166_v51, %v3165_v0 }
 0x227   : > { %3168 = vst.msk [vmem:[%s214_s24] sm:$0x1] %vm3065_vm5, %v3167_v47 }
 0x228 PF: > { %s15_s15 = sadd.s32 1, %s4401_s15  }
 0x229   : > { %p12_p4 = scmp.ge.s32.totalorder %s15_s15, 4  }
 0x22b   :  { %14 = sbr.rel (!%p12_p4) target bundleno = 1 (0x1), region = 90 }

// kernel: residue_block.4
= control target key start
LH: loop header
LB: loop body
LE: loop exit
PB: predicated region body
PF: predicated region fallthrough
CT: control target
= control target key end

     0   :  { %s4717_s21 = smov 0   ;;  %s5663_s0 = inlined_call_operand.vmem [shape: bf16[2,16,16,4], index: 0, kind: input, shape index: {}]   ;;  %s5664_s1 = inlined_call_operand.vmem [shape: f32[1,4], index: 1, kind: input, shape index: {}]   ;;  %s5665_s2 = inlined_call_operand.vmem [shape: f32[1,4], index: 2, kind: input, shape index: {}]   ;;  %s5666_s3 = inlined_call_operand.vmem [shape: bf16[9,4,4], index: 3, kind: input, shape index: {}]   ;;  %s5667_s4 = inlined_call_operand.vmem [shape: bf16[2,16,16,4], index: 4, kind: output, shape index: {0}]   ;;  %s5668_s5 = inlined_call_operand.vmem [shape: f32[2,1,4], index: 5, kind: output, shape index: {1}]   ;;  %s5669_s6 = inlined_call_operand.vmem [shape: f32[2,1,4], index: 6, kind: output, shape index: {2}]  }
   0x1 LB: > { %s3631_s22 = sadd.s32 4294967295, %s4678_s21   ;;  %p3635_p0 = scmp.ge.s32.totalorder %s4678_s21, 1  ;;  %s4678_s21 = sphi %s4717_s21, %s17_s21  }
   0x2   : > { %p217_p1 = scmp.lt.s32.totalorder %s4678_s21, 3 }
   0x4   : > { %p218_p2 = pnand %p3635_p0, %p217_p1 }
   0x6   : > { %221 = sbr.rel (%p218_p2) target bundleno = 556 (0x22c), region = 36 }
   0xd   : > { %vm662_vm0 = vcmask 1041408   ;;  %v4728_v0 = vld [vmem:[%s5666_s3 + $0x8] sm:$0x3]  ;;  %p253_p3 = scmp.lt.s32.totalorder %s3631_s22, 1  ;;  %v483_v1 = vlaneseq  ;;  %v3642_v3 = vld [vmem:[%s5666_s3 + $0x2] sm:$0x3] }
   0xe   : > { %4656 = vmatprep.subr.msk.bf16.mxu0 %vm662_vm0, %v4728_v0  ;;  %v4734_v2 = vsel %vm662_vm0, %v4728_v0, 0  ;;  %4652 = vmatprep.subr.msk.bf16.mxu1 %vm662_vm0, %v3642_v3  ;;  %v664_v4 = vsel %vm662_vm0, %v3642_v3, 0  ;;  %v566_v5 = vld [vmem:[%s5666_s3] sm:$0x3]  ;;  %vm444_vm1 = vcmask 31744   ;;  %v5686_v7 = vmov 0.0|0.0  }
   0xf   : > { %4225 = vmatpush3.bf16.msra.mxu0 %v4734_v2  ;;  %s5736_s22 = smov (!%p253_p3, %s3631_s22), 1  ;;  %v4747_v6 = vshrl.u32 %v483_v1, 7  ;;  %4089 = vmatpush3.bf16.msra.mxu1 %v664_v4  ;;  %v3723_v8 = vld [vmem:[%s5666_s3 + $0xa] sm:$0x3]  ;;  %v4681_v9 = vmov 0.0   ;;  %v4773_v13 = vsel %vm662_vm0, %v566_v5, 0 }
  0x10   : > { %4090 = vmatprep.mubr.bf16.mxu1 %v5686_v7  ;;  %s3822_s7 = sshll.u32 %s5736_s22, 7  ;;  %4653 = vmatprep.subr.msk.bf16.mxu1 %vm662_vm0, %v566_v5  ;;  %447 = vst.msk [vmem:[#allocation2 + $0x10] sm:$0xff] %vm444_vm1, %v4681_v9  ;;  %448 = vst.msk [vmem:[#allocation2 + $0x118] sm:$0xff] %vm444_vm1, %v4681_v9  ;;  %v4768_v10 = vld [vmem:[%s5664_s1] ss:$0 sm:$0xff]  ;;  %v4777_v15 = vsel %vm662_vm0, %v3723_v8, 0  ;;  %s265_s8 = scalar_lea.vmem %s5668_s5, %s5736_s22 }
  0x11   : > { %4658 = vmatprep.subr.msk.bf16.mxu0 %vm662_vm0, %v3723_v8  ;;  %s4763_s10 = scalar_lea.vmem %s5663_s0, %s3822_s7  ;;  %v4780_v16 = vadd.s32 8, %v4747_v6  ;;  %v4786_v22 = vld [vmem:[%s5665_s2] ss:$0 sm:$0xff]  ;;  %v4825_v8 = vld [vmem:[%s5666_s3 + $0xc] sm:$0x3]  ;;  %vm486_vm3 = vcmp.ge.s32.totalorder %v4747_v6, 1  ;;  %s5512_s29 = scalar_lea.vmem %s5667_s4, %s3822_s7 }
  0x12   : > { %v3857_v11 = vld [vmem:[%s4763_s10] sm:$0xff]   ;;  %v3920_v12 = vld [vmem:[%s4763_s10 + $0x8] sm:$0xff]   ;;  %v3921_v14 = vld [vmem:[%s4763_s10 + $0x10] sm:$0xff]   ;;  %vm3493_vm4 = vcmask 27648   ;;  %vm3261_vm5 = vcmask 24576   ;;  %s268_s11 = scalar_lea.vmem %s5669_s6, %s5736_s22 }
  0x13   : > { %v3858_v17 = vunpack.c.l.bf16 %v3857_v11  ;;  %v3859_v18 = vunpack.c.h.bf16 %v3857_v11  ;;  %v3862_v19 = vunpack.c.l.bf16 %v3920_v12  ;;  %v3863_v20 = vunpack.c.h.bf16 %v3920_v12  ;;  %v3922_v21 = vld [vmem:[%s4763_s10 + $0x18] sm:$0xff]   ;;  %v3923_v43 = vld [vmem:[%s4763_s10 + $0x20] sm:$0xff]   ;;  %v3924_v48 = vld [vmem:[%s4763_s10 + $0x28] sm:$0xff]  }
  0x14   : > { %v3866_v23 = vunpack.c.l.bf16 %v3921_v14  ;;  %v3867_v24 = vunpack.c.h.bf16 %v3921_v14  ;;  %v3870_v25 = vunpack.c.l.bf16 %v3922_v21  ;;  %v3871_v26 = vunpack.c.h.bf16 %v3922_v21  ;;  %v3925_v53 = vld [vmem:[%s4763_s10 + $0x30] sm:$0xff]   ;;  %v3926_v58 = vld [vmem:[%s4763_s10 + $0x38] sm:$0xff]   ;;  %v4817_v63 = vld [vmem:[%s4763_s10 + $0x40] sm:$0xff]  }
  0x15   : > { %v342_v27 = vmul.f32 %v3858_v17, %v4768_v10  ;;  %v343_v28 = vmul.f32 %v3859_v18, %v4768_v10  ;;  %v344_v29 = vmul.f32 %v3862_v19, %v4768_v10  ;;  %v345_v30 = vmul.f32 %v3863_v20, %v4768_v10 }
  0x16   : > { %v346_v31 = vmul.f32 %v3866_v23, %v4768_v10  ;;  %v347_v32 = vmul.f32 %v3867_v24, %v4768_v10  ;;  %v348_v33 = vmul.f32 %v3870_v25, %v4768_v10  ;;  %v349_v34 = vmul.f32 %v3871_v26, %v4768_v10 }
  0x17   : > { %v380_v35 = vadd.f32 %v4786_v22, %v342_v27  ;;  %v381_v36 = vadd.f32 %v4786_v22, %v343_v28  ;;  %v382_v37 = vadd.f32 %v4786_v22, %v344_v29  ;;  %v383_v38 = vadd.f32 %v4786_v22, %v345_v30 }
  0x18   : > { %v384_v39 = vadd.f32 %v4786_v22, %v346_v31  ;;  %v385_v40 = vadd.f32 %v4786_v22, %v347_v32  ;;  %v386_v41 = vadd.f32 %v4786_v22, %v348_v33  ;;  %v387_v42 = vadd.f32 %v4786_v22, %v349_v34 }
  0x19   : > { %v412_v44 = vmax.f32 %v380_v35, 0.0  ;;  %v413_v45 = vmax.f32 %v381_v36, 0.0  ;;  %v414_v46 = vmax.f32 %v382_v37, 0.0  ;;  %v415_v47 = vmax.f32 %v383_v38, 0.0 }
  0x1a   : > { %v416_v49 = vmax.f32 %v384_v39, 0.0  ;;  %v417_v50 = vmax.f32 %v385_v40, 0.0  ;;  %v418_v51 = vmax.f32 %v386_v41, 0.0  ;;  %v419_v52 = vmax.f32 %v387_v42, 0.0 }
  0x1b   : > { %451 = vst.msk [vmem:[#allocation2 + $0x18] sm:$0xff] %vm444_vm1, %v412_v44  ;;  %452 = vst.msk [vmem:[#allocation2 + $0x20] sm:$0xff] %vm444_vm1, %v413_v45  ;;  %v1680_v54 = vpack.c.bf16 %v413_v45, %v412_v44  ;;  %v1681_v55 = vpack.c.bf16 %v415_v47, %v414_v46  ;;  %v3874_v56 = vunpack.c.l.bf16 %v3923_v43  ;;  %v3875_v57 = vunpack.c.h.bf16 %v3923_v43  ;;  %v4860_v43 = vld [vmem:[%s5666_s3 + $0x4] sm:$0x3] }
  0x1c   : > { %453 = vst.msk [vmem:[#allocation2 + $0x28] sm:$0xff] %vm444_vm1, %v414_v46  ;;  %454 = vst.msk [vmem:[#allocation2 + $0x30] sm:$0xff] %vm444_vm1, %v415_v47  ;;  %v1682_v59 = vpack.c.bf16 %v417_v50, %v416_v49  ;;  %v1683_v60 = vpack.c.bf16 %v419_v52, %v418_v51  ;;  %v3878_v61 = vunpack.c.l.bf16 %v3924_v48  ;;  %v3879_v62 = vunpack.c.h.bf16 %v3924_v48 }
  0x1d   : > { %455 = vst.msk [vmem:[#allocation2 + $0x38] sm:$0xff] %vm444_vm1, %v416_v49  ;;  %456 = vst.msk [vmem:[#allocation2 + $0x40] sm:$0xff] %vm444_vm1, %v417_v50  ;;  %4226 = vmatprep.mubr.msk.bf16.mxu0 %vm444_vm1, %v1680_v54  ;;  %v350_v1 = vmul.f32 %v3874_v56, %v4768_v10  ;;  %v351_v3 = vmul.f32 %v3875_v57, %v4768_v10  ;;  %v3882_v4 = vunpack.c.l.bf16 %v3925_v53  ;;  %v3883_v5 = vunpack.c.h.bf16 %v3925_v53  ;;  %v3928_v49 = vld [vmem:[%s4763_s10 + $0x48] sm:$0xff]  }
  0x1e   : > { %457 = vst.msk [vmem:[#allocation2 + $0x48] sm:$0xff] %vm444_vm1, %v418_v51  ;;  %458 = vst.msk [vmem:[#allocation2 + $0x50] sm:$0xff] %vm444_vm1, %v419_v52  ;;  %4227 = vmatmul.mubr.msk.bf16.vlgmr.msra.gmra.mrb[0].mxu0 %vm444_vm1, %v1681_v55  ;;  %v352_v9 = vmul.f32 %v3878_v61, %v4768_v10  ;;  %v353_v11 = vmul.f32 %v3879_v62, %v4768_v10  ;;  %v3886_v12 = vunpack.c.l.bf16 %v3926_v58  ;;  %v3887_v14 = vunpack.c.h.bf16 %v3926_v58  ;;  %v3929_v51 = vld [vmem:[%s4763_s10 + $0x50] sm:$0xff]   ;;  %v3930_v61 = vld [vmem:[%s4763_s10 + $0x58] sm:$0xff]  }
  0x1f   : > { %4230 = vmatprep.mubr.msk.bf16.mxu0 %vm444_vm1, %v1682_v59  ;;  %4259 = vmatpush3.bf16.msra.mxu0 %v4777_v15  ;;  %v388_v17 = vadd.f32 %v4786_v22, %v350_v1  ;;  %v389_v18 = vadd.f32 %v4786_v22, %v351_v3  ;;  %v354_v19 = vmul.f32 %v3882_v4, %v4768_v10  ;;  %v3890_v20 = vunpack.c.l.bf16 %v4817_v63 }
  0x20   : > { %v390_v21 = vadd.f32 %v4786_v22, %v352_v9  ;;  %v391_v23 = vadd.f32 %v4786_v22, %v353_v11  ;;  %v355_v24 = vmul.f32 %v3883_v5, %v4768_v10  ;;  %v356_v25 = vmul.f32 %v3886_v12, %v4768_v10  ;;  %4659 = vmatprep.subr.msk.bf16.mxu0 %vm662_vm0, %v4825_v8 }
  0x21   : > { %v420_v15 = vmax.f32 %v388_v17, 0.0  ;;  %v421_v26 = vmax.f32 %v389_v18, 0.0  ;;  %v392_v27 = vadd.f32 %v4786_v22, %v354_v19  ;;  %v357_v28 = vmul.f32 %v3887_v14, %v4768_v10 }
  0x22   : > { %v567_v29 = vld [vmem:[#allocation2 + $0x18] sm:$0xff]  ;;  %v568_v30 = vld [vmem:[#allocation2 + $0x20] sm:$0xff]  ;;  %v422_v32 = vmax.f32 %v390_v21, 0.0  ;;  %v423_v33 = vmax.f32 %v391_v23, 0.0  ;;  %v393_v34 = vadd.f32 %v4786_v22, %v355_v24  ;;  %v4846_v35 = vadd.f32 %v4786_v22, %v356_v25 }
  0x23   : > { %v569_v31 = vld [vmem:[#allocation2 + $0x28] sm:$0xff]  ;;  %v597_v36 = vpack.c.bf16 %v568_v30, %v567_v29  ;;  %v570_v37 = vld [vmem:[#allocation2 + $0x30] sm:$0xff]  ;;  %459 = vst.msk [vmem:[#allocation2 + $0x58] sm:$0xff] %vm444_vm1, %v420_v15  ;;  %460 = vst.msk [vmem:[#allocation2 + $0x60] sm:$0xff] %vm444_vm1, %v421_v26  ;;  %v1684_v38 = vpack.c.bf16 %v421_v26, %v420_v15  ;;  %v424_v39 = vmax.f32 %v392_v27, 0.0  ;;  %v4851_v40 = vadd.f32 %v4786_v22, %v357_v28 }
  0x24   : > { %v4853_v41 = vpack.c.bf16 %v570_v37, %v569_v31  ;;  %461 = vst.msk [vmem:[#allocation2 + $0x68] sm:$0xff] %vm444_vm1, %v422_v32  ;;  %462 = vst.msk [vmem:[#allocation2 + $0x70] sm:$0xff] %vm444_vm1, %v423_v33  ;;  %v425_v42 = vmax.f32 %v393_v34, 0.0  ;;  %v571_v44 = vld [vmem:[#allocation2 + $0x38] sm:$0xff]  ;;  %v572_v45 = vld [vmem:[#allocation2 + $0x40] sm:$0xff]  ;;  %v426_v46 = vmax.f32 %v4846_v35, 0.0  ;;  %v3891_v48 = vunpack.c.h.bf16 %v4817_v63 }
  0x25   : > { %4091 = vmatmul.mubr.msk.bf16.vlgmr.msra.gmra.mrb[0].mxu1 %vm444_vm1, %v597_v36  ;;  %463 = vst.msk [vmem:[#allocation2 + $0x78] sm:$0xff] %vm444_vm1, %v424_v39  ;;  %v427_v47 = vmax.f32 %v4851_v40, 0.0  ;;  %v358_v50 = vmul.f32 %v3890_v20, %v4768_v10  ;;  %v573_v52 = vld [vmem:[#allocation2 + $0x48] sm:$0xff]  ;;  %v574_v53 = vld [vmem:[#allocation2 + $0x50] sm:$0xff]  ;;  %vm489_vm2 = vcmp.le.s32.totalorder %v4780_v16, 14  ;;  %v3894_v56 = vunpack.c.l.bf16 %v3928_v49  ;;  %v1942_v19 = vld [vmem:[#allocation2 + $0x19] sm:$0xff] }
  0x26   : > { %4123 = vmatpush3.bf16.msra.mxu1 %v4773_v13  ;;  %4231 = vmatmul.mubr.msk.bf16.gmra.mrb[4].mxu0 %vm444_vm1, %v1683_v60  ;;  %464 = vst.msk [vmem:[#allocation2 + $0x80] sm:$0xff] %vm444_vm1, %v425_v42  ;;  %465 = vst.msk [vmem:[#allocation2 + $0x88] sm:$0xff] %vm444_vm1, %v426_v46  ;;  %v4879_v13 = vpack.c.bf16 %v572_v45, %v571_v44  ;;  %v359_v54 = vmul.f32 %v3891_v48, %v4768_v10  ;;  %v3895_v58 = vunpack.c.h.bf16 %v3928_v49  ;;  %v1943_v63 = vld [vmem:[#allocation2 + $0x21] sm:$0xff] }
  0x27   : > { %4094 = vmatprep.mubr.msk.bf16.mxu1 %vm444_vm1, %v4853_v41  ;;  %4234 = vmatprep.mubr.msk.bf16.mxu0 %vm444_vm1, %v1684_v38  ;;  %466 = vst.msk [vmem:[#allocation2 + $0x90] sm:$0xff] %vm444_vm1, %v427_v47  ;;  %v4883_v55 = vadd.f32 %v4786_v22, %v358_v50  ;;  %v1685_v57 = vpack.c.bf16 %v423_v33, %v422_v32  ;;  %v3898_v59 = vunpack.c.l.bf16 %v3929_v51  ;;  %v3899_v60 = vunpack.c.h.bf16 %v3929_v51  ;;  %v3931_v25 = vld [vmem:[%s4763_s10 + $0x60] sm:$0xff]   ;;  %v3932_v28 = vld [vmem:[%s4763_s10 + $0x68] sm:$0xff]  }
  0x28   : > { %4654 = vmatprep.subr.msk.bf16.mxu1 %vm662_vm0, %v4860_v43  ;;  %v4888_v62 = vpack.c.bf16 %v574_v53, %v573_v52  ;;  %v4891_v1 = vadd.f32 %v4786_v22, %v359_v54  ;;  %v360_v4 = vmul.f32 %v3894_v56, %v4768_v10  ;;  %v1686_v5 = vpack.c.bf16 %v425_v42, %v424_v39  ;;  %v3933_v39 = vld [vmem:[%s4763_s10 + $0x70] sm:$0xff]  }
  0x29   : > { %v5685_v3 = vmax.f32 %v4883_v55, 0.0  ;;  %v361_v9 = vmul.f32 %v3895_v58, %v4768_v10  ;;  %v362_v11 = vmul.f32 %v3898_v59, %v4768_v10  ;;  %v3902_v17 = vunpack.c.l.bf16 %v3930_v61  ;;  %v1945_v54 = vld [vmem:[#allocation2 + $0x31] sm:$0xff]  ;;  %v1947_v59 = vld [vmem:[#allocation2 + $0x41] sm:$0xff] }
  0x2a   : > { %v5684_v12 = vmax.f32 %v4891_v1, 0.0  ;;  %v4902_v14 = vadd.f32 %v4786_v22, %v360_v4  ;;  %v3903_v18 = vunpack.c.h.bf16 %v3930_v61  ;;  %v1975_v20 = vsel %vm489_vm2, %v1943_v63, 0.0  ;;  %v575_v15 = vld [vmem:[#allocation2 + $0x58] sm:$0xff]  ;;  %v576_v26 = vld [vmem:[#allocation2 + $0x60] sm:$0xff] }
  0x2b   : > { %467 = vst.msk [vmem:[#allocation2 + $0x98] sm:$0xff] %vm444_vm1, %v5685_v3  ;;  %v4909_v21 = vadd.f32 %v4786_v22, %v361_v9  ;;  %v363_v23 = vmul.f32 %v3899_v60, %v4768_v10  ;;  %v4913_v24 = vadd.f32 %v4786_v22, %v362_v11  ;;  %v1687_v29 = vpack.c.bf16 %v427_v47, %v426_v46  ;;  %v577_v30 = vld [vmem:[#allocation2 + $0x68] sm:$0xff]  ;;  %v578_v31 = vld [vmem:[#allocation2 + $0x70] sm:$0xff] }
  0x2c   : > { %468 = vst.msk [vmem:[#allocation2 + $0xa0] sm:$0xff] %vm444_vm1, %v5684_v12  ;;  %v5683_v27 = vmax.f32 %v4902_v14, 0.0  ;;  %v4930_v35 = vpack.c.bf16 %v1975_v20, %v1942_v19  ;;  %v364_v36 = vmul.f32 %v3902_v17, %v4768_v10  ;;  %v365_v37 = vmul.f32 %v3903_v18, %v4768_v10  ;;  %v579_v4 = vld [vmem:[#allocation2 + $0x78] sm:$0xff]  ;;  %v1944_v18 = vld [vmem:[#allocation2 + $0x29] sm:$0xff] }
  0x2d   : > { %4095 = vmatmul.mubr.msk.bf16.gmra.mrb[4].mxu1 %vm444_vm1, %v4879_v13  ;;  %v5682_v32 = vmax.f32 %v4909_v21, 0.0  ;;  %v4927_v33 = vadd.f32 %v4786_v22, %v363_v23  ;;  %v5681_v34 = vmax.f32 %v4913_v24, 0.0  ;;  %v3906_v38 = vunpack.c.l.bf16 %v3931_v25  ;;  %v581_v20 = vld [vmem:[#allocation2 + $0x88] sm:$0xff]  ;;  %v494_v3 = vld [vmem:[#allocation2 + $0x37] sm:$0xff] }
  0x2e   : > { %4235 = vmatmul.mubr.msk.bf16.gmra.mrb[8].mxu0 %vm444_vm1, %v1685_v57  ;;  %4098 = vmatprep.mubr.msk.bf16.mxu1 %vm444_vm1, %v4888_v62  ;;  %469 = vst.msk [vmem:[#allocation2 + $0xa8] sm:$0xff] %vm444_vm1, %v5683_v27  ;;  %v4938_v40 = vpack.c.bf16 %v576_v26, %v575_v15  ;;  %v3907_v44 = vunpack.c.h.bf16 %v3931_v25  ;;  %v3910_v45 = vunpack.c.l.bf16 %v3932_v28  ;;  %v4947_v46 = vpack.c.bf16 %v578_v31, %v577_v30  ;;  %v582_v23 = vld [vmem:[#allocation2 + $0x90] sm:$0xff] }
  0x2f   : > { %4238 = vmatprep.mubr.msk.bf16.mxu0 %vm444_vm1, %v1686_v5  ;;  %470 = vst.msk [vmem:[#allocation2 + $0xb0] sm:$0xff] %vm444_vm1, %v5682_v32  ;;  %v5680_v42 = vmax.f32 %v4927_v33, 0.0  ;;  %471 = vst.msk [vmem:[#allocation2 + $0xb8] sm:$0xff] %vm444_vm1, %v5681_v34  ;;  %v4950_v47 = vadd.f32 %v4786_v22, %v364_v36  ;;  %v4953_v48 = vadd.f32 %v4786_v22, %v365_v37  ;;  %v3911_v51 = vunpack.c.h.bf16 %v3932_v28  ;;  %v580_v5 = vld [vmem:[#allocation2 + $0x80] sm:$0xff] }
  0x30   : > { %v366_v49 = vmul.f32 %v3906_v38, %v4768_v10  ;;  %v367_v50 = vmul.f32 %v3907_v44, %v4768_v10  ;;  %v368_v52 = vmul.f32 %v3910_v45, %v4768_v10  ;;  %v3914_v53 = vunpack.c.l.bf16 %v3933_v39  ;;  %v1946_v28 = vld [vmem:[#allocation2 + $0x39] sm:$0xff] }
  0x31   : > { %5698 = vst [vmem:[#allocation3_spill] sm:$0xff] %v4953_v48  ;;  %472 = vst.msk [vmem:[#allocation2 + $0xc0] sm:$0xff] %vm444_vm1, %v5680_v42  ;;  %v5679_v56 = vmax.f32 %v4950_v47, 0.0  ;;  %v5678_v57 = vmax.f32 %v4953_v48, 0.0  ;;  %v369_v61 = vmul.f32 %v3911_v51, %v4768_v10  ;;  %v3915_v11 = vunpack.c.h.bf16 %v3933_v39  ;;  %v492_v42 = vld [vmem:[#allocation2 + $0x27] sm:$0xff] }
  0x32   : > { %v4964_v58 = vadd.f32 %v4786_v22, %v366_v49  ;;  %v4969_v60 = vadd.f32 %v4786_v22, %v367_v50  ;;  %v4973_v63 = vadd.f32 %v4786_v22, %v368_v52  ;;  %v370_v17 = vmul.f32 %v3914_v53, %v4768_v10  ;;  %v3934_v49 = vld [vmem:[%s4763_s10 + $0x78] sm:$0xff]  }
  0x33   : > { %473 = vst.msk [vmem:[#allocation2 + $0xc8] sm:$0xff] %vm444_vm1, %v5679_v56  ;;  %474 = vst.msk [vmem:[#allocation2 + $0xd0] sm:$0xff] %vm444_vm1, %v5678_v57  ;;  %v1977_v19 = vsel %vm489_vm2, %v1945_v54, 0.0  ;;  %v4992_v15 = vadd.f32 %v4786_v22, %v369_v61  ;;  %v371_v30 = vmul.f32 %v3915_v11, %v4768_v10  ;;  %v5004_v36 = vpack.c.bf16 %v580_v5, %v579_v4  ;;  %v1949_v52 = vld [vmem:[#allocation2 + $0x51] sm:$0xff]  ;;  %v1951_v54 = vld [vmem:[#allocation2 + $0x61] sm:$0xff] }
  0x34   : > { %5699 = vst [vmem:[#allocation4_spill] sm:$0xff] %v4964_v58  ;;  %5700 = vst [vmem:[#allocation5_spill] sm:$0xff] %v4969_v60  ;;  %v5677_v9 = vmax.f32 %v4964_v58, 0.0  ;;  %v5676_v25 = vmax.f32 %v4969_v60, 0.0  ;;  %v5675_v26 = vmax.f32 %v4973_v63, 0.0  ;;  %v5002_v31 = vadd.f32 %v4786_v22, %v370_v17  ;;  %v584_v5 = vld [vmem:[#allocation2 + $0xa0] sm:$0xff] }
  0x35   : > { %4099 = vmatmul.mubr.msk.bf16.gmra.mrb[8].mxu1 %vm444_vm1, %v4938_v40  ;;  %5701 = vst [vmem:[#allocation6_spill] sm:$0xff] %v4973_v63  ;;  %5702 = vst [vmem:[#allocation7_spill] sm:$0xff] %v4992_v15  ;;  %v5674_v37 = vmax.f32 %v4992_v15, 0.0  ;;  %v5013_v38 = vpack.c.bf16 %v1977_v19, %v1944_v18  ;;  %v5015_v39 = vpack.c.bf16 %v582_v23, %v581_v20  ;;  %v2391_v51 = vsel %vm662_vm0, %v4825_v8, 0  ;;  %v5038_v4 = vld [vmem:[%s5666_s3 + $0xe] sm:$0x3] }
  0x36   : > { %4239 = vmatmul.mubr.msk.bf16.gmra.mrb[12].mxu0 %vm444_vm1, %v1687_v29  ;;  %4102 = vmatprep.mubr.msk.bf16.mxu1 %vm444_vm1, %v4947_v46  ;;  %v1979_v29 = vsel %vm489_vm2, %v1947_v59, 0.0  ;;  %475 = vst.msk [vmem:[#allocation2 + $0xd8] sm:$0xff] %vm444_vm1, %v5677_v9  ;;  %5703 = vst [vmem:[#allocation8_spill] sm:$0xff] %v5002_v31  ;;  %v5018_v44 = vadd.f32 %v4786_v22, %v371_v30  ;;  %v5673_v45 = vmax.f32 %v5002_v31, 0.0  ;;  %v3918_v59 = vunpack.c.l.bf16 %v3934_v49  ;;  %v583_v8 = vld [vmem:[#allocation2 + $0x98] sm:$0xff]  ;;  %v1948_v11 = vld [vmem:[#allocation2 + $0x49] sm:$0xff] }
  0x37   : > { %4260 = vmatprep.mubr.msk.bf16.mxu0 %vm444_vm1, %v4930_v35  ;;  %476 = vst.msk [vmem:[#allocation2 + $0xe0] sm:$0xff] %vm444_vm1, %v5676_v25  ;;  %477 = vst.msk [vmem:[#allocation2 + $0xe8] sm:$0xff] %vm444_vm1, %v5675_v26  ;;  %v5022_v50 = vpack.c.bf16 %v1979_v29, %v1946_v28  ;;  %v3919_v61 = vunpack.c.h.bf16 %v3934_v49  ;;  %v1981_v17 = vsel %vm489_vm2, %v1949_v52, 0.0  ;;  %v585_v18 = vld [vmem:[#allocation2 + $0xa8] sm:$0xff]  ;;  %v586_v19 = vld [vmem:[#allocation2 + $0xb0] sm:$0xff]  ;;  %v1983_v29 = vsel %vm489_vm2, %v1951_v54, 0.0 }
  0x38   : > { %5704 = vst [vmem:[#allocation9_spill] sm:$0xff] %v5018_v44  ;;  %478 = vst.msk [vmem:[#allocation2 + $0xf0] sm:$0xff] %vm444_vm1, %v5674_v37  ;;  %v5670_v53 = vmax.f32 %v5018_v44, 0.0  ;;  %v372_v20 = vmul.f32 %v3918_v59, %v4768_v10  ;;  %v1950_v28 = vld [vmem:[#allocation2 + $0x59] sm:$0xff]  ;;  %v5057_v30 = vpack.c.bf16 %v584_v5, %v583_v8  ;;  %v5065_v52 = vpack.c.bf16 %v1981_v17, %v1948_v11  ;;  %v1955_v8 = vld [vmem:[#allocation2 + $0x81] sm:$0xff] }
  0x39   : > { %479 = vst.msk [vmem:[#allocation2 + $0xf8] sm:$0xff] %vm444_vm1, %v5673_v45  ;;  %v373_v23 = vmul.f32 %v3919_v61, %v4768_v10  ;;  %v5067_v59 = vpack.c.bf16 %v586_v19, %v585_v18  ;;  %v5069_v10 = vpack.c.bf16 %v1983_v29, %v1950_v28  ;;  %v588_v5 = vld [vmem:[#allocation2 + $0xc0] sm:$0xff]  ;;  %v1952_v11 = vld [vmem:[#allocation2 + $0x69] sm:$0xff]  ;;  %v1957_v45 = vld [vmem:[#allocation2 + $0x91] sm:$0xff]  ;;  %v5709_v16 = vmax.f32 %v4883_v55, 0.0 }
  0x3a   : > { %480 = vst.msk [vmem:[#allocation2 + $0x100] sm:$0xff] %vm444_vm1, %v5670_v53  ;;  %v5060_v49 = vadd.f32 %v4786_v22, %v372_v20  ;;  %v1953_v53 = vld [vmem:[#allocation2 + $0x71] sm:$0xff]  ;;  %v589_v18 = vld [vmem:[#allocation2 + $0xc8] sm:$0xff]  ;;  %v1954_v20 = vld [vmem:[#allocation2 + $0x79] sm:$0xff]  ;;  %v5713_v55 = vmax.f32 %v4913_v24, 0.0 }
  0x3b   : > { %v1985_v17 = vsel %vm489_vm2, %v1953_v53, 0.0  ;;  %v590_v19 = vld [vmem:[#allocation2 + $0xd0] sm:$0xff]  ;;  %v1959_v37 = vld [vmem:[#allocation2 + $0xa1] sm:$0xff] }
  0x3c   : > { %5705 = vst [vmem:[#allocation10_spill] sm:$0xff] %v5060_v49  ;;  %v5672_v61 = vmax.f32 %v5060_v49, 0.0  ;;  %v5093_v29 = vpack.c.bf16 %v1985_v17, %v1952_v11  ;;  %v1961_v9 = vld [vmem:[#allocation2 + $0xb1] sm:$0xff]  ;;  %v1963_v57 = vld [vmem:[#allocation2 + $0xc1] sm:$0xff] }
  0x3d   : > { %4103 = vmatmul.mubr.msk.bf16.gmra.mrb[12].mxu1 %vm444_vm1, %v5004_v36  ;;  %v591_v53 = vld [vmem:[#allocation2 + $0xd8] sm:$0xff]  ;;  %v500_v31 = vld [vmem:[#allocation2 + $0x67] sm:$0xff] }
  0x3e   : > { %4261 = vmatmul.mubr.msk.bf16.vlgmr.msra.gmra.mrb[0].mxu0 %vm444_vm1, %v5013_v38  ;;  %4106 = vmatprep.mubr.msk.bf16.mxu1 %vm444_vm1, %v5015_v39  ;;  %481 = vst.msk [vmem:[#allocation2 + $0x108] sm:$0xff] %vm444_vm1, %v5672_v61  ;;  %v593_v11 = vld [vmem:[#allocation2 + $0xe8] sm:$0xff]  ;;  %v1965_v56 = vld [vmem:[#allocation2 + $0xd1] sm:$0xff] }
  0x3f   : > { %4264 = vmatprep.mubr.msk.bf16.mxu0 %vm444_vm1, %v5022_v50  ;;  %4293 = vmatpush3.bf16.msra.mxu0 %v2391_v51  ;;  %v5063_v51 = vadd.f32 %v4786_v22, %v373_v23  ;;  %v587_v22 = vld [vmem:[#allocation2 + $0xb8] sm:$0xff]  ;;  %v1987_v23 = vsel %vm489_vm2, %v1955_v8, 0.0  ;;  %v592_v8 = vld [vmem:[#allocation2 + $0xe0] sm:$0xff]  ;;  %v594_v17 = vld [vmem:[#allocation2 + $0xf0] sm:$0xff] }
  0x40   : > { %4660 = vmatprep.subr.msk.bf16.mxu0 %vm662_vm0, %v5038_v4  ;;  %v5091_v28 = vpack.c.bf16 %v588_v5, %v587_v22  ;;  %v5097_v61 = vpack.c.bf16 %v1987_v23, %v1954_v20  ;;  %v1956_v22 = vld [vmem:[#allocation2 + $0x89] sm:$0xff]  ;;  %v1989_v5 = vsel %vm489_vm2, %v1957_v45, 0.0  ;;  %v5111_v20 = vpack.c.bf16 %v592_v8, %v591_v53  ;;  %v1967_v34 = vld [vmem:[#allocation2 + $0xe1] sm:$0xff]  ;;  %v498_v49 = vld [vmem:[#allocation2 + $0x57] sm:$0xff] }
  0x41   : > { %5706 = vst [vmem:[#allocation11_spill] sm:$0xff] %v5063_v51  ;;  %v5671_v54 = vmax.f32 %v5063_v51, 0.0  ;;  %v5113_v23 = vpack.c.bf16 %v1989_v5, %v1956_v22  ;;  %v5115_v26 = vpack.c.bf16 %v594_v17, %v593_v11  ;;  %v596_v45 = vld [vmem:[#allocation2 + $0x100] sm:$0xff]  ;;  %v1960_v53 = vld [vmem:[#allocation2 + $0xa9] sm:$0xff]  ;;  %v1993_v8 = vsel %vm489_vm2, %v1961_v9, 0.0  ;;  %v510_v63 = vld [vmem:[#allocation2 + $0xb7] sm:$0xff] }
  0x42   : > { %v1962_v22 = vld [vmem:[#allocation2 + $0xb9] sm:$0xff]  ;;  %v1995_v5 = vsel %vm489_vm2, %v1963_v57, 0.0  ;;  %v5133_v17 = vpack.c.bf16 %v1993_v8, %v1960_v53  ;;  %v493_v53 = vld [vmem:[#allocation2 + $0x2f] sm:$0xff]  ;;  %v522_v8 = vsel %vm486_vm3, %v492_v42, 0.0  ;;  %v496_v51 = vld [vmem:[#allocation2 + $0x47] sm:$0xff] }
  0x43   : > { %482 = vst.msk [vmem:[#allocation2 + $0x110] sm:$0xff] %vm444_vm1, %v5671_v54  ;;  %v5095_v54 = vpack.c.bf16 %v590_v19, %v589_v18  ;;  %v1958_v18 = vld [vmem:[#allocation2 + $0x99] sm:$0xff]  ;;  %v1991_v19 = vsel %vm489_vm2, %v1959_v37, 0.0  ;;  %v5159_v12 = vpack.c.bf16 %v493_v53, %v522_v8  ;;  %v526_v53 = vsel %vm486_vm3, %v496_v51, 0.0  ;;  %v504_v15 = vld [vmem:[#allocation2 + $0x87] sm:$0xff] }
  0x44   : > { %v5117_v25 = vpack.c.bf16 %v1991_v19, %v1958_v18  ;;  %v595_v37 = vld [vmem:[#allocation2 + $0xf8] sm:$0xff]  ;;  %v5136_v19 = vpack.c.bf16 %v1995_v5, %v1962_v22  ;;  %v1999_v5 = vsel %vm489_vm2, %v1967_v34, 0.0  ;;  %v5168_v34 = vld [vmem:[%s5666_s3 + $0x6] sm:$0x3] }
  0x45   : > { %4107 = vmatmul.mubr.msk.bf16.gmra.mrb[16].mxu1 %vm444_vm1, %v5057_v30  ;;  %v5131_v11 = vpack.c.bf16 %v596_v45, %v595_v37  ;;  %v490_v18 = vld [vmem:[#allocation2 + $0x17] sm:$0xff]  ;;  %v491_v57 = vld [vmem:[#allocation2 + $0x1f] sm:$0xff]  ;;  %v1964_v37 = vld [vmem:[#allocation2 + $0xc9] sm:$0xff]  ;;  %v1997_v45 = vsel %vm489_vm2, %v1965_v56, 0.0 }
  0x46   : > { %4265 = vmatmul.mubr.msk.bf16.gmra.mrb[4].mxu0 %vm444_vm1, %v5065_v52  ;;  %4110 = vmatprep.mubr.msk.bf16.mxu1 %vm444_vm1, %v5067_v59  ;;  %v520_v9 = vsel %vm486_vm3, %v490_v18, 0.0  ;;  %v1966_v22 = vld [vmem:[#allocation2 + $0xd9] sm:$0xff]  ;;  %v5155_v27 = vpack.c.bf16 %v1997_v45, %v1964_v37  ;;  %v1159_v18 = vsel %vm662_vm0, %v4860_v43, 0  ;;  %v1969_v56 = vld [vmem:[#allocation2 + $0xf1] sm:$0xff]  ;;  %v1971_v42 = vld [vmem:[#allocation2 + $0x101] sm:$0xff] }
  0x47   : > { %4268 = vmatprep.mubr.msk.bf16.mxu0 %vm444_vm1, %v5069_v10  ;;  %v5153_v32 = vpack.c.bf16 %v491_v57, %v520_v9  ;;  %v495_v43 = vld [vmem:[#allocation2 + $0x3f] sm:$0xff]  ;;  %v524_v57 = vsel %vm486_vm3, %v494_v3, 0.0  ;;  %v1968_v9 = vld [vmem:[#allocation2 + $0xe9] sm:$0xff]  ;;  %v2001_v37 = vsel %vm489_vm2, %v1969_v56, 0.0 }
  0x48   : > { %v497_v45 = vld [vmem:[#allocation2 + $0x4f] sm:$0xff]  ;;  %v1970_v8 = vld [vmem:[#allocation2 + $0xf9] sm:$0xff]  ;;  %v5186_v3 = vpack.c.bf16 %v495_v43, %v524_v57  ;;  %v516_v60 = vld [vmem:[#allocation2 + $0xe7] sm:$0xff] }
  0x49   : > { %v499_v51 = vld [vmem:[#allocation2 + $0x5f] sm:$0xff]  ;;  %v2614_v6 = vld [vmem:[#allocation2 + $0x108] sm:$0xff] }
  0x4a   : > { %v1973_v56 = vld [vmem:[#allocation2 + $0x111] sm:$0xff]  ;;  %v1972_v43 = vld [vmem:[#allocation2 + $0x109] sm:$0xff] }
  0x4b   : > { %v2005_v57 = vsel %vm489_vm2, %v1973_v56, 0.0  ;;  %v505_v56 = vld [vmem:[#allocation2 + $0x8f] sm:$0xff] }
  0x4d   : > { %4111 = vmatmul.mubr.msk.bf16.gmra.mrb[20].mxu1 %vm444_vm1, %v5091_v28 }
  0x4e   : > { %4269 = vmatmul.mubr.msk.bf16.gmra.mrb[8].mxu0 %vm444_vm1, %v5093_v29  ;;  %4114 = vmatprep.mubr.msk.bf16.mxu1 %vm444_vm1, %v5095_v54 }
  0x4f   : > { %4272 = vmatprep.mubr.msk.bf16.mxu0 %vm444_vm1, %v5097_v61 }
  0x55   : > { %4115 = vmatmul.mubr.msk.bf16.gmra.mrb[24].mxu1 %vm444_vm1, %v5111_v20 }
  0x56   : > { %4273 = vmatmul.mubr.msk.bf16.gmra.mrb[12].mxu0 %vm444_vm1, %v5113_v23  ;;  %4118 = vmatprep.mubr.msk.bf16.mxu1 %vm444_vm1, %v5115_v26 }
  0x57   : > { %4276 = vmatprep.mubr.msk.bf16.mxu0 %vm444_vm1, %v5117_v25 }
  0x5d   : > { %4119 = vmatmul.mubr.msk.bf16.gmra.mrb[28].mxu1 %vm444_vm1, %v5131_v11 }
  0x5e   : > { %4277 = vmatmul.mubr.msk.bf16.gmra.mrb[16].mxu0 %vm444_vm1, %v5133_v17  ;;  %4124 = vmatprep.mubr.bf16.mxu1 %v5686_v7  ;;  %v5161_v7 = vpack.c.bf16 %v1999_v5, %v1966_v22  ;;  %v2003_v22 = vsel %vm489_vm2, %v1971_v42, 0.0  ;;  %v5188_v5 = vpack.c.bf16 %v2001_v37, %v1968_v9  ;;  %v528_v42 = vsel %vm486_vm3, %v498_v49, 0.0  ;;  %v501_v9 = vld [vmem:[#allocation2 + $0x6f] sm:$0xff]  ;;  %v503_v49 = vld [vmem:[#allocation2 + $0x7f] sm:$0xff] }
  0x5f   : > { %4280 = vmatprep.mubr.msk.bf16.mxu0 %vm444_vm1, %v5136_v19  ;;  %v5192_v44 = vpack.c.bf16 %v2003_v22, %v1970_v8  ;;  %v530_v37 = vsel %vm486_vm3, %v500_v31, 0.0  ;;  %v502_v22 = vld [vmem:[#allocation2 + $0x77] sm:$0xff] }
  0x60   : > { %v5212_v8 = vpack.c.bf16 %v501_v9, %v530_v37  ;;  %v532_v31 = vsel %vm486_vm3, %v502_v22, 0.0  ;;  %v2679_v9 = vsel %vm662_vm0, %v5038_v4, 0  ;;  %v508_v37 = vld [vmem:[#allocation2 + $0xa7] sm:$0xff]  ;;  %v5237_v22 = vld [vmem:[%s5666_s3 + $0x10] sm:$0x3] }
  0x61   : > { %v509_v4 = vld [vmem:[#allocation2 + $0xaf] sm:$0xff] }
  0x65   : > { %4125 = vmatmul.mubr.msk.bf16.vlgmr.msra.gmra.mrb[0].mxu1 %vm444_vm1, %v5153_v32 }
  0x66   : > { %4157 = vmatpush3.bf16.msra.mxu1 %v1159_v18  ;;  %4281 = vmatmul.mubr.msk.bf16.gmra.mrb[20].mxu0 %vm444_vm1, %v5155_v27  ;;  %v5190_v18 = vpack.c.bf16 %v497_v45, %v526_v53  ;;  %v5208_v45 = vpack.c.bf16 %v499_v51, %v528_v42  ;;  %v5210_v53 = vpack.c.bf16 %v2005_v57, %v1972_v43  ;;  %v534_v51 = vsel %vm486_vm3, %v504_v15, 0.0  ;;  %v506_v57 = vld [vmem:[#allocation2 + $0x97] sm:$0xff]  ;;  %v507_v15 = vld [vmem:[#allocation2 + $0x9f] sm:$0xff] }
  0x67   : > { %4128 = vmatprep.mubr.msk.bf16.mxu1 %vm444_vm1, %v5159_v12  ;;  %4284 = vmatprep.mubr.msk.bf16.mxu0 %vm444_vm1, %v5161_v7  ;;  %v5226_v42 = vpack.c.bf16 %v503_v49, %v532_v31  ;;  %v5228_v43 = vpack.c.bf16 %v505_v56, %v534_v51  ;;  %v536_v49 = vsel %vm486_vm3, %v506_v57, 0.0  ;;  %v538_v31 = vsel %vm486_vm3, %v508_v37, 0.0  ;;  %v511_v57 = vld [vmem:[#allocation2 + $0xbf] sm:$0xff]  ;;  %v513_v37 = vld [vmem:[#allocation2 + $0xcf] sm:$0xff] }
  0x68   : > { %4655 = vmatprep.subr.msk.bf16.mxu1 %vm662_vm0, %v5168_v34  ;;  %5707 = vst [vmem:[#allocation12_spill] sm:$0xff] %v5210_v53  ;;  %v5251_v56 = vpack.c.bf16 %v507_v15, %v536_v49  ;;  %v5253_v51 = vpack.c.bf16 %v509_v4, %v538_v31  ;;  %v514_v31 = vld [vmem:[#allocation2 + $0xd7] sm:$0xff] }
  0x69   : > { %v544_v58 = vsel %vm486_vm3, %v514_v31, 0.0  ;;  %v519_v31 = vld [vmem:[#allocation2 + $0xff] sm:$0xff] }
  0x6d   : > { %4129 = vmatmul.mubr.msk.bf16.gmra.mrb[4].mxu1 %vm444_vm1, %v5186_v3 }
  0x6e   : > { %4285 = vmatmul.mubr.msk.bf16.gmra.mrb[24].mxu0 %vm444_vm1, %v5188_v5  ;;  %4132 = vmatprep.mubr.msk.bf16.mxu1 %vm444_vm1, %v5190_v18 }
  0x6f   : > { %4288 = vmatprep.mubr.msk.bf16.mxu0 %vm444_vm1, %v5192_v44 }
  0x75   : > { %4133 = vmatmul.mubr.msk.bf16.gmra.mrb[8].mxu1 %vm444_vm1, %v5208_v45 }
  0x76   : > { %4289 = vmatmul.mubr.msk.bf16.gmra.mrb[28].mxu0 %vm444_vm1, %v5210_v53  ;;  %4136 = vmatprep.mubr.msk.bf16.mxu1 %vm444_vm1, %v5212_v8  ;;  %v512_v53 = vld [vmem:[#allocation2 + $0xc7] sm:$0xff] }
  0x77   : > { %4294 = vmatprep.mubr.msk.bf16.mxu0 %vm444_vm1, %v5159_v12  ;;  %v542_v15 = vsel %vm486_vm3, %v512_v53, 0.0  ;;  %v517_v53 = vld [vmem:[#allocation2 + $0xef] sm:$0xff] }
  0x78   : > { %v5269_v4 = vpack.c.bf16 %v513_v37, %v542_v15  ;;  %v518_v15 = vld [vmem:[#allocation2 + $0xf7] sm:$0xff] }
  0x79   : > { %v548_v48 = vsel %vm486_vm3, %v518_v15, 0.0 }
  0x7d   : > { %4137 = vmatmul.mubr.msk.bf16.gmra.mrb[12].mxu1 %vm444_vm1, %v5226_v42 }
  0x7e   : > { %4295 = vmatmul.mubr.msk.bf16.vlgmr.msra.gmra.mrb[0].mxu0 %vm444_vm1, %v5186_v3  ;;  %4140 = vmatprep.mubr.msk.bf16.mxu1 %vm444_vm1, %v5228_v43 }
  0x7f   : > { %4298 = vmatprep.mubr.msk.bf16.mxu0 %vm444_vm1, %v5190_v18  ;;  %4327 = vmatpush3.bf16.msra.mxu0 %v2679_v9  ;;  %v540_v9 = vsel %vm486_vm3, %v510_v63, 0.0  ;;  %v515_v63 = vld [vmem:[#allocation2 + $0xdf] sm:$0xff] }
  0x80   : > { %4661 = vmatprep.subr.msk.bf16.mxu0 %vm662_vm0, %v5237_v22  ;;  %v5267_v49 = vpack.c.bf16 %v511_v57, %v540_v9  ;;  %v546_v57 = vsel %vm486_vm3, %v516_v60, 0.0  ;;  %v5283_v9 = vpack.c.bf16 %v515_v63, %v544_v58  ;;  %v5297_v58 = vpack.c.bf16 %v519_v31, %v548_v48  ;;  %v2297_v48 = vld [vmem:[#allocation2 + $0x10f] sm:$0xff] }
  0x81   : > { %v5285_v37 = vpack.c.bf16 %v517_v53, %v546_v57  ;;  %v5708_v60 = vmov 0.0|0.0   ;;  %v1485_v63 = vsel %vm662_vm0, %v5168_v34, 0  ;;  %v2296_v53 = vld [vmem:[#allocation2 + $0x107] sm:$0xff] }
  0x82   : > { %v2326_v57 = vsel %vm486_vm3, %v2296_v53, 0.0 }
  0x83   : > { %v5320_v34 = vpack.c.bf16 %v2297_v48, %v2326_v57 }
  0x85   : > { %4141 = vmatmul.mubr.msk.bf16.gmra.mrb[16].mxu1 %vm444_vm1, %v5251_v56 }
  0x86   : > { %4299 = vmatmul.mubr.msk.bf16.gmra.mrb[4].mxu0 %vm444_vm1, %v5208_v45  ;;  %4144 = vmatprep.mubr.msk.bf16.mxu1 %vm444_vm1, %v5253_v51 }
  0x87   : > { %4302 = vmatprep.mubr.msk.bf16.mxu0 %vm444_vm1, %v5212_v8 }
  0x8d   : > { %4145 = vmatmul.mubr.msk.bf16.gmra.mrb[20].mxu1 %vm444_vm1, %v5267_v49 }
  0x8e   : > { %4303 = vmatmul.mubr.msk.bf16.gmra.mrb[8].mxu0 %vm444_vm1, %v5226_v42  ;;  %4148 = vmatprep.mubr.msk.bf16.mxu1 %vm444_vm1, %v5269_v4 }
  0x8f   : > { %4306 = vmatprep.mubr.msk.bf16.mxu0 %vm444_vm1, %v5228_v43 }
  0x95   : > { %4149 = vmatmul.mubr.msk.bf16.gmra.mrb[24].mxu1 %vm444_vm1, %v5283_v9 }
  0x96   : > { %4307 = vmatmul.mubr.msk.bf16.gmra.mrb[12].mxu0 %vm444_vm1, %v5251_v56  ;;  %4152 = vmatprep.mubr.msk.bf16.mxu1 %vm444_vm1, %v5285_v37 }
  0x97   : > { %4310 = vmatprep.mubr.msk.bf16.mxu0 %vm444_vm1, %v5253_v51 }
  0x9d   : > { %4153 = vmatmul.mubr.msk.bf16.gmra.mrb[28].mxu1 %vm444_vm1, %v5297_v58 }
  0x9e   : > { %4311 = vmatmul.mubr.msk.bf16.gmra.mrb[16].mxu0 %vm444_vm1, %v5267_v49  ;;  %4158 = vmatprep.mubr.bf16.mxu1 %v5708_v60 }
  0x9f   : > { %4314 = vmatprep.mubr.msk.bf16.mxu0 %vm444_vm1, %v5269_v4 }
  0xa5   : > { %4159 = vmatmul.mubr.msk.bf16.vlgmr.msra.gmra.mrb[0].mxu1 %vm444_vm1, %v4930_v35  ;;  %v2877_v35 = vld [vmem:[#allocation2 + $0x41] sm:$0xff] }
  0xa6   : > { %4191 = vmatpush3.bf16.msra.mxu1 %v1485_v63  ;;  %4315 = vmatmul.mubr.msk.bf16.gmra.mrb[20].mxu0 %vm444_vm1, %v5283_v9 }
  0xa7   : > { %4162 = vmatprep.mubr.msk.bf16.mxu1 %vm444_vm1, %v5013_v38  ;;  %4318 = vmatprep.mubr.msk.bf16.mxu0 %vm444_vm1, %v5285_v37 }
  0xa8   : > { %4657 = vmatprep.subr.msk.bf16.mxu1 %vm662_vm0, %v4728_v0  ;;  %v2997_v0 = vsel %vm662_vm0, %v5237_v22, 0 }
  0xad   : > { %4163 = vmatmul.mubr.msk.bf16.gmra.mrb[4].mxu1 %vm444_vm1, %v5022_v50 }
  0xae   : > { %4319 = vmatmul.mubr.msk.bf16.gmra.mrb[24].mxu0 %vm444_vm1, %v5297_v58  ;;  %4166 = vmatprep.mubr.msk.bf16.mxu1 %vm444_vm1, %v5065_v52  ;;  %v2882_v52 = vld [vmem:[#allocation2 + $0x69] sm:$0xff] }
  0xaf   : > { %4322 = vmatprep.mubr.msk.bf16.mxu0 %vm444_vm1, %v5320_v34 }
  0xb5   : > { %4167 = vmatmul.mubr.msk.bf16.gmra.mrb[8].mxu1 %vm444_vm1, %v5069_v10 }
  0xb6   : > { %4323 = vmatmul.mubr.bf16.gmra.mrb[28].mxu0 %v5708_v60  ;;  %4170 = vmatprep.mubr.msk.bf16.mxu1 %vm444_vm1, %v5093_v29 }
  0xb7   : > { %4328 = vmatprep.mubr.msk.bf16.mxu0 %vm444_vm1, %v4853_v41  ;;  %v2615_v41 = vld [vmem:[#allocation2 + $0x110] sm:$0xff] }
  0xbd   : > { %4171 = vmatmul.mubr.msk.bf16.gmra.mrb[12].mxu1 %vm444_vm1, %v5097_v61 }
  0xbe   : > { %4329 = vmatmul.mubr.msk.bf16.vlgmr.msra.gmra.mrb[0].mxu0 %vm444_vm1, %v4879_v13  ;;  %4174 = vmatprep.mubr.msk.bf16.mxu1 %vm444_vm1, %v5113_v23  ;;  %v2630_v13 = vpack.c.bf16 %v2615_v41, %v2614_v6 }
  0xbf   : > { %4332 = vmatprep.mubr.msk.bf16.mxu0 %vm444_vm1, %v4888_v62  ;;  %4361 = vmatpush3.bf16.msra.mxu0 %v2997_v0  ;;  %v2875_v62 = vld [vmem:[#allocation2 + $0x31] sm:$0xff] }
  0xc5   : > { %4175 = vmatmul.mubr.msk.bf16.gmra.mrb[16].mxu1 %vm444_vm1, %v5117_v25 }
  0xc6   : > { %4333 = vmatmul.mubr.msk.bf16.gmra.mrb[4].mxu0 %vm444_vm1, %v4938_v40  ;;  %4178 = vmatprep.mubr.msk.bf16.mxu1 %vm444_vm1, %v5133_v17  ;;  %v2879_v40 = vld [vmem:[#allocation2 + $0x51] sm:$0xff] }
  0xc7   : > { %4336 = vmatprep.mubr.msk.bf16.mxu0 %vm444_vm1, %v4947_v46  ;;  %v2876_v46 = vld [vmem:[#allocation2 + $0x39] sm:$0xff]  ;;  %v2909_v38 = vsel %vm489_vm2, %v2879_v40, 0.0 }
  0xcd   : > { %4179 = vmatmul.mubr.msk.bf16.gmra.mrb[20].mxu1 %vm444_vm1, %v5136_v19 }
  0xce   : > { %4337 = vmatmul.mubr.msk.bf16.gmra.mrb[8].mxu0 %vm444_vm1, %v5004_v36  ;;  %4182 = vmatprep.mubr.msk.bf16.mxu1 %vm444_vm1, %v5155_v27  ;;  %v2878_v36 = vld [vmem:[#allocation2 + $0x49] sm:$0xff] }
  0xcf   : > { %4340 = vmatprep.mubr.msk.bf16.mxu0 %vm444_vm1, %v5015_v39  ;;  %v2936_v50 = vpack.c.bf16 %v2909_v38, %v2878_v36 }
  0xd5   : > { %4183 = vmatmul.mubr.msk.bf16.gmra.mrb[24].mxu1 %vm444_vm1, %v5161_v7 }
  0xd6   : > { %4341 = vmatmul.mubr.msk.bf16.gmra.mrb[12].mxu0 %vm444_vm1, %v5057_v30  ;;  %4186 = vmatprep.mubr.msk.bf16.mxu1 %vm444_vm1, %v5188_v5  ;;  %v2883_v30 = vld [vmem:[#allocation2 + $0x71] sm:$0xff] }
  0xd7   : > { %4344 = vmatprep.mubr.msk.bf16.mxu0 %vm444_vm1, %v5067_v59  ;;  %v2913_v59 = vsel %vm489_vm2, %v2883_v30, 0.0 }
  0xdd   : > { %4187 = vmatmul.mubr.msk.bf16.gmra.mrb[28].mxu1 %vm444_vm1, %v5192_v44 }
  0xde   : > { %4345 = vmatmul.mubr.msk.bf16.gmra.mrb[16].mxu0 %vm444_vm1, %v5091_v28  ;;  %4192 = vmatprep.mubr.msk.bf16.mxu1 %vm444_vm1, %v5153_v32  ;;  %v5712_v28 = vmax.f32 %v4909_v21, 0.0 }
  0xdf   : > { %4348 = vmatprep.mubr.msk.bf16.mxu0 %vm444_vm1, %v5095_v54  ;;  %v2938_v54 = vpack.c.bf16 %v2913_v59, %v2882_v52 }
  0xe5   : > { %4193 = vmatmul.mubr.msk.bf16.vlgmr.msra.gmra.mrb[0].mxu1 %vm444_vm1, %v5159_v12  ;;  %v2905_v12 = vsel %vm489_vm2, %v2875_v62, 0.0 }
  0xe6   : > { %4395 = vmatpush3.bf16.msra.mxu1 %v4734_v2  ;;  %4349 = vmatmul.mubr.msk.bf16.gmra.mrb[20].mxu0 %vm444_vm1, %v5111_v20  ;;  %v2874_v2 = vld [vmem:[#allocation2 + $0x29] sm:$0xff] }
  0xe7   : > { %4196 = vmatprep.mubr.msk.bf16.mxu1 %vm444_vm1, %v5186_v3  ;;  %4352 = vmatprep.mubr.msk.bf16.mxu0 %vm444_vm1, %v5115_v26  ;;  %v2934_v32 = vpack.c.bf16 %v2905_v12, %v2874_v2  ;;  %v2907_v26 = vsel %vm489_vm2, %v2877_v35, 0.0  ;;  %v5723_v3 = vld [vmem:[#allocation6_spill] sm:$0xff] }
  0xe8   : > { %v2935_v39 = vpack.c.bf16 %v2907_v26, %v2876_v46 }
  0xed   : > { %4197 = vmatmul.mubr.msk.bf16.gmra.mrb[4].mxu1 %vm444_vm1, %v5190_v18 }
  0xee   : > { %4353 = vmatmul.mubr.msk.bf16.gmra.mrb[24].mxu0 %vm444_vm1, %v5131_v11  ;;  %4200 = vmatprep.mubr.msk.bf16.mxu1 %vm444_vm1, %v5208_v45  ;;  %v5718_v11 = vld [vmem:[#allocation4_spill] sm:$0xff] }
  0xef   : > { %4356 = vmatprep.mubr.msk.bf16.mxu0 %vm444_vm1, %v2630_v13  ;;  %v5719_v24 = vmax.f32 %v5718_v11, 0.0 }
  0xf5   : > { %4201 = vmatmul.mubr.msk.bf16.gmra.mrb[8].mxu1 %vm444_vm1, %v5212_v8  ;;  %v5727_v8 = vld [vmem:[#allocation8_spill] sm:$0xff] }
  0xf6   : > { %4357 = vmatmul.mubr.bf16.gmra.mrb[28].mxu0 %v5708_v60  ;;  %4204 = vmatprep.mubr.msk.bf16.mxu1 %vm444_vm1, %v5226_v42  ;;  %v5728_v42 = vmax.f32 %v5727_v8, 0.0 }
  0xf7   : > { %4362 = vmatprep.mubr.msk.bf16.mxu0 %vm444_vm1, %v2934_v32 }
  0xfd   : > { %4205 = vmatmul.mubr.msk.bf16.gmra.mrb[12].mxu1 %vm444_vm1, %v5228_v43  ;;  %v5729_v43 = vld [vmem:[#allocation9_spill] sm:$0xff] }
  0xfe   : > { %4363 = vmatmul.mubr.msk.bf16.vlgmr.msra.gmra.mrb[0].mxu0 %vm444_vm1, %v2935_v39  ;;  %4208 = vmatprep.mubr.msk.bf16.mxu1 %vm444_vm1, %v5251_v56  ;;  %v5730_v22 = vmax.f32 %v5729_v43, 0.0 }
  0xff   : > { %4366 = vmatprep.mubr.msk.bf16.mxu0 %vm444_vm1, %v2936_v50 }
 0x100   : > { %v1694_v56 = vpack.c.bf16 %v5730_v22, %v5728_v42 }
 0x105   : > { %4209 = vmatmul.mubr.msk.bf16.gmra.mrb[16].mxu1 %vm444_vm1, %v5253_v51 }
 0x106   : > { %4367 = vmatmul.mubr.msk.bf16.gmra.mrb[4].mxu0 %vm444_vm1, %v5069_v10  ;;  %4212 = vmatprep.mubr.msk.bf16.mxu1 %vm444_vm1, %v5267_v49  ;;  %v5710_v10 = vmax.f32 %v4891_v1, 0.0  ;;  %v5714_v1 = vmax.f32 %v4927_v33, 0.0  ;;  %v5733_v49 = vld [vmem:[#allocation11_spill] sm:$0xff] }
 0x107   : > { %4370 = vmatprep.mubr.msk.bf16.mxu0 %vm444_vm1, %v2938_v54 }
 0x108   : > { %v1690_v20 = vpack.c.bf16 %v5714_v1, %v5713_v55 }
 0x10d   : > { %4213 = vmatmul.mubr.msk.bf16.gmra.mrb[20].mxu1 %vm444_vm1, %v5269_v4  ;;  %v5734_v4 = vmax.f32 %v5733_v49, 0.0 }
 0x10e   : > { %4371 = vmatmul.mubr.msk.bf16.gmra.mrb[8].mxu0 %vm444_vm1, %v5097_v61  ;;  %4216 = vmatprep.mubr.msk.bf16.mxu1 %vm444_vm1, %v5283_v9  ;;  %v1688_v61 = vpack.c.bf16 %v5710_v10, %v5709_v16 }
 0x10f   : > { %4374 = vmatprep.mubr.msk.bf16.mxu0 %vm444_vm1, %v5113_v23 }
 0x115   : > { %4217 = vmatmul.mubr.msk.bf16.gmra.mrb[24].mxu1 %vm444_vm1, %v5285_v37 }
 0x116   : > { %4375 = vmatmul.mubr.msk.bf16.gmra.mrb[12].mxu0 %vm444_vm1, %v5117_v25  ;;  %4220 = vmatprep.mubr.msk.bf16.mxu1 %vm444_vm1, %v5297_v58  ;;  %v5711_v25 = vmax.f32 %v4902_v14, 0.0  ;;  %v5715_v14 = vmax.f32 %v4950_v47, 0.0  ;;  %v5724_v47 = vmax.f32 %v5723_v3, 0.0 }
 0x117   : > { %4378 = vmatprep.mubr.msk.bf16.mxu0 %vm444_vm1, %v5133_v17  ;;  %v5720_v17 = vld [vmem:[#allocation5_spill] sm:$0xff] }
 0x118   : > { %v1689_v29 = vpack.c.bf16 %v5712_v28, %v5711_v25  ;;  %v5721_v33 = vmax.f32 %v5720_v17, 0.0 }
 0x11d   : > { %4221 = vmatmul.mubr.msk.bf16.gmra.mrb[28].mxu1 %vm444_vm1, %v5320_v34 }
 0x11e   : > { %4379 = vmatmul.mubr.msk.bf16.gmra.mrb[16].mxu0 %vm444_vm1, %v5136_v19  ;;  %4242 = vmatprep.mubr.msk.bf16.mxu1 %vm444_vm1, %v1688_v61  ;;  %v1692_v19 = vpack.c.bf16 %v5721_v33, %v5719_v24 }
 0x11f   : > { %4382 = vmatprep.mubr.msk.bf16.mxu0 %vm444_vm1, %v5155_v27  ;;  %v5716_v27 = vld [vmem:[#allocation3_spill] sm:$0xff] }
 0x120   : > { %v5717_v21 = vmax.f32 %v5716_v27, 0.0 }
 0x122   : > { %v1691_v23 = vpack.c.bf16 %v5717_v21, %v5715_v14 }
 0x125   : > { %4243 = vmatmul.mubr.msk.bf16.vlgmr.msra.gmra.mrb[16].mxu1 %vm444_vm1, %v1689_v29 }
 0x126   : > { %4383 = vmatmul.mubr.msk.bf16.gmra.mrb[20].mxu0 %vm444_vm1, %v5161_v7  ;;  %4246 = vmatprep.mubr.msk.bf16.mxu1 %vm444_vm1, %v1690_v20  ;;  %v5722_v7 = vld [vmem:[#allocation12_spill] sm:$0xff] }
 0x127   : > { %4386 = vmatprep.mubr.msk.bf16.mxu0 %vm444_vm1, %v5188_v5  ;;  %v5725_v5 = vld [vmem:[#allocation7_spill] sm:$0xff] }
 0x128   : > { %v5726_v18 = vmax.f32 %v5725_v5, 0.0 }
 0x12a   : > { %v1693_v45 = vpack.c.bf16 %v5726_v18, %v5724_v47 }
 0x12d   : > { %4247 = vmatmul.mubr.msk.bf16.gmra.mrb[20].mxu1 %vm444_vm1, %v1691_v23 }
 0x12e   : > { %4387 = vmatmul.mubr.msk.bf16.gmra.mrb[24].mxu0 %vm444_vm1, %v5192_v44  ;;  %4250 = vmatprep.mubr.msk.bf16.mxu1 %vm444_vm1, %v1692_v19  ;;  %v5731_v44 = vld [vmem:[#allocation10_spill] sm:$0xff] }
 0x12f   : > { %4390 = vmatprep.mubr.msk.bf16.mxu0 %vm444_vm1, %v5722_v7  ;;  %v5732_v51 = vmax.f32 %v5731_v44, 0.0 }
 0x131   : > { %v1695_v9 = vpack.c.bf16 %v5734_v4, %v5732_v51 }
 0x135   : > { %4251 = vmatmul.mubr.msk.bf16.gmra.mrb[24].mxu1 %vm444_vm1, %v1693_v45 }
 0x136   : > { %4391 = vmatmul.mubr.bf16.gmra.mrb[28].mxu0 %v5708_v60  ;;  %4254 = vmatprep.mubr.msk.bf16.mxu1 %vm444_vm1, %v1694_v56 }
 0x13d   : > { %4255 = vmatmul.mubr.msk.bf16.gmra.mrb[28].mxu1 %vm444_vm1, %v1695_v9 }
 0x1b8   : > { %v4194_v37 = vpop.f32.mrb[0].mxu1 }
 0x1b9   : > { %v1521_v15 = vpop.f32.mrb[1].mxu1 }
 0x1ba   : > { %v4195_v31 = vpop.f32.mrb[2].mxu1 }
 0x1bb   : > { %v1524_v58 = vpop.f32.mrb[3].mxu1 }
 0x1c0   : > { %v4198_v63 = vpop.f32.mrb[4].mxu1 }
 0x1c1   : > { %v1537_v53 = vpop.f32.mrb[5].mxu1 }
 0x1c2   : > { %v4199_v48 = vpop.f32.mrb[6].mxu1 }
 0x1c3   : > { %v1540_v57 = vpop.f32.mrb[7].mxu1 }
 0x1c8   : > { %v5493_v34 = vpop.f32.mrb[8].mxu1 }
 0x1c9   : > { %v5495_v60 = vpop.f32.mrb[9].mxu1 }
 0x1ca   : > { %v5497_v0 = vpop.f32.mrb[10].mxu1 }
 0x1cb   : > { %v5499_v6 = vpop.f32.mrb[11].mxu1 }
 0x1d0   : > { %v5501_v41 = vpop.f32.mrb[12].mxu1 }
 0x1d1   : > { %v5503_v13 = vpop.f32.mrb[13].mxu1  ;;  %v4364_v62 = vpop.f32.mrb[0].mxu0 }
 0x1d2   : > { %v4396_v2 = vadd.f32 %v4364_v62, %v4194_v37  ;;  %v5505_v12 = vpop.f32.mrb[14].mxu1  ;;  %v3033_v32 = vpop.f32.mrb[1].mxu0 }
 0x1d3   : > { %v4397_v35 = vadd.f32 %v3033_v32, %v1521_v15  ;;  %v5514_v40 = vpop.f32.mrb[15].mxu1  ;;  %v4365_v46 = vpop.f32.mrb[2].mxu0 }
 0x1d4   : > { %v3826_v26 = vpack.c.bf16 %v4396_v2, %v4396_v2  ;;  %v4398_v36 = vadd.f32 %v4365_v46, %v4195_v31  ;;  %v3036_v38 = vpop.f32.mrb[3].mxu0  ;;  %v3265_v52 = vmul.f32 %v4396_v2, %v4396_v2  ;;  %v3195_v29 = vsel %vm444_vm1, %v4396_v2, 0.0 }
 0x1d5   : > { %v3263_v39 = vmul.f32 %v4397_v35, %v4397_v35  ;;  %v3824_v50 = vpack.c.bf16 %v4397_v35, %v4397_v35  ;;  %v4399_v30 = vadd.f32 %v3036_v38, %v1524_v58  ;;  %v3192_v54 = vsel %vm444_vm1, %v4397_v35, 0.0 }
 0x1d6   : > { %3496 = vst.msk [vmem:[%s5512_s29 + $0x8] sm:$0xf] %vm3493_vm4, %v3826_v26  ;;  %v3827_v59 = vpack.c.bf16 %v4398_v36, %v4398_v36  ;;  %v3266_v25 = vmul.f32 %v4398_v36, %v4398_v36  ;;  %v3298_v11 = vsel %vm444_vm1, %v3265_v52, 0.0  ;;  %v3197_v33 = vsel %vm444_vm1, %v4398_v36, 0.0 }
 0x1d7   : > { %3494 = vst.msk [vmem:[%s5512_s29] sm:$0xf] %vm3493_vm4, %v3824_v50  ;;  %v3193_v16 = vsel %vm444_vm1, %v4399_v30, 0.0  ;;  %v3264_v10 = vmul.f32 %v4399_v30, %v4399_v30  ;;  %v3825_v61 = vpack.c.bf16 %v4399_v30, %v4399_v30  ;;  %v3295_v55 = vsel %vm444_vm1, %v3263_v39, 0.0 }
 0x1d8   : > { %3497 = vst.msk [vmem:[%s5512_s29 + $0xc] sm:$0xf] %vm3493_vm4, %v3827_v59  ;;  %v3194_v28 = vadd.f32 %v3193_v16, %v3192_v54  ;;  %v3300_v19 = vsel %vm444_vm1, %v3266_v25, 0.0 }
 0x1d9   : > { %v3296_v1 = vsel %vm444_vm1, %v3264_v10, 0.0  ;;  %3495 = vst.msk [vmem:[%s5512_s29 + $0x4] sm:$0xf] %vm3493_vm4, %v3825_v61  ;;  %v4368_v20 = vpop.f32.mrb[4].mxu0 }
 0x1da   : > { %v3196_v14 = vadd.f32 %v3195_v29, %v3194_v28  ;;  %v3297_v27 = vadd.f32 %v3296_v1, %v3295_v55  ;;  %v4400_v21 = vadd.f32 %v4368_v20, %v4198_v63  ;;  %v3049_v23 = vpop.f32.mrb[5].mxu0 }
 0x1db   : > { %v4401_v24 = vadd.f32 %v3049_v23, %v1537_v53  ;;  %v4369_v17 = vpop.f32.mrb[6].mxu0 }
 0x1dc   : > { %v3299_v7 = vadd.f32 %v3298_v11, %v3297_v27  ;;  %v3830_v3 = vpack.c.bf16 %v4400_v21, %v4400_v21  ;;  %v3052_v47 = vpop.f32.mrb[7].mxu0  ;;  %v3198_v5 = vadd.f32 %v3197_v33, %v3196_v14  ;;  %v4402_v43 = vadd.f32 %v4369_v17, %v4199_v48 }
 0x1dd   : > { %v3199_v18 = vsel %vm444_vm1, %v4401_v24, 0.0  ;;  %v3267_v45 = vmul.f32 %v4401_v24, %v4401_v24  ;;  %v3828_v8 = vpack.c.bf16 %v4401_v24, %v4401_v24  ;;  %v4403_v22 = vadd.f32 %v3052_v47, %v1540_v57 }
 0x1de   : > { %3500 = vst.msk [vmem:[%s5512_s29 + $0x18] sm:$0xf] %vm3493_vm4, %v3830_v3  ;;  %v3301_v42 = vadd.f32 %v3300_v19, %v3299_v7  ;;  %v3200_v56 = vadd.f32 %v3199_v18, %v3198_v5  ;;  %v3269_v51 = vmul.f32 %v4400_v21, %v4400_v21  ;;  %v3831_v4 = vpack.c.bf16 %v4402_v43, %v4402_v43 }
 0x1df   : > { %v3302_v44 = vsel %vm444_vm1, %v3267_v45, 0.0  ;;  %3498 = vst.msk [vmem:[%s5512_s29 + $0x10] sm:$0xf] %vm3493_vm4, %v3828_v8  ;;  %v3201_v9 = vsel %vm444_vm1, %v4403_v22, 0.0  ;;  %v3268_v37 = vmul.f32 %v4403_v22, %v4403_v22  ;;  %v3829_v15 = vpack.c.bf16 %v4403_v22, %v4403_v22 }
 0x1e0   : > { %v3303_v49 = vadd.f32 %v3302_v44, %v3301_v42  ;;  %3501 = vst.msk [vmem:[%s5512_s29 + $0x1c] sm:$0xf] %vm3493_vm4, %v3831_v4  ;;  %v3202_v58 = vadd.f32 %v3201_v9, %v3200_v56  ;;  %v3203_v48 = vsel %vm444_vm1, %v4400_v21, 0.0  ;;  %v3270_v57 = vmul.f32 %v4402_v43, %v4402_v43 }
 0x1e1   : > { %v4372_v31 = vpop.f32.mrb[8].mxu0  ;;  %v3304_v62 = vsel %vm444_vm1, %v3268_v37, 0.0  ;;  %3499 = vst.msk [vmem:[%s5512_s29 + $0x14] sm:$0xf] %vm3493_vm4, %v3829_v15  ;;  %v3306_v35 = vsel %vm444_vm1, %v3269_v51, 0.0  ;;  %v3205_v46 = vsel %vm444_vm1, %v4402_v43, 0.0 }
 0x1e2   : > { %v4404_v63 = vadd.f32 %v4372_v31, %v5493_v34  ;;  %v3065_v53 = vpop.f32.mrb[9].mxu0  ;;  %v3204_v26 = vadd.f32 %v3203_v48, %v3202_v58  ;;  %v3305_v36 = vadd.f32 %v3304_v62, %v3303_v49 }
 0x1e3   : > { %v4405_v2 = vadd.f32 %v3065_v53, %v5495_v60  ;;  %v4373_v32 = vpop.f32.mrb[10].mxu0  ;;  %v3308_v60 = vsel %vm444_vm1, %v3270_v57, 0.0 }
 0x1e4   : > { %v3068_v34 = vpop.f32.mrb[11].mxu0  ;;  %v3834_v38 = vpack.c.bf16 %v4404_v63, %v4404_v63  ;;  %v3307_v52 = vadd.f32 %v3306_v35, %v3305_v36  ;;  %v3206_v59 = vadd.f32 %v3205_v46, %v3204_v26  ;;  %v4406_v54 = vadd.f32 %v4373_v32, %v5497_v0 }
 0x1e5   : > { %v3207_v39 = vsel %vm444_vm1, %v4405_v2, 0.0  ;;  %v3271_v50 = vmul.f32 %v4405_v2, %v4405_v2  ;;  %v3832_v30 = vpack.c.bf16 %v4405_v2, %v4405_v2  ;;  %v4407_v10 = vadd.f32 %v3068_v34, %v5499_v6 }
 0x1e6   : > { %3504 = vst.msk [vmem:[%s5512_s29 + $0x28] sm:$0xf] %vm3493_vm4, %v3834_v38  ;;  %v3273_v61 = vmul.f32 %v4404_v63, %v4404_v63  ;;  %v3208_v25 = vadd.f32 %v3207_v39, %v3206_v59  ;;  %v3309_v28 = vadd.f32 %v3308_v60, %v3307_v52  ;;  %v3835_v29 = vpack.c.bf16 %v4406_v54, %v4406_v54 }
 0x1e7   : > { %v3310_v16 = vsel %vm444_vm1, %v3271_v50, 0.0  ;;  %3502 = vst.msk [vmem:[%s5512_s29 + $0x20] sm:$0xf] %vm3493_vm4, %v3832_v30  ;;  %v3209_v55 = vsel %vm444_vm1, %v4407_v10, 0.0  ;;  %v3272_v1 = vmul.f32 %v4407_v10, %v4407_v10  ;;  %v3833_v0 = vpack.c.bf16 %v4407_v10, %v4407_v10 }
 0x1e8   : > { %v3311_v14 = vadd.f32 %v3310_v16, %v3309_v28  ;;  %v3210_v27 = vadd.f32 %v3209_v55, %v3208_v25  ;;  %v3211_v11 = vsel %vm444_vm1, %v4404_v63, 0.0  ;;  %v3274_v24 = vmul.f32 %v4406_v54, %v4406_v54  ;;  %3505 = vst.msk [vmem:[%s5512_s29 + $0x2c] sm:$0xf] %vm3493_vm4, %v3835_v29 }
 0x1e9   : > { %v4376_v20 = vpop.f32.mrb[12].mxu0  ;;  %v3312_v6 = vsel %vm444_vm1, %v3272_v1, 0.0  ;;  %3503 = vst.msk [vmem:[%s5512_s29 + $0x24] sm:$0xf] %vm3493_vm4, %v3833_v0  ;;  %v3314_v19 = vsel %vm444_vm1, %v3273_v61, 0.0  ;;  %v3213_v7 = vsel %vm444_vm1, %v4406_v54, 0.0 }
 0x1ea   : > { %v4408_v21 = vadd.f32 %v4376_v20, %v5501_v41  ;;  %v3081_v23 = vpop.f32.mrb[13].mxu0  ;;  %v3212_v41 = vadd.f32 %v3211_v11, %v3210_v27  ;;  %v3313_v3 = vadd.f32 %v3312_v6, %v3311_v14 }
 0x1eb   : > { %v4409_v17 = vadd.f32 %v3081_v23, %v5503_v13  ;;  %v4377_v33 = vpop.f32.mrb[14].mxu0  ;;  %v3316_v13 = vsel %vm444_vm1, %v3274_v24, 0.0 }
 0x1ec   : > { %v3084_v47 = vpop.f32.mrb[15].mxu0  ;;  %v3838_v5 = vpack.c.bf16 %v4408_v21, %v4408_v21  ;;  %v3315_v42 = vadd.f32 %v3314_v19, %v3313_v3  ;;  %v3214_v43 = vadd.f32 %v3213_v7, %v3212_v41  ;;  %v4410_v22 = vadd.f32 %v4377_v33, %v5505_v12 }
 0x1ed   : > { %v3215_v18 = vsel %vm444_vm1, %v4409_v17, 0.0  ;;  %v3275_v45 = vmul.f32 %v4409_v17, %v4409_v17  ;;  %v3836_v8 = vpack.c.bf16 %v4409_v17, %v4409_v17  ;;  %v4411_v44 = vadd.f32 %v3084_v47, %v5514_v40 }
 0x1ee   : > { %3508 = vst.msk [vmem:[%s5512_s29 + $0x38] sm:$0xf] %vm3493_vm4, %v3838_v5  ;;  %v3277_v51 = vmul.f32 %v4408_v21, %v4408_v21  ;;  %v3216_v49 = vadd.f32 %v3215_v18, %v3214_v43  ;;  %v3317_v4 = vadd.f32 %v3316_v13, %v3315_v42  ;;  %v3839_v9 = vpack.c.bf16 %v4410_v22, %v4410_v22 }
 0x1ef   : > { %v3318_v56 = vsel %vm444_vm1, %v3275_v45, 0.0  ;;  %3506 = vst.msk [vmem:[%s5512_s29 + $0x30] sm:$0xf] %vm3493_vm4, %v3836_v8  ;;  %v3217_v37 = vsel %vm444_vm1, %v4411_v44, 0.0  ;;  %v3276_v15 = vmul.f32 %v4411_v44, %v4411_v44  ;;  %v3837_v12 = vpack.c.bf16 %v4411_v44, %v4411_v44 }
 0x1f0   : > { %v3319_v58 = vadd.f32 %v3318_v56, %v3317_v4  ;;  %v3218_v63 = vadd.f32 %v3217_v37, %v3216_v49  ;;  %v3219_v48 = vsel %vm444_vm1, %v4408_v21, 0.0  ;;  %v3278_v57 = vmul.f32 %v4410_v22, %v4410_v22  ;;  %3509 = vst.msk [vmem:[%s5512_s29 + $0x3c] sm:$0xf] %vm3493_vm4, %v3839_v9 }
 0x1f1   : > { %v4380_v31 = vpop.f32.mrb[16].mxu0  ;;  %v3320_v40 = vsel %vm444_vm1, %v3276_v15, 0.0  ;;  %3507 = vst.msk [vmem:[%s5512_s29 + $0x34] sm:$0xf] %vm3493_vm4, %v3837_v12  ;;  %v3322_v46 = vsel %vm444_vm1, %v3277_v51, 0.0  ;;  %v3221_v26 = vsel %vm444_vm1, %v4410_v22, 0.0 }
 0x1f2   : > { %v3097_v53 = vpop.f32.mrb[17].mxu0  ;;  %v3220_v2 = vadd.f32 %v3219_v48, %v3218_v63  ;;  %v3321_v32 = vadd.f32 %v3320_v40, %v3319_v58  ;;  %v3324_v38 = vsel %vm444_vm1, %v3278_v57, 0.0 }
 0x1f3   : > { %v4381_v62 = vpop.f32.mrb[18].mxu0 }
 0x1f4   : > { %v3100_v35 = vpop.f32.mrb[19].mxu0  ;;  %v3323_v36 = vadd.f32 %v3322_v46, %v3321_v32  ;;  %v3222_v34 = vadd.f32 %v3221_v26, %v3220_v2 }
 0x1f6   : > { %v3325_v50 = vadd.f32 %v3324_v38, %v3323_v36 }
 0x1f8   : > { %v4244_v39 = vpop.f32.mrb[16].mxu1 }
 0x1f9   : > { %v4412_v30 = vadd.f32 %v4380_v31, %v4244_v39  ;;  %v1847_v52 = vpop.f32.mrb[17].mxu1  ;;  %v4384_v59 = vpop.f32.mrb[20].mxu0 }
 0x1fa   : > { %v4413_v54 = vadd.f32 %v3097_v53, %v1847_v52  ;;  %v4245_v60 = vpop.f32.mrb[18].mxu1  ;;  %v3113_v16 = vpop.f32.mrb[21].mxu0 }
 0x1fb   : > { %v3842_v10 = vpack.c.bf16 %v4412_v30, %v4412_v30  ;;  %v4414_v61 = vadd.f32 %v4381_v62, %v4245_v60  ;;  %v1850_v25 = vpop.f32.mrb[19].mxu1  ;;  %v4385_v28 = vpop.f32.mrb[22].mxu0  ;;  %v3281_v14 = vmul.f32 %v4412_v30, %v4412_v30  ;;  %v3227_v7 = vsel %vm444_vm1, %v4412_v30, 0.0 }
 0x1fc   : > { %v3223_v29 = vsel %vm444_vm1, %v4413_v54, 0.0  ;;  %v3279_v55 = vmul.f32 %v4413_v54, %v4413_v54  ;;  %v3840_v1 = vpack.c.bf16 %v4413_v54, %v4413_v54  ;;  %v4415_v0 = vadd.f32 %v3100_v35, %v1850_v25  ;;  %v3116_v20 = vpop.f32.mrb[23].mxu0 }
 0x1fd   : > { %3512 = vst.msk [vmem:[%s5512_s29 + $0x48] sm:$0xf] %vm3493_vm4, %v3842_v10  ;;  %v3224_v27 = vadd.f32 %v3223_v29, %v3222_v34  ;;  %v3843_v23 = vpack.c.bf16 %v4414_v61, %v4414_v61  ;;  %v3282_v17 = vmul.f32 %v4414_v61, %v4414_v61  ;;  %v3330_v42 = vsel %vm444_vm1, %v3281_v14, 0.0 }
 0x1fe   : > { %v3326_v21 = vsel %vm444_vm1, %v3279_v55, 0.0  ;;  %3510 = vst.msk [vmem:[%s5512_s29 + $0x40] sm:$0xf] %vm3493_vm4, %v3840_v1  ;;  %v3225_v11 = vsel %vm444_vm1, %v4415_v0, 0.0  ;;  %v3280_v24 = vmul.f32 %v4415_v0, %v4415_v0  ;;  %v3841_v19 = vpack.c.bf16 %v4415_v0, %v4415_v0 }
 0x1ff   : > { %v3327_v6 = vadd.f32 %v3326_v21, %v3325_v50  ;;  %v3226_v33 = vadd.f32 %v3225_v11, %v3224_v27  ;;  %3513 = vst.msk [vmem:[%s5512_s29 + $0x4c] sm:$0xf] %vm3493_vm4, %v3843_v23  ;;  %v3229_v56 = vsel %vm444_vm1, %v4414_v61, 0.0  ;;  %v3332_v44 = vsel %vm444_vm1, %v3282_v17, 0.0 }
 0x200   : > { %v3328_v41 = vsel %vm444_vm1, %v3280_v24, 0.0  ;;  %v4248_v3 = vpop.f32.mrb[20].mxu1  ;;  %3511 = vst.msk [vmem:[%s5512_s29 + $0x44] sm:$0xf] %vm3493_vm4, %v3841_v19 }
 0x201   : > { %v3228_v47 = vadd.f32 %v3227_v7, %v3226_v33  ;;  %v3329_v5 = vadd.f32 %v3328_v41, %v3327_v6  ;;  %v4416_v18 = vadd.f32 %v4384_v59, %v4248_v3  ;;  %v1863_v45 = vpop.f32.mrb[21].mxu1  ;;  %v4388_v8 = vpop.f32.mrb[24].mxu0 }
 0x202   : > { %v4417_v43 = vadd.f32 %v3113_v16, %v1863_v45  ;;  %v4249_v22 = vpop.f32.mrb[22].mxu1  ;;  %v3129_v13 = vpop.f32.mrb[25].mxu0 }
 0x203   : > { %v3331_v51 = vadd.f32 %v3330_v42, %v3329_v5  ;;  %v3846_v49 = vpack.c.bf16 %v4416_v18, %v4416_v18  ;;  %v1866_v4 = vpop.f32.mrb[23].mxu1  ;;  %v4389_v9 = vpop.f32.mrb[26].mxu0  ;;  %v3230_v37 = vadd.f32 %v3229_v56, %v3228_v47  ;;  %v4418_v53 = vadd.f32 %v4385_v28, %v4249_v22 }
 0x204   : > { %v3231_v15 = vsel %vm444_vm1, %v4417_v43, 0.0  ;;  %v3283_v12 = vmul.f32 %v4417_v43, %v4417_v43  ;;  %v3844_v31 = vpack.c.bf16 %v4417_v43, %v4417_v43  ;;  %v3132_v58 = vpop.f32.mrb[27].mxu0  ;;  %v4419_v48 = vadd.f32 %v3116_v20, %v1866_v4 }
 0x205   : > { %3516 = vst.msk [vmem:[%s5512_s29 + $0x58] sm:$0xf] %vm3493_vm4, %v3846_v49  ;;  %v3333_v63 = vadd.f32 %v3332_v44, %v3331_v51  ;;  %v3232_v57 = vadd.f32 %v3231_v15, %v3230_v37  ;;  %v3285_v62 = vmul.f32 %v4416_v18, %v4416_v18  ;;  %v3847_v32 = vpack.c.bf16 %v4418_v53, %v4418_v53 }
 0x206   : > { %v3334_v40 = vsel %vm444_vm1, %v3283_v12, 0.0  ;;  %3514 = vst.msk [vmem:[%s5512_s29 + $0x50] sm:$0xf] %vm3493_vm4, %v3844_v31  ;;  %v3233_v35 = vsel %vm444_vm1, %v4419_v48, 0.0  ;;  %v3284_v46 = vmul.f32 %v4419_v48, %v4419_v48  ;;  %v3845_v26 = vpack.c.bf16 %v4419_v48, %v4419_v48 }
 0x207   : > { %v3335_v2 = vadd.f32 %v3334_v40, %v3333_v63  ;;  %3517 = vst.msk [vmem:[%s5512_s29 + $0x5c] sm:$0xf] %vm3493_vm4, %v3847_v32  ;;  %v3234_v34 = vadd.f32 %v3233_v35, %v3232_v57  ;;  %v3235_v30 = vsel %vm444_vm1, %v4416_v18, 0.0  ;;  %v3286_v52 = vmul.f32 %v4418_v53, %v4418_v53 }
 0x208   : > { %v4252_v36 = vpop.f32.mrb[24].mxu1  ;;  %v3336_v59 = vsel %vm444_vm1, %v3284_v46, 0.0  ;;  %3515 = vst.msk [vmem:[%s5512_s29 + $0x54] sm:$0xf] %vm3493_vm4, %v3845_v26  ;;  %v3338_v10 = vsel %vm444_vm1, %v3285_v62, 0.0  ;;  %v3237_v61 = vsel %vm444_vm1, %v4418_v53, 0.0 }
 0x209   : > { %v4420_v38 = vadd.f32 %v4388_v8, %v4252_v36  ;;  %v1879_v39 = vpop.f32.mrb[25].mxu1  ;;  %v4392_v50 = vpop.f32.mrb[28].mxu0  ;;  %v3236_v25 = vadd.f32 %v3235_v30, %v3234_v34  ;;  %v3337_v28 = vadd.f32 %v3336_v59, %v3335_v2  ;;  %v3340_v24 = vsel %vm444_vm1, %v3286_v52, 0.0 }
 0x20a   : > { %v4421_v54 = vadd.f32 %v3129_v13, %v1879_v39  ;;  %v4253_v60 = vpop.f32.mrb[26].mxu1  ;;  %v3145_v16 = vpop.f32.mrb[29].mxu0 }
 0x20b   : > { %v1882_v29 = vpop.f32.mrb[27].mxu1  ;;  %v4393_v55 = vpop.f32.mrb[30].mxu0  ;;  %v3850_v1 = vpack.c.bf16 %v4420_v38, %v4420_v38  ;;  %v3339_v21 = vadd.f32 %v3338_v10, %v3337_v28  ;;  %v3238_v23 = vadd.f32 %v3237_v61, %v3236_v25  ;;  %v4422_v11 = vadd.f32 %v4389_v9, %v4253_v60 }
 0x20c   : > { %v3239_v0 = vsel %vm444_vm1, %v4421_v54, 0.0  ;;  %v3287_v20 = vmul.f32 %v4421_v54, %v4421_v54  ;;  %v3848_v14 = vpack.c.bf16 %v4421_v54, %v4421_v54  ;;  %v3148_v27 = vpop.f32.mrb[31].mxu0  ;;  %v4423_v17 = vadd.f32 %v3132_v58, %v1882_v29 }
 0x20d   : > { %3520 = vst.msk [vmem:[%s5512_s29 + $0x68] sm:$0xf] %vm3493_vm4, %v3850_v1  ;;  %v3289_v33 = vmul.f32 %v4420_v38, %v4420_v38  ;;  %v3240_v19 = vadd.f32 %v3239_v0, %v3238_v23  ;;  %v3341_v7 = vadd.f32 %v3340_v24, %v3339_v21  ;;  %v3851_v41 = vpack.c.bf16 %v4422_v11, %v4422_v11 }
 0x20e   : > { %v3342_v6 = vsel %vm444_vm1, %v3287_v20, 0.0  ;;  %3518 = vst.msk [vmem:[%s5512_s29 + $0x60] sm:$0xf] %vm3493_vm4, %v3848_v14  ;;  %v3241_v3 = vsel %vm444_vm1, %v4423_v17, 0.0  ;;  %v3288_v47 = vmul.f32 %v4423_v17, %v4423_v17  ;;  %v3849_v5 = vpack.c.bf16 %v4423_v17, %v4423_v17 }
 0x20f   : > { %v3343_v45 = vadd.f32 %v3342_v6, %v3341_v7  ;;  %v3242_v8 = vadd.f32 %v3241_v3, %v3240_v19  ;;  %v3243_v22 = vsel %vm444_vm1, %v4420_v38, 0.0  ;;  %v3290_v13 = vmul.f32 %v4422_v11, %v4422_v11  ;;  %3521 = vst.msk [vmem:[%s5512_s29 + $0x6c] sm:$0xf] %vm3493_vm4, %v3851_v41 }
 0x210   : > { %v4256_v18 = vpop.f32.mrb[28].mxu1  ;;  %v3344_v56 = vsel %vm444_vm1, %v3288_v47, 0.0  ;;  %3519 = vst.msk [vmem:[%s5512_s29 + $0x64] sm:$0xf] %vm3493_vm4, %v3849_v5  ;;  %v3346_v49 = vsel %vm444_vm1, %v3289_v33, 0.0  ;;  %v3245_v4 = vsel %vm444_vm1, %v4422_v11, 0.0 }
 0x211   : > { %v4424_v42 = vadd.f32 %v4392_v50, %v4256_v18  ;;  %v1895_v43 = vpop.f32.mrb[29].mxu1  ;;  %v3244_v9 = vadd.f32 %v3243_v22, %v3242_v8  ;;  %v3345_v37 = vadd.f32 %v3344_v56, %v3343_v45  ;;  %v3348_v40 = vsel %vm444_vm1, %v3290_v13, 0.0 }
 0x212   : > { %v4425_v44 = vadd.f32 %v3145_v16, %v1895_v43  ;;  %v4257_v51 = vpop.f32.mrb[30].mxu1 }
 0x213   : > { %v1898_v15 = vpop.f32.mrb[31].mxu1  ;;  %v3854_v12 = vpack.c.bf16 %v4424_v42, %v4424_v42  ;;  %v3347_v53 = vadd.f32 %v3346_v49, %v3345_v37  ;;  %v3246_v48 = vadd.f32 %v3245_v4, %v3244_v9  ;;  %v4426_v57 = vadd.f32 %v4393_v55, %v4257_v51 }
 0x214   : > { %v3247_v31 = vsel %vm444_vm1, %v4425_v44, 0.0  ;;  %v3291_v58 = vmul.f32 %v4425_v44, %v4425_v44  ;;  %v3852_v63 = vpack.c.bf16 %v4425_v44, %v4425_v44  ;;  %v4427_v2 = vadd.f32 %v3148_v27, %v1898_v15 }
 0x215   : > { %3524 = vst.msk [vmem:[%s5512_s29 + $0x78] sm:$0xf] %vm3493_vm4, %v3854_v12  ;;  %v3293_v32 = vmul.f32 %v4424_v42, %v4424_v42  ;;  %v3248_v35 = vadd.f32 %v3247_v31, %v3246_v48  ;;  %v3349_v46 = vadd.f32 %v3348_v40, %v3347_v53  ;;  %v3855_v26 = vpack.c.bf16 %v4426_v57, %v4426_v57 }
 0x216   : > { %v3350_v62 = vsel %vm444_vm1, %v3291_v58, 0.0  ;;  %3522 = vst.msk [vmem:[%s5512_s29 + $0x70] sm:$0xf] %vm3493_vm4, %v3852_v63  ;;  %v3249_v36 = vsel %vm444_vm1, %v4427_v2, 0.0  ;;  %v3292_v34 = vmul.f32 %v4427_v2, %v4427_v2  ;;  %v3853_v38 = vpack.c.bf16 %v4427_v2, %v4427_v2 }
 0x217   : > { %v3351_v39 = vadd.f32 %v3350_v62, %v3349_v46  ;;  %v3250_v50 = vadd.f32 %v3249_v36, %v3248_v35  ;;  %v3251_v30 = vsel %vm444_vm1, %v4424_v42, 0.0  ;;  %v3294_v52 = vmul.f32 %v4426_v57, %v4426_v57  ;;  %3525 = vst.msk [vmem:[%s5512_s29 + $0x7c] sm:$0xf] %vm3493_vm4, %v3855_v26 }
 0x218   : > { %v3352_v59 = vsel %vm444_vm1, %v3292_v34, 0.0  ;;  %3523 = vst.msk [vmem:[%s5512_s29 + $0x74] sm:$0xf] %vm3493_vm4, %v3853_v38  ;;  %v3354_v16 = vsel %vm444_vm1, %v3293_v32, 0.0  ;;  %v3253_v10 = vsel %vm444_vm1, %v4426_v57, 0.0 }
 0x219   : > { %v3252_v54 = vadd.f32 %v3251_v30, %v3250_v50  ;;  %v3353_v60 = vadd.f32 %v3352_v59, %v3351_v39  ;;  %v3356_v28 = vsel %vm444_vm1, %v3294_v52, 0.0 }
 0x21b   : > { %v3254_v61 = vadd.f32 %v3253_v10, %v3252_v54  ;;  %v3355_v25 = vadd.f32 %v3354_v16, %v3353_v60 }
 0x21d   : > { %v3255_v29 = vrot.slane %v3254_v61, 4  ;;  %v3357_v55 = vadd.f32 %v3356_v28, %v3355_v25 }
 0x21f   : > { %v3256_v1 = vadd.f32 %v3255_v29, %v3254_v61  ;;  %v3358_v0 = vrot.slane %v3357_v55, 4 }
 0x221   : > { %v3257_v20 = vrot.slane %v3256_v1, 2  ;;  %v3359_v14 = vadd.f32 %v3358_v0, %v3357_v55 }
 0x223   : > { %v3258_v27 = vadd.f32 %v3257_v20, %v3256_v1  ;;  %v3360_v21 = vrot.slane %v3359_v14, 2 }
 0x225   : > { %v3259_v23 = vrot.slane %v3258_v27, 1  ;;  %v3361_v11 = vadd.f32 %v3360_v21, %v3359_v14 }
 0x227   : > { %v3260_v24 = vadd.f32 %v3259_v23, %v3258_v27  ;;  %v3362_v6 = vrot.slane %v3361_v11, 1 }
 0x229   : > { %3262 = vst.msk [vmem:[%s265_s8] sm:$0x1] %vm3261_vm5, %v3260_v24  ;;  %v3363_v17 = vadd.f32 %v3362_v6, %v3361_v11 }
 0x22b   : > { %3364 = vst.msk [vmem:[%s268_s11] sm:$0x1] %vm3261_vm5, %v3363_v17 }
 0x22c PF: > { %s17_s21 = sadd.s32 1, %s4678_s21  }
 0x22d   : > { %p14_p4 = scmp.ge.s32.totalorder %s17_s21, 4  }
 0x22f   :  { %16 = sbr.rel (!%p14_p4) target bundleno = 1 (0x1), region = 98 }

</bundles_post_ra>
